<compile_context>
chip_gen: v5e
topology: v5e:2x2
jax: 0.10.0
libtpu: 0.0.40
codegen_flags: <defaults>
</compile_context>

<pallas_src>
import functools
import math

import jax
import jax.numpy as jnp
from jax import lax
from jax.experimental import pallas as pl
from jax.experimental.pallas import tpu as pltpu


# ----------------------------------------------------------------------------
# In-kernel helpers
# ----------------------------------------------------------------------------
def _folded_conv(src, wk_ref, b_ref, *, hin, win, cin, cout, f, apply_silu):
    """Conv2d(k=4, s=2, p=1) + optional SiLU on a W-folded input.

    src    : ref, shape (hin + 2, win // (2*f) + 1, 2*f*cin) with
             src[r, u, s*cin + c] == x_padded[r, 2*f*u + s, c].
    wk_ref : ref, shape (4, 4*cin, cout); row (kw*cin + c) of wk[kh] is the
             PyTorch weight W[co, c, kh, kw].
    b_ref  : ref, shape (1, 1, cout).
    Returns f groups; group t has shape (hout, wout//f, cout) == out[:, t::f, :].
    """
    hout, wout = hin // 2, win // 2
    wgrp = wout // f
    twof = 2 * f
    hh = hin // 2 + 1
    bias = b_ref[...]                                    # (1, 1, cout)

    outs = []
    for t in range(f):
        acc = jnp.zeros((hout, wgrp, cout), jnp.float32)
        for kh in range(4):
            m, p = kh // 2, kh % 2
            kw = 0
            while kw < 4:
                # Contiguous slab of kw-taps: column 2*ow + kw maps to
                # (u = b + delta, s) in the folded layout.
                v = 2 * t + kw
                delta, s = v // twof, v % twof
                n = min(4 - kw, twof - s)                # taps in this slab
                # (hin+2, wgrp, n*cin): contiguous static ref slices only.
                chunk = src[:, delta:delta + wgrp, s * cin:(s + n) * cin]
                # Rows 2*oh + kh via a leading-dim split (layout-free reshape).
                chunk = chunk.reshape(hh, 2, wgrp, n * cin)[m:m + hout, p]
                # (n*cin, cout) weight slab; broadcast for a batched matmul
                # (same batched dot_general pattern as flash-attention).
                wslab = wk_ref[kh, kw * cin:(kw + n) * cin, :]
                wslab = jnp.broadcast_to(wslab, (hout, n * cin, cout))
                acc = acc + jnp.einsum(
                    "hwk,hkc->hwc", chunk, wslab,
                    preferred_element_type=jnp.float32)
                kw += n
        acc = acc + bias
        if apply_silu:
            acc = acc * jax.nn.sigmoid(acc)              # fused SiLU
        outs.append(acc)
    return outs


def _store_folded(groups, dst_ref, *, f, cout):
    """Scatter the f output groups into the next layer's zero-padded folded buffer."""
    hout, wgrp = groups[0].shape[0], groups[0].shape[1]
    for t in range(f):
        u_off, s = (0, t + 1) if t + 1 < f else (1, 0)
        dst_ref[1:hout + 1, u_off:u_off + wgrp, s * cout:(s + 1) * cout] = groups[t]


def _downsampler_kernel(xf_ref, w1_ref, b1_ref, w2_ref, b2_ref, w3_ref, b3_ref,
                        o_ref, xf2_ref, xf3_ref, *, H, W, cin, cmid, cout):
    # Zero-init the padded VMEM intermediates (their 1-pixel halo must be 0).
    xf2_ref[...] = jnp.zeros_like(xf2_ref)
    xf3_ref[...] = jnp.zeros_like(xf3_ref)

    # Conv1 (cin->cmid) + SiLU : output written W-folded by 4 into VMEM scratch.
    g1 = _folded_conv(xf_ref, w1_ref, b1_ref, hin=H, win=W, cin=cin,
                      cout=cmid, f=4, apply_silu=True)
    _store_folded(g1, xf2_ref, f=4, cout=cmid)

    # Conv2 (cmid->cmid) + SiLU : output written W-folded by 2 into VMEM scratch.
    g2 = _folded_conv(xf2_ref, w2_ref, b2_ref, hin=H // 2, win=W // 2, cin=cmid,
                      cout=cmid, f=2, apply_silu=True)
    _store_folded(g2, xf3_ref, f=2, cout=cmid)

    # Conv3 (cmid->cout), no activation : single group == the NHWC output tile.
    g3 = _folded_conv(xf3_ref, w3_ref, b3_ref, hin=H // 4, win=W // 4, cin=cmid,
                      cout=cout, f=1, apply_silu=False)
    o_ref[...] = g3[0].astype(o_ref.dtype)


# ----------------------------------------------------------------------------
# Wrapper (NCHW in, NCHW out — matches the PyTorch module)
# ----------------------------------------------------------------------------
def _tiled_bytes(shape, itemsize=4):
    s = list(shape)
    s[-1] = -(-s[-1] // 128) * 128
    s[-2] = -(-s[-2] // 8) * 8
    return math.prod(s) * itemsize


def grounding_downsampler_forward(x_nchw, params):
    N, Cin, H, W = x_nchw.shape
    assert H % 8 == 0 and W % 8 == 0, "H and W must be multiples of 8"
    w1, b1 = params["w1"], params["b1"]
    w2, b2 = params["w2"], params["b2"]
    w3, b3 = params["w3"], params["b3"]
    Cmid, Cout = w1.shape[0], w3.shape[0]
    H2, H4, H8, W8 = H // 2, H // 4, H // 8, W // 8
    U = W8 + 1                           # folded-W block count (same every layer)

    # Cheap XLA-side prep (one pass over the input; no 16x im2col blow-up).
    # Folded input: xf1[n, r, u, s*Cin + c] = x_pad[n, r, 8*u + s, c]
    xh = jnp.transpose(x_nchw, (0, 2, 3, 1)).astype(jnp.float32)      # NHWC
    xp = jnp.pad(xh, ((0, 0), (1, 1), (1, 7), (0, 0)))                # pad=1 (+fold slack)
    xf1 = xp.reshape(N, H + 2, U, 8, Cin).reshape(N, H + 2, U, 8 * Cin)

    def prep_w(w):                       # OIHW -> (4, 4*ci, co), rows ordered (kw, ci)
        co, ci = w.shape[0], w.shape[1]
        return (jnp.transpose(w, (2, 3, 1, 0))
                .reshape(4, 4 * ci, co).astype(jnp.float32))

    wk1, wk2, wk3 = prep_w(w1), prep_w(w2), prep_w(w3)
    bb1 = b1.reshape(1, 1, Cmid).astype(jnp.float32)
    bb2 = b2.reshape(1, 1, Cmid).astype(jnp.float32)
    bb3 = b3.reshape(1, 1, Cout).astype(jnp.float32)

    # VMEM budget: double-buffered input/output blocks + the two VMEM intermediates.
    vmem_need = (2 * _tiled_bytes((H + 2, U, 8 * Cin))
                 + 2 * _tiled_bytes((H8, W8, Cout))
                 + _tiled_bytes((H2 + 2, U, 4 * Cmid))
                 + _tiled_bytes((H4 + 2, U, 2 * Cmid))
                 + (4 << 20))
    vmem_limit = int(min(max(vmem_need, 16 << 20), 100 << 20))
    # TODO(synk): add spatial (halo) tiling so very large H*W images also fit
    # v7x's 64 MiB VMEM; current blocks are whole-image per batch element.

    kernel = functools.partial(_downsampler_kernel, H=H, W=W,
                               cin=Cin, cmid=Cmid, cout=Cout)
    out_nhwc = pl.pallas_call(
        kernel,
        out_shape=jax.ShapeDtypeStruct((N, H8, W8, Cout), jnp.float32),
        grid=(N,),
        in_specs=[
            pl.BlockSpec((None, H + 2, U, 8 * Cin), lambda n: (n, 0, 0, 0)),
            pl.BlockSpec((4, 4 * Cin, Cmid), lambda n: (0, 0, 0)),
            pl.BlockSpec((1, 1, Cmid), lambda n: (0, 0, 0)),
            pl.BlockSpec((4, 4 * Cmid, Cmid), lambda n: (0, 0, 0)),
            pl.BlockSpec((1, 1, Cmid), lambda n: (0, 0, 0)),
            pl.BlockSpec((4, 4 * Cmid, Cout), lambda n: (0, 0, 0)),
            pl.BlockSpec((1, 1, Cout), lambda n: (0, 0, 0)),
        ],
        out_specs=pl.BlockSpec((None, H8, W8, Cout), lambda n: (n, 0, 0, 0)),
        scratch_shapes=[
            pltpu.VMEM((H2 + 2, U, 4 * Cmid), jnp.float32),   # conv1 out (folded x4)
            pltpu.VMEM((H4 + 2, U, 2 * Cmid), jnp.float32),   # conv2 out (folded x2)
        ],
        compiler_params=pltpu.CompilerParams(
            dimension_semantics=("parallel",),   # batch across cores (v7x dual-TC)
            vmem_limit_bytes=vmem_limit,
        ),
    )(xf1, wk1, bb1, wk2, bb2, wk3, bb3)

    return jnp.transpose(out_nhwc, (0, 3, 1, 2)).astype(x_nchw.dtype)  # NHWC -> NCHW


# ----------------------------------------------------------------------------
# Parameter init (matches nn.Conv2d defaults) and pure-JAX reference
# ----------------------------------------------------------------------------
def init_params(key, in_dim=3, mid_dim=4, out_dim=8, dtype=jnp.float32):
    ks = jax.random.split(key, 6)

    def conv_init(kw_key, kb_key, cout, cin):
        fan_in = cin * 4 * 4
        bound = 1.0 / jnp.sqrt(fan_in)
        w = jax.random.uniform(kw_key, (cout, cin, 4, 4), dtype, -bound, bound)
        b = jax.random.uniform(kb_key, (cout,), dtype, -bound, bound)
        return w, b

    w1, b1 = conv_init(ks[0], ks[1], mid_dim, in_dim)
    w2, b2 = conv_init(ks[2], ks[3], mid_dim, mid_dim)
    w3, b3 = conv_init(ks[4], ks[5], out_dim, mid_dim)
    return {"w1": w1, "b1": b1, "w2": w2, "b2": b2, "w3": w3, "b3": b3}


def _reference_forward(x_nchw, params):
    def conv(x, w, b):
        y = lax.conv_general_dilated(
            x, w, window_strides=(2, 2), padding=((1, 1), (1, 1)),
            dimension_numbers=("NCHW", "OIHW", "NCHW"))
        return y + b.reshape(1, -1, 1, 1)

    x = jax.nn.silu(conv(x_nchw, params["w1"], params["b1"]))
    x = jax.nn.silu(conv(x, params["w2"], params["b2"]))
    return conv(x, params["w3"], params["b3"])


if __name__ == "__main__":
    key = jax.random.PRNGKey(0)
    k_x, k_x2, k_p = jax.random.split(key, 3)

    params = init_params(k_p)        # module defaults: in_dim=3, mid_dim=4, out_dim=8

    for kx, shape in ((k_x, (2, 3, 16, 16)), (k_x2, (1, 3, 24, 32))):
        x = jax.random.normal(kx, shape, dtype=jnp.float32)          # NCHW
        out = jax.block_until_ready(grounding_downsampler_forward(x, params))
        ref = jax.block_until_ready(_reference_forward(x, params))
        assert out.shape == ref.shape, (out.shape, ref.shape)
        err = float(jnp.max(jnp.abs(out - ref)))
        assert err < 1e-4, f"max abs err {err} for shape {shape}"

    print("KERNEL_OK")
</pallas_src>

<mosaic_0001>
module attributes {stable_mosaic.version = 11 : i64} {
  func.func @_downsampler_kernel(%arg0: i32, %arg1: memref<1x18x3x24xf32, #tpu.memory_space<vmem>>, %arg2: memref<4x12x4xf32, #tpu.memory_space<vmem>>, %arg3: memref<1x1x4xf32, #tpu.memory_space<vmem>>, %arg4: memref<4x16x4xf32, #tpu.memory_space<vmem>>, %arg5: memref<1x1x4xf32, #tpu.memory_space<vmem>>, %arg6: memref<4x16x8xf32, #tpu.memory_space<vmem>>, %arg7: memref<1x1x8xf32, #tpu.memory_space<vmem>>, %arg8: memref<1x2x2x8xf32, #tpu.memory_space<vmem>>, %arg9: memref<10x3x16xf32, #tpu.memory_space<vmem>>, %arg10: memref<6x3x8xf32, #tpu.memory_space<vmem>>) attributes {dimension_semantics = [#tpu.dimension_semantics<parallel>], iteration_bounds = array<i64: 2>, scalar_prefetch = 0 : i64, scratch_operands = 2 : i64, tpu.core_type = #tpu.core_type<tc>, window_params = [{transform_indices = @transform_0, window_bounds = array<i64: 1, 18, 3, 24>}, {pipeline_mode = #tpu.pipeline_mode<synchronous>, transform_indices = @transform_1, window_bounds = array<i64: 4, 12, 4>}, {pipeline_mode = #tpu.pipeline_mode<synchronous>, transform_indices = @transform_2, window_bounds = array<i64: 1, 1, 4>}, {pipeline_mode = #tpu.pipeline_mode<synchronous>, transform_indices = @transform_3, window_bounds = array<i64: 4, 16, 4>}, {pipeline_mode = #tpu.pipeline_mode<synchronous>, transform_indices = @transform_4, window_bounds = array<i64: 1, 1, 4>}, {pipeline_mode = #tpu.pipeline_mode<synchronous>, transform_indices = @transform_5, window_bounds = array<i64: 4, 16, 8>}, {pipeline_mode = #tpu.pipeline_mode<synchronous>, transform_indices = @transform_6, window_bounds = array<i64: 1, 1, 8>}, {transform_indices = @transform_7, window_bounds = array<i64: 1, 2, 2, 8>}]} {
    %cst = arith.constant 0.000000e+00 : f32
    %0 = vector.broadcast %cst : f32 to vector<10x3x16xf32>
    %c0 = arith.constant 0 : index
    %c0_0 = arith.constant 0 : index
    %c0_1 = arith.constant 0 : index
    %1 = vector.load %arg9[%c0, %c0_0, %c0_1] : memref<10x3x16xf32, #tpu.memory_space<vmem>>, vector<10x3x16xf32>
    tpu.vector_store %arg9[%c0, %c0_0, %c0_1], %0 {strides = array<i32>} : memref<10x3x16xf32, #tpu.memory_space<vmem>>, vector<10x3x16xf32>,
    %cst_2 = arith.constant 0.000000e+00 : f32
    %2 = vector.broadcast %cst_2 : f32 to vector<6x3x8xf32>
    %c0_3 = arith.constant 0 : index
    %c0_4 = arith.constant 0 : index
    %c0_5 = arith.constant 0 : index
    %3 = vector.load %arg10[%c0_3, %c0_4, %c0_5] : memref<6x3x8xf32, #tpu.memory_space<vmem>>, vector<6x3x8xf32>
    tpu.vector_store %arg10[%c0_3, %c0_4, %c0_5], %2 {strides = array<i32>} : memref<6x3x8xf32, #tpu.memory_space<vmem>>, vector<6x3x8xf32>,
    %c0_6 = arith.constant 0 : index
    %c0_7 = arith.constant 0 : index
    %c0_8 = arith.constant 0 : index
    %4 = vector.load %arg3[%c0_6, %c0_7, %c0_8] : memref<1x1x4xf32, #tpu.memory_space<vmem>>, vector<1x1x4xf32>
    %cst_9 = arith.constant 0.000000e+00 : f32
    %5 = vector.broadcast %cst_9 : f32 to vector<8x2x4xf32>
    %c0_10 = arith.constant 0 : index
    %c0_11 = arith.constant 0 : index
    %c0_12 = arith.constant 0 : index
    %c0_13 = arith.constant 0 : index
    %6 = vector.load %arg1[%c0_10, %c0_11, %c0_12, %c0_13] : memref<1x18x3x24xf32, #tpu.memory_space<vmem>>, vector<1x18x2x12xf32>
    %7 = vector.shape_cast %6 : vector<1x18x2x12xf32> to vector<18x2x12xf32>
    %8 = vector.shape_cast %7 : vector<18x2x12xf32> to vector<9x2x2x12xf32>
    %9 = vector.extract_strided_slice %8 {offsets = [0, 0, 0, 0], sizes = [8, 1, 2, 12], strides = [1, 1, 1, 1]} : vector<9x2x2x12xf32> to vector<8x1x2x12xf32>
    %10 = vector.shape_cast %9 : vector<8x1x2x12xf32> to vector<8x2x12xf32>
    %c0_14 = arith.constant 0 : index
    %c0_15 = arith.constant 0 : index
    %c0_16 = arith.constant 0 : index
    %11 = vector.load %arg2[%c0_14, %c0_15, %c0_16] : memref<4x12x4xf32, #tpu.memory_space<vmem>>, vector<1x12x4xf32>
    %12 = vector.shape_cast %11 : vector<1x12x4xf32> to vector<12x4xf32>
    %13 = vector.shape_cast %12 : vector<12x4xf32> to vector<1x12x4xf32>
    %14 = vector.broadcast %13 : vector<1x12x4xf32> to vector<8x12x4xf32>
    "tpu.trace_start"() <{level = 10 : i32, message = "hwk,hkc->hwc"}> : () -> ()
    %cst_17 = arith.constant dense<0.000000e+00> : vector<8x2x4xf32>
    %15 = tpu.matmul %10, %14, %cst_17 {dimension_numbers = #tpu.dot_dimension_numbers<[2], [1], [1], [2], [0, 0, 0, 1, 1, 2], [0], [0]>} : vector<8x2x12xf32>, vector<8x12x4xf32>, vector<8x2x4xf32> -> vector<8x2x4xf32>
    "tpu.trace_stop"() : () -> ()
    %16 = arith.addf %5, %15 : vector<8x2x4xf32>
    %c0_18 = arith.constant 0 : index
    %c0_19 = arith.constant 0 : index
    %c0_20 = arith.constant 0 : index
    %c0_21 = arith.constant 0 : index
    %17 = vector.load %arg1[%c0_18, %c0_19, %c0_20, %c0_21] : memref<1x18x3x24xf32, #tpu.memory_space<vmem>>, vector<1x18x2x12xf32>
    %18 = vector.shape_cast %17 : vector<1x18x2x12xf32> to vector<18x2x12xf32>
    %19 = vector.shape_cast %18 : vector<18x2x12xf32> to vector<9x2x2x12xf32>
    %20 = vector.extract_strided_slice %19 {offsets = [0, 1, 0, 0], sizes = [8, 1, 2, 12], strides = [1, 1, 1, 1]} : vector<9x2x2x12xf32> to vector<8x1x2x12xf32>
    %21 = vector.shape_cast %20 : vector<8x1x2x12xf32> to vector<8x2x12xf32>
    %c1 = arith.constant 1 : index
    %c0_22 = arith.constant 0 : index
    %c0_23 = arith.constant 0 : index
    %22 = vector.load %arg2[%c1, %c0_22, %c0_23] : memref<4x12x4xf32, #tpu.memory_space<vmem>>, vector<1x12x4xf32>
    %23 = vector.shape_cast %22 : vector<1x12x4xf32> to vector<12x4xf32>
    %24 = vector.shape_cast %23 : vector<12x4xf32> to vector<1x12x4xf32>
    %25 = vector.broadcast %24 : vector<1x12x4xf32> to vector<8x12x4xf32>
    "tpu.trace_start"() <{level = 10 : i32, message = "hwk,hkc->hwc"}> : () -> ()
    %cst_24 = arith.constant dense<0.000000e+00> : vector<8x2x4xf32>
    %26 = tpu.matmul %21, %25, %cst_24 {dimension_numbers = #tpu.dot_dimension_numbers<[2], [1], [1], [2], [0, 0, 0, 1, 1, 2], [0], [0]>} : vector<8x2x12xf32>, vector<8x12x4xf32>, vector<8x2x4xf32> -> vector<8x2x4xf32>
    "tpu.trace_stop"() : () -> ()
    %27 = arith.addf %16, %26 : vector<8x2x4xf32>
    %c0_25 = arith.constant 0 : index
    %c0_26 = arith.constant 0 : index
    %c0_27 = arith.constant 0 : index
    %c0_28 = arith.constant 0 : index
    %28 = vector.load %arg1[%c0_25, %c0_26, %c0_27, %c0_28] : memref<1x18x3x24xf32, #tpu.memory_space<vmem>>, vector<1x18x2x12xf32>
    %29 = vector.shape_cast %28 : vector<1x18x2x12xf32> to vector<18x2x12xf32>
    %30 = vector.shape_cast %29 : vector<18x2x12xf32> to vector<9x2x2x12xf32>
    %31 = vector.extract_strided_slice %30 {offsets = [1, 0, 0, 0], sizes = [8, 1, 2, 12], strides = [1, 1, 1, 1]} : vector<9x2x2x12xf32> to vector<8x1x2x12xf32>
    %32 = vector.shape_cast %31 : vector<8x1x2x12xf32> to vector<8x2x12xf32>
    %c2 = arith.constant 2 : index
    %c0_29 = arith.constant 0 : index
    %c0_30 = arith.constant 0 : index
    %33 = vector.load %arg2[%c2, %c0_29, %c0_30] : memref<4x12x4xf32, #tpu.memory_space<vmem>>, vector<1x12x4xf32>
    %34 = vector.shape_cast %33 : vector<1x12x4xf32> to vector<12x4xf32>
    %35 = vector.shape_cast %34 : vector<12x4xf32> to vector<1x12x4xf32>
    %36 = vector.broadcast %35 : vector<1x12x4xf32> to vector<8x12x4xf32>
    "tpu.trace_start"() <{level = 10 : i32, message = "hwk,hkc->hwc"}> : () -> ()
    %cst_31 = arith.constant dense<0.000000e+00> : vector<8x2x4xf32>
    %37 = tpu.matmul %32, %36, %cst_31 {dimension_numbers = #tpu.dot_dimension_numbers<[2], [1], [1], [2], [0, 0, 0, 1, 1, 2], [0], [0]>} : vector<8x2x12xf32>, vector<8x12x4xf32>, vector<8x2x4xf32> -> vector<8x2x4xf32>
    "tpu.trace_stop"() : () -> ()
    %38 = arith.addf %27, %37 : vector<8x2x4xf32>
    %c0_32 = arith.constant 0 : index
    %c0_33 = arith.constant 0 : index
    %c0_34 = arith.constant 0 : index
    %c0_35 = arith.constant 0 : index
    %39 = vector.load %arg1[%c0_32, %c0_33, %c0_34, %c0_35] : memref<1x18x3x24xf32, #tpu.memory_space<vmem>>, vector<1x18x2x12xf32>
    %40 = vector.shape_cast %39 : vector<1x18x2x12xf32> to vector<18x2x12xf32>
    %41 = vector.shape_cast %40 : vector<18x2x12xf32> to vector<9x2x2x12xf32>
    %42 = vector.extract_strided_slice %41 {offsets = [1, 1, 0, 0], sizes = [8, 1, 2, 12], strides = [1, 1, 1, 1]} : vector<9x2x2x12xf32> to vector<8x1x2x12xf32>
    %43 = vector.shape_cast %42 : vector<8x1x2x12xf32> to vector<8x2x12xf32>
    %c3 = arith.constant 3 : index
    %c0_36 = arith.constant 0 : index
    %c0_37 = arith.constant 0 : index
    %44 = vector.load %arg2[%c3, %c0_36, %c0_37] : memref<4x12x4xf32, #tpu.memory_space<vmem>>, vector<1x12x4xf32>
    %45 = vector.shape_cast %44 : vector<1x12x4xf32> to vector<12x4xf32>
    %46 = vector.shape_cast %45 : vector<12x4xf32> to vector<1x12x4xf32>
    %47 = vector.broadcast %46 : vector<1x12x4xf32> to vector<8x12x4xf32>
    "tpu.trace_start"() <{level = 10 : i32, message = "hwk,hkc->hwc"}> : () -> ()
    %cst_38 = arith.constant dense<0.000000e+00> : vector<8x2x4xf32>
    %48 = tpu.matmul %43, %47, %cst_38 {dimension_numbers = #tpu.dot_dimension_numbers<[2], [1], [1], [2], [0, 0, 0, 1, 1, 2], [0], [0]>} : vector<8x2x12xf32>, vector<8x12x4xf32>, vector<8x2x4xf32> -> vector<8x2x4xf32>
    "tpu.trace_stop"() : () -> ()
    %49 = arith.addf %38, %48 : vector<8x2x4xf32>
    %50 = vector.broadcast %4 : vector<1x1x4xf32> to vector<8x2x4xf32>
    %51 = arith.addf %49, %50 : vector<8x2x4xf32>
    %52 = arith.negf %51 : vector<8x2x4xf32>
    %53 = math.exp %52 : vector<8x2x4xf32>
    %cst_39 = arith.constant 1.000000e+00 : f32
    %54 = vector.broadcast %cst_39 : f32 to vector<8x2x4xf32>
    %55 = arith.addf %54, %53 : vector<8x2x4xf32>
    %56 = arith.divf %54, %55 : vector<8x2x4xf32>
    %57 = arith.mulf %51, %56 : vector<8x2x4xf32>
    %cst_40 = arith.constant 0.000000e+00 : f32
    %58 = vector.broadcast %cst_40 : f32 to vector<8x2x4xf32>
    %c0_41 = arith.constant 0 : index
    %c0_42 = arith.constant 0 : index
    %c0_43 = arith.constant 0 : index
    %c6 = arith.constant 6 : index
    %59 = vector.load %arg1[%c0_41, %c0_42, %c0_43, %c6] : memref<1x18x3x24xf32, #tpu.memory_space<vmem>>, vector<1x18x2x12xf32>
    %60 = vector.shape_cast %59 : vector<1x18x2x12xf32> to vector<18x2x12xf32>
    %61 = vector.shape_cast %60 : vector<18x2x12xf32> to vector<9x2x2x12xf32>
    %62 = vector.extract_strided_slice %61 {offsets = [0, 0, 0, 0], sizes = [8, 1, 2, 12], strides = [1, 1, 1, 1]} : vector<9x2x2x12xf32> to vector<8x1x2x12xf32>
    %63 = vector.shape_cast %62 : vector<8x1x2x12xf32> to vector<8x2x12xf32>
    %c0_44 = arith.constant 0 : index
    %c0_45 = arith.constant 0 : index
    %c0_46 = arith.constant 0 : index
    %64 = vector.load %arg2[%c0_44, %c0_45, %c0_46] : memref<4x12x4xf32, #tpu.memory_space<vmem>>, vector<1x12x4xf32>
    %65 = vector.shape_cast %64 : vector<1x12x4xf32> to vector<12x4xf32>
    %66 = vector.shape_cast %65 : vector<12x4xf32> to vector<1x12x4xf32>
    %67 = vector.broadcast %66 : vector<1x12x4xf32> to vector<8x12x4xf32>
    "tpu.trace_start"() <{level = 10 : i32, message = "hwk,hkc->hwc"}> : () -> ()
    %cst_47 = arith.constant dense<0.000000e+00> : vector<8x2x4xf32>
    %68 = tpu.matmul %63, %67, %cst_47 {dimension_numbers = #tpu.dot_dimension_numbers<[2], [1], [1], [2], [0, 0, 0, 1, 1, 2], [0], [0]>} : vector<8x2x12xf32>, vector<8x12x4xf32>, vector<8x2x4xf32> -> vector<8x2x4xf32>
    "tpu.trace_stop"() : () -> ()
    %69 = arith.addf %58, %68 : vector<8x2x4xf32>
    %c0_48 = arith.constant 0 : index
    %c0_49 = arith.constant 0 : index
    %c0_50 = arith.constant 0 : index
    %c6_51 = arith.constant 6 : index
    %70 = vector.load %arg1[%c0_48, %c0_49, %c0_50, %c6_51] : memref<1x18x3x24xf32, #tpu.memory_space<vmem>>, vector<1x18x2x12xf32>
    %71 = vector.shape_cast %70 : vector<1x18x2x12xf32> to vector<18x2x12xf32>
    %72 = vector.shape_cast %71 : vector<18x2x12xf32> to vector<9x2x2x12xf32>
    %73 = vector.extract_strided_slice %72 {offsets = [0, 1, 0, 0], sizes = [8, 1, 2, 12], strides = [1, 1, 1, 1]} : vector<9x2x2x12xf32> to vector<8x1x2x12xf32>
    %74 = vector.shape_cast %73 : vector<8x1x2x12xf32> to vector<8x2x12xf32>
    %c1_52 = arith.constant 1 : index
    %c0_53 = arith.constant 0 : index
    %c0_54 = arith.constant 0 : index
    %75 = vector.load %arg2[%c1_52, %c0_53, %c0_54] : memref<4x12x4xf32, #tpu.memory_space<vmem>>, vector<1x12x4xf32>
    %76 = vector.shape_cast %75 : vector<1x12x4xf32> to vector<12x4xf32>
    %77 = vector.shape_cast %76 : vector<12x4xf32> to vector<1x12x4xf32>
    %78 = vector.broadcast %77 : vector<1x12x4xf32> to vector<8x12x4xf32>
    "tpu.trace_start"() <{level = 10 : i32, message = "hwk,hkc->hwc"}> : () -> ()
    %cst_55 = arith.constant dense<0.000000e+00> : vector<8x2x4xf32>
    %79 = tpu.matmul %74, %78, %cst_55 {dimension_numbers = #tpu.dot_dimension_numbers<[2], [1], [1], [2], [0, 0, 0, 1, 1, 2], [0], [0]>} : vector<8x2x12xf32>, vector<8x12x4xf32>, vector<8x2x4xf32> -> vector<8x2x4xf32>
    "tpu.trace_stop"() : () -> ()
    %80 = arith.addf %69, %79 : vector<8x2x4xf32>
    %c0_56 = arith.constant 0 : index
    %c0_57 = arith.constant 0 : index
    %c0_58 = arith.constant 0 : index
    %c6_59 = arith.constant 6 : index
    %81 = vector.load %arg1[%c0_56, %c0_57, %c0_58, %c6_59] : memref<1x18x3x24xf32, #tpu.memory_space<vmem>>, vector<1x18x2x12xf32>
    %82 = vector.shape_cast %81 : vector<1x18x2x12xf32> to vector<18x2x12xf32>
    %83 = vector.shape_cast %82 : vector<18x2x12xf32> to vector<9x2x2x12xf32>
    %84 = vector.extract_strided_slice %83 {offsets = [1, 0, 0, 0], sizes = [8, 1, 2, 12], strides = [1, 1, 1, 1]} : vector<9x2x2x12xf32> to vector<8x1x2x12xf32>
    %85 = vector.shape_cast %84 : vector<8x1x2x12xf32> to vector<8x2x12xf32>
    %c2_60 = arith.constant 2 : index
    %c0_61 = arith.constant 0 : index
    %c0_62 = arith.constant 0 : index
    %86 = vector.load %arg2[%c2_60, %c0_61, %c0_62] : memref<4x12x4xf32, #tpu.memory_space<vmem>>, vector<1x12x4xf32>
    %87 = vector.shape_cast %86 : vector<1x12x4xf32> to vector<12x4xf32>
    %88 = vector.shape_cast %87 : vector<12x4xf32> to vector<1x12x4xf32>
    %89 = vector.broadcast %88 : vector<1x12x4xf32> to vector<8x12x4xf32>
    "tpu.trace_start"() <{level = 10 : i32, message = "hwk,hkc->hwc"}> : () -> ()
    %cst_63 = arith.constant dense<0.000000e+00> : vector<8x2x4xf32>
    %90 = tpu.matmul %85, %89, %cst_63 {dimension_numbers = #tpu.dot_dimension_numbers<[2], [1], [1], [2], [0, 0, 0, 1, 1, 2], [0], [0]>} : vector<8x2x12xf32>, vector<8x12x4xf32>, vector<8x2x4xf32> -> vector<8x2x4xf32>
    "tpu.trace_stop"() : () -> ()
    %91 = arith.addf %80, %90 : vector<8x2x4xf32>
    %c0_64 = arith.constant 0 : index
    %c0_65 = arith.constant 0 : index
    %c0_66 = arith.constant 0 : index
    %c6_67 = arith.constant 6 : index
    %92 = vector.load %arg1[%c0_64, %c0_65, %c0_66, %c6_67] : memref<1x18x3x24xf32, #tpu.memory_space<vmem>>, vector<1x18x2x12xf32>
    %93 = vector.shape_cast %92 : vector<1x18x2x12xf32> to vector<18x2x12xf32>
    %94 = vector.shape_cast %93 : vector<18x2x12xf32> to vector<9x2x2x12xf32>
    %95 = vector.extract_strided_slice %94 {offsets = [1, 1, 0, 0], sizes = [8, 1, 2, 12], strides = [1, 1, 1, 1]} : vector<9x2x2x12xf32> to vector<8x1x2x12xf32>
    %96 = vector.shape_cast %95 : vector<8x1x2x12xf32> to vector<8x2x12xf32>
    %c3_68 = arith.constant 3 : index
    %c0_69 = arith.constant 0 : index
    %c0_70 = arith.constant 0 : index
    %97 = vector.load %arg2[%c3_68, %c0_69, %c0_70] : memref<4x12x4xf32, #tpu.memory_space<vmem>>, vector<1x12x4xf32>
    %98 = vector.shape_cast %97 : vector<1x12x4xf32> to vector<12x4xf32>
    %99 = vector.shape_cast %98 : vector<12x4xf32> to vector<1x12x4xf32>
    %100 = vector.broadcast %99 : vector<1x12x4xf32> to vector<8x12x4xf32>
    "tpu.trace_start"() <{level = 10 : i32, message = "hwk,hkc->hwc"}> : () -> ()
    %cst_71 = arith.constant dense<0.000000e+00> : vector<8x2x4xf32>
    %101 = tpu.matmul %96, %100, %cst_71 {dimension_numbers = #tpu.dot_dimension_numbers<[2], [1], [1], [2], [0, 0, 0, 1, 1, 2], [0], [0]>} : vector<8x2x12xf32>, vector<8x12x4xf32>, vector<8x2x4xf32> -> vector<8x2x4xf32>
    "tpu.trace_stop"() : () -> ()
    %102 = arith.addf %91, %101 : vector<8x2x4xf32>
    %103 = vector.broadcast %4 : vector<1x1x4xf32> to vector<8x2x4xf32>
    %104 = arith.addf %102, %103 : vector<8x2x4xf32>
    %105 = arith.negf %104 : vector<8x2x4xf32>
    %106 = math.exp %105 : vector<8x2x4xf32>
    %cst_72 = arith.constant 1.000000e+00 : f32
    %107 = vector.broadcast %cst_72 : f32 to vector<8x2x4xf32>
    %108 = arith.addf %107, %106 : vector<8x2x4xf32>
    %109 = arith.divf %107, %108 : vector<8x2x4xf32>
    %110 = arith.mulf %104, %109 : vector<8x2x4xf32>
    %cst_73 = arith.constant 0.000000e+00 : f32
    %111 = vector.broadcast %cst_73 : f32 to vector<8x2x4xf32>
    %c0_74 = arith.constant 0 : index
    %c0_75 = arith.constant 0 : index
    %c0_76 = arith.constant 0 : index
    %c12 = arith.constant 12 : index
    %112 = vector.load %arg1[%c0_74, %c0_75, %c0_76, %c12] : memref<1x18x3x24xf32, #tpu.memory_space<vmem>>, vector<1x18x2x12xf32>
    %113 = vector.shape_cast %112 : vector<1x18x2x12xf32> to vector<18x2x12xf32>
    %114 = vector.shape_cast %113 : vector<18x2x12xf32> to vector<9x2x2x12xf32>
    %115 = vector.extract_strided_slice %114 {offsets = [0, 0, 0, 0], sizes = [8, 1, 2, 12], strides = [1, 1, 1, 1]} : vector<9x2x2x12xf32> to vector<8x1x2x12xf32>
    %116 = vector.shape_cast %115 : vector<8x1x2x12xf32> to vector<8x2x12xf32>
    %c0_77 = arith.constant 0 : index
    %c0_78 = arith.constant 0 : index
    %c0_79 = arith.constant 0 : index
    %117 = vector.load %arg2[%c0_77, %c0_78, %c0_79] : memref<4x12x4xf32, #tpu.memory_space<vmem>>, vector<1x12x4xf32>
    %118 = vector.shape_cast %117 : vector<1x12x4xf32> to vector<12x4xf32>
    %119 = vector.shape_cast %118 : vector<12x4xf32> to vector<1x12x4xf32>
    %120 = vector.broadcast %119 : vector<1x12x4xf32> to vector<8x12x4xf32>
    "tpu.trace_start"() <{level = 10 : i32, message = "hwk,hkc->hwc"}> : () -> ()
    %cst_80 = arith.constant dense<0.000000e+00> : vector<8x2x4xf32>
    %121 = tpu.matmul %116, %120, %cst_80 {dimension_numbers = #tpu.dot_dimension_numbers<[2], [1], [1], [2], [0, 0, 0, 1, 1, 2], [0], [0]>} : vector<8x2x12xf32>, vector<8x12x4xf32>, vector<8x2x4xf32> -> vector<8x2x4xf32>
    "tpu.trace_stop"() : () -> ()
    %122 = arith.addf %111, %121 : vector<8x2x4xf32>
    %c0_81 = arith.constant 0 : index
    %c0_82 = arith.constant 0 : index
    %c0_83 = arith.constant 0 : index
    %c12_84 = arith.constant 12 : index
    %123 = vector.load %arg1[%c0_81, %c0_82, %c0_83, %c12_84] : memref<1x18x3x24xf32, #tpu.memory_space<vmem>>, vector<1x18x2x12xf32>
    %124 = vector.shape_cast %123 : vector<1x18x2x12xf32> to vector<18x2x12xf32>
    %125 = vector.shape_cast %124 : vector<18x2x12xf32> to vector<9x2x2x12xf32>
    %126 = vector.extract_strided_slice %125 {offsets = [0, 1, 0, 0], sizes = [8, 1, 2, 12], strides = [1, 1, 1, 1]} : vector<9x2x2x12xf32> to vector<8x1x2x12xf32>
    %127 = vector.shape_cast %126 : vector<8x1x2x12xf32> to vector<8x2x12xf32>
    %c1_85 = arith.constant 1 : index
    %c0_86 = arith.constant 0 : index
    %c0_87 = arith.constant 0 : index
    %128 = vector.load %arg2[%c1_85, %c0_86, %c0_87] : memref<4x12x4xf32, #tpu.memory_space<vmem>>, vector<1x12x4xf32>
    %129 = vector.shape_cast %128 : vector<1x12x4xf32> to vector<12x4xf32>
    %130 = vector.shape_cast %129 : vector<12x4xf32> to vector<1x12x4xf32>
    %131 = vector.broadcast %130 : vector<1x12x4xf32> to vector<8x12x4xf32>
    "tpu.trace_start"() <{level = 10 : i32, message = "hwk,hkc->hwc"}> : () -> ()
    %cst_88 = arith.constant dense<0.000000e+00> : vector<8x2x4xf32>
    %132 = tpu.matmul %127, %131, %cst_88 {dimension_numbers = #tpu.dot_dimension_numbers<[2], [1], [1], [2], [0, 0, 0, 1, 1, 2], [0], [0]>} : vector<8x2x12xf32>, vector<8x12x4xf32>, vector<8x2x4xf32> -> vector<8x2x4xf32>
    "tpu.trace_stop"() : () -> ()
    %133 = arith.addf %122, %132 : vector<8x2x4xf32>
    %c0_89 = arith.constant 0 : index
    %c0_90 = arith.constant 0 : index
    %c0_91 = arith.constant 0 : index
    %c12_92 = arith.constant 12 : index
    %134 = vector.load %arg1[%c0_89, %c0_90, %c0_91, %c12_92] : memref<1x18x3x24xf32, #tpu.memory_space<vmem>>, vector<1x18x2x12xf32>
    %135 = vector.shape_cast %134 : vector<1x18x2x12xf32> to vector<18x2x12xf32>
    %136 = vector.shape_cast %135 : vector<18x2x12xf32> to vector<9x2x2x12xf32>
    %137 = vector.extract_strided_slice %136 {offsets = [1, 0, 0, 0], sizes = [8, 1, 2, 12], strides = [1, 1, 1, 1]} : vector<9x2x2x12xf32> to vector<8x1x2x12xf32>
    %138 = vector.shape_cast %137 : vector<8x1x2x12xf32> to vector<8x2x12xf32>
    %c2_93 = arith.constant 2 : index
    %c0_94 = arith.constant 0 : index
    %c0_95 = arith.constant 0 : index
    %139 = vector.load %arg2[%c2_93, %c0_94, %c0_95] : memref<4x12x4xf32, #tpu.memory_space<vmem>>, vector<1x12x4xf32>
    %140 = vector.shape_cast %139 : vector<1x12x4xf32> to vector<12x4xf32>
    %141 = vector.shape_cast %140 : vector<12x4xf32> to vector<1x12x4xf32>
    %142 = vector.broadcast %141 : vector<1x12x4xf32> to vector<8x12x4xf32>
    "tpu.trace_start"() <{level = 10 : i32, message = "hwk,hkc->hwc"}> : () -> ()
    %cst_96 = arith.constant dense<0.000000e+00> : vector<8x2x4xf32>
    %143 = tpu.matmul %138, %142, %cst_96 {dimension_numbers = #tpu.dot_dimension_numbers<[2], [1], [1], [2], [0, 0, 0, 1, 1, 2], [0], [0]>} : vector<8x2x12xf32>, vector<8x12x4xf32>, vector<8x2x4xf32> -> vector<8x2x4xf32>
    "tpu.trace_stop"() : () -> ()
    %144 = arith.addf %133, %143 : vector<8x2x4xf32>
    %c0_97 = arith.constant 0 : index
    %c0_98 = arith.constant 0 : index
    %c0_99 = arith.constant 0 : index
    %c12_100 = arith.constant 12 : index
    %145 = vector.load %arg1[%c0_97, %c0_98, %c0_99, %c12_100] : memref<1x18x3x24xf32, #tpu.memory_space<vmem>>, vector<1x18x2x12xf32>
    %146 = vector.shape_cast %145 : vector<1x18x2x12xf32> to vector<18x2x12xf32>
    %147 = vector.shape_cast %146 : vector<18x2x12xf32> to vector<9x2x2x12xf32>
    %148 = vector.extract_strided_slice %147 {offsets = [1, 1, 0, 0], sizes = [8, 1, 2, 12], strides = [1, 1, 1, 1]} : vector<9x2x2x12xf32> to vector<8x1x2x12xf32>
    %149 = vector.shape_cast %148 : vector<8x1x2x12xf32> to vector<8x2x12xf32>
    %c3_101 = arith.constant 3 : index
    %c0_102 = arith.constant 0 : index
    %c0_103 = arith.constant 0 : index
    %150 = vector.load %arg2[%c3_101, %c0_102, %c0_103] : memref<4x12x4xf32, #tpu.memory_space<vmem>>, vector<1x12x4xf32>
    %151 = vector.shape_cast %150 : vector<1x12x4xf32> to vector<12x4xf32>
    %152 = vector.shape_cast %151 : vector<12x4xf32> to vector<1x12x4xf32>
    %153 = vector.broadcast %152 : vector<1x12x4xf32> to vector<8x12x4xf32>
    "tpu.trace_start"() <{level = 10 : i32, message = "hwk,hkc->hwc"}> : () -> ()
    %cst_104 = arith.constant dense<0.000000e+00> : vector<8x2x4xf32>
    %154 = tpu.matmul %149, %153, %cst_104 {dimension_numbers = #tpu.dot_dimension_numbers<[2], [1], [1], [2], [0, 0, 0, 1, 1, 2], [0], [0]>} : vector<8x2x12xf32>, vector<8x12x4xf32>, vector<8x2x4xf32> -> vector<8x2x4xf32>
    "tpu.trace_stop"() : () -> ()
    %155 = arith.addf %144, %154 : vector<8x2x4xf32>
    %156 = vector.broadcast %4 : vector<1x1x4xf32> to vector<8x2x4xf32>
    %157 = arith.addf %155, %156 : vector<8x2x4xf32>
    %158 = arith.negf %157 : vector<8x2x4xf32>
    %159 = math.exp %158 : vector<8x2x4xf32>
    %cst_105 = arith.constant 1.000000e+00 : f32
    %160 = vector.broadcast %cst_105 : f32 to vector<8x2x4xf32>
    %161 = arith.addf %160, %159 : vector<8x2x4xf32>
    %162 = arith.divf %160, %161 : vector<8x2x4xf32>
    %163 = arith.mulf %157, %162 : vector<8x2x4xf32>
    %cst_106 = arith.constant 0.000000e+00 : f32
    %164 = vector.broadcast %cst_106 : f32 to vector<8x2x4xf32>
    %c0_107 = arith.constant 0 : index
    %c0_108 = arith.constant 0 : index
    %c0_109 = arith.constant 0 : index
    %c18 = arith.constant 18 : index
    %165 = vector.load %arg1[%c0_107, %c0_108, %c0_109, %c18] : memref<1x18x3x24xf32, #tpu.memory_space<vmem>>, vector<1x18x2x6xf32>
    %166 = vector.shape_cast %165 : vector<1x18x2x6xf32> to vector<18x2x6xf32>
    %167 = vector.shape_cast %166 : vector<18x2x6xf32> to vector<9x2x2x6xf32>
    %168 = vector.extract_strided_slice %167 {offsets = [0, 0, 0, 0], sizes = [8, 1, 2, 6], strides = [1, 1, 1, 1]} : vector<9x2x2x6xf32> to vector<8x1x2x6xf32>
    %169 = vector.shape_cast %168 : vector<8x1x2x6xf32> to vector<8x2x6xf32>
    %c0_110 = arith.constant 0 : index
    %c0_111 = arith.constant 0 : index
    %c0_112 = arith.constant 0 : index
    %170 = vector.load %arg2[%c0_110, %c0_111, %c0_112] : memref<4x12x4xf32, #tpu.memory_space<vmem>>, vector<1x6x4xf32>
    %171 = vector.shape_cast %170 : vector<1x6x4xf32> to vector<6x4xf32>
    %172 = vector.shape_cast %171 : vector<6x4xf32> to vector<1x6x4xf32>
    %173 = vector.broadcast %172 : vector<1x6x4xf32> to vector<8x6x4xf32>
    "tpu.trace_start"() <{level = 10 : i32, message = "hwk,hkc->hwc"}> : () -> ()
    %cst_113 = arith.constant dense<0.000000e+00> : vector<8x2x4xf32>
    %174 = tpu.matmul %169, %173, %cst_113 {dimension_numbers = #tpu.dot_dimension_numbers<[2], [1], [1], [2], [0, 0, 0, 1, 1, 2], [0], [0]>} : vector<8x2x6xf32>, vector<8x6x4xf32>, vector<8x2x4xf32> -> vector<8x2x4xf32>
    "tpu.trace_stop"() : () -> ()
    %175 = arith.addf %164, %174 : vector<8x2x4xf32>
    %c0_114 = arith.constant 0 : index
    %c0_115 = arith.constant 0 : index
    %c1_116 = arith.constant 1 : index
    %c0_117 = arith.constant 0 : index
    %176 = vector.load %arg1[%c0_114, %c0_115, %c1_116, %c0_117] : memref<1x18x3x24xf32, #tpu.memory_space<vmem>>, vector<1x18x2x6xf32>
    %177 = vector.shape_cast %176 : vector<1x18x2x6xf32> to vector<18x2x6xf32>
    %178 = vector.shape_cast %177 : vector<18x2x6xf32> to vector<9x2x2x6xf32>
    %179 = vector.extract_strided_slice %178 {offsets = [0, 0, 0, 0], sizes = [8, 1, 2, 6], strides = [1, 1, 1, 1]} : vector<9x2x2x6xf32> to vector<8x1x2x6xf32>
    %180 = vector.shape_cast %179 : vector<8x1x2x6xf32> to vector<8x2x6xf32>
    %c0_118 = arith.constant 0 : index
    %c6_119 = arith.constant 6 : index
    %c0_120 = arith.constant 0 : index
    %181 = vector.load %arg2[%c0_118, %c6_119, %c0_120] : memref<4x12x4xf32, #tpu.memory_space<vmem>>, vector<1x6x4xf32>
    %182 = vector.shape_cast %181 : vector<1x6x4xf32> to vector<6x4xf32>
    %183 = vector.shape_cast %182 : vector<6x4xf32> to vector<1x6x4xf32>
    %184 = vector.broadcast %183 : vector<1x6x4xf32> to vector<8x6x4xf32>
    "tpu.trace_start"() <{level = 10 : i32, message = "hwk,hkc->hwc"}> : () -> ()
    %cst_121 = arith.constant dense<0.000000e+00> : vector<8x2x4xf32>
    %185 = tpu.matmul %180, %184, %cst_121 {dimension_numbers = #tpu.dot_dimension_numbers<[2], [1], [1], [2], [0, 0, 0, 1, 1, 2], [0], [0]>} : vector<8x2x6xf32>, vector<8x6x4xf32>, vector<8x2x4xf32> -> vector<8x2x4xf32>
    "tpu.trace_stop"() : () -> ()
    %186 = arith.addf %175, %185 : vector<8x2x4xf32>
    %c0_122 = arith.constant 0 : index
    %c0_123 = arith.constant 0 : index
    %c0_124 = arith.constant 0 : index
    %c18_125 = arith.constant 18 : index
    %187 = vector.load %arg1[%c0_122, %c0_123, %c0_124, %c18_125] : memref<1x18x3x24xf32, #tpu.memory_space<vmem>>, vector<1x18x2x6xf32>
    %188 = vector.shape_cast %187 : vector<1x18x2x6xf32> to vector<18x2x6xf32>
    %189 = vector.shape_cast %188 : vector<18x2x6xf32> to vector<9x2x2x6xf32>
    %190 = vector.extract_strided_slice %189 {offsets = [0, 1, 0, 0], sizes = [8, 1, 2, 6], strides = [1, 1, 1, 1]} : vector<9x2x2x6xf32> to vector<8x1x2x6xf32>
    %191 = vector.shape_cast %190 : vector<8x1x2x6xf32> to vector<8x2x6xf32>
    %c1_126 = arith.constant 1 : index
    %c0_127 = arith.constant 0 : index
    %c0_128 = arith.constant 0 : index
    %192 = vector.load %arg2[%c1_126, %c0_127, %c0_128] : memref<4x12x4xf32, #tpu.memory_space<vmem>>, vector<1x6x4xf32>
    %193 = vector.shape_cast %192 : vector<1x6x4xf32> to vector<6x4xf32>
    %194 = vector.shape_cast %193 : vector<6x4xf32> to vector<1x6x4xf32>
    %195 = vector.broadcast %194 : vector<1x6x4xf32> to vector<8x6x4xf32>
    "tpu.trace_start"() <{level = 10 : i32, message = "hwk,hkc->hwc"}> : () -> ()
    %cst_129 = arith.constant dense<0.000000e+00> : vector<8x2x4xf32>
    %196 = tpu.matmul %191, %195, %cst_129 {dimension_numbers = #tpu.dot_dimension_numbers<[2], [1], [1], [2], [0, 0, 0, 1, 1, 2], [0], [0]>} : vector<8x2x6xf32>, vector<8x6x4xf32>, vector<8x2x4xf32> -> vector<8x2x4xf32>
    "tpu.trace_stop"() : () -> ()
    %197 = arith.addf %186, %196 : vector<8x2x4xf32>
    %c0_130 = arith.constant 0 : index
    %c0_131 = arith.constant 0 : index
    %c1_132 = arith.constant 1 : index
    %c0_133 = arith.constant 0 : index
    %198 = vector.load %arg1[%c0_130, %c0_131, %c1_132, %c0_133] : memref<1x18x3x24xf32, #tpu.memory_space<vmem>>, vector<1x18x2x6xf32>
    %199 = vector.shape_cast %198 : vector<1x18x2x6xf32> to vector<18x2x6xf32>
    %200 = vector.shape_cast %199 : vector<18x2x6xf32> to vector<9x2x2x6xf32>
    %201 = vector.extract_strided_slice %200 {offsets = [0, 1, 0, 0], sizes = [8, 1, 2, 6], strides = [1, 1, 1, 1]} : vector<9x2x2x6xf32> to vector<8x1x2x6xf32>
    %202 = vector.shape_cast %201 : vector<8x1x2x6xf32> to vector<8x2x6xf32>
    %c1_134 = arith.constant 1 : index
    %c6_135 = arith.constant 6 : index
    %c0_136 = arith.constant 0 : index
    %203 = vector.load %arg2[%c1_134, %c6_135, %c0_136] : memref<4x12x4xf32, #tpu.memory_space<vmem>>, vector<1x6x4xf32>
    %204 = vector.shape_cast %203 : vector<1x6x4xf32> to vector<6x4xf32>
    %205 = vector.shape_cast %204 : vector<6x4xf32> to vector<1x6x4xf32>
    %206 = vector.broadcast %205 : vector<1x6x4xf32> to vector<8x6x4xf32>
    "tpu.trace_start"() <{level = 10 : i32, message = "hwk,hkc->hwc"}> : () -> ()
    %cst_137 = arith.constant dense<0.000000e+00> : vector<8x2x4xf32>
    %207 = tpu.matmul %202, %206, %cst_137 {dimension_numbers = #tpu.dot_dimension_numbers<[2], [1], [1], [2], [0, 0, 0, 1, 1, 2], [0], [0]>} : vector<8x2x6xf32>, vector<8x6x4xf32>, vector<8x2x4xf32> -> vector<8x2x4xf32>
    "tpu.trace_stop"() : () -> ()
    %208 = arith.addf %197, %207 : vector<8x2x4xf32>
    %c0_138 = arith.constant 0 : index
    %c0_139 = arith.constant 0 : index
    %c0_140 = arith.constant 0 : index
    %c18_141 = arith.constant 18 : index
    %209 = vector.load %arg1[%c0_138, %c0_139, %c0_140, %c18_141] : memref<1x18x3x24xf32, #tpu.memory_space<vmem>>, vector<1x18x2x6xf32>
    %210 = vector.shape_cast %209 : vector<1x18x2x6xf32> to vector<18x2x6xf32>
    %211 = vector.shape_cast %210 : vector<18x2x6xf32> to vector<9x2x2x6xf32>
    %212 = vector.extract_strided_slice %211 {offsets = [1, 0, 0, 0], sizes = [8, 1, 2, 6], strides = [1, 1, 1, 1]} : vector<9x2x2x6xf32> to vector<8x1x2x6xf32>
    %213 = vector.shape_cast %212 : vector<8x1x2x6xf32> to vector<8x2x6xf32>
    %c2_142 = arith.constant 2 : index
    %c0_143 = arith.constant 0 : index
    %c0_144 = arith.constant 0 : index
    %214 = vector.load %arg2[%c2_142, %c0_143, %c0_144] : memref<4x12x4xf32, #tpu.memory_space<vmem>>, vector<1x6x4xf32>
    %215 = vector.shape_cast %214 : vector<1x6x4xf32> to vector<6x4xf32>
    %216 = vector.shape_cast %215 : vector<6x4xf32> to vector<1x6x4xf32>
    %217 = vector.broadcast %216 : vector<1x6x4xf32> to vector<8x6x4xf32>
    "tpu.trace_start"() <{level = 10 : i32, message = "hwk,hkc->hwc"}> : () -> ()
    %cst_145 = arith.constant dense<0.000000e+00> : vector<8x2x4xf32>
    %218 = tpu.matmul %213, %217, %cst_145 {dimension_numbers = #tpu.dot_dimension_numbers<[2], [1], [1], [2], [0, 0, 0, 1, 1, 2], [0], [0]>} : vector<8x2x6xf32>, vector<8x6x4xf32>, vector<8x2x4xf32> -> vector<8x2x4xf32>
    "tpu.trace_stop"() : () -> ()
    %219 = arith.addf %208, %218 : vector<8x2x4xf32>
    %c0_146 = arith.constant 0 : index
    %c0_147 = arith.constant 0 : index
    %c1_148 = arith.constant 1 : index
    %c0_149 = arith.constant 0 : index
    %220 = vector.load %arg1[%c0_146, %c0_147, %c1_148, %c0_149] : memref<1x18x3x24xf32, #tpu.memory_space<vmem>>, vector<1x18x2x6xf32>
    %221 = vector.shape_cast %220 : vector<1x18x2x6xf32> to vector<18x2x6xf32>
    %222 = vector.shape_cast %221 : vector<18x2x6xf32> to vector<9x2x2x6xf32>
    %223 = vector.extract_strided_slice %222 {offsets = [1, 0, 0, 0], sizes = [8, 1, 2, 6], strides = [1, 1, 1, 1]} : vector<9x2x2x6xf32> to vector<8x1x2x6xf32>
    %224 = vector.shape_cast %223 : vector<8x1x2x6xf32> to vector<8x2x6xf32>
    %c2_150 = arith.constant 2 : index
    %c6_151 = arith.constant 6 : index
    %c0_152 = arith.constant 0 : index
    %225 = vector.load %arg2[%c2_150, %c6_151, %c0_152] : memref<4x12x4xf32, #tpu.memory_space<vmem>>, vector<1x6x4xf32>
    %226 = vector.shape_cast %225 : vector<1x6x4xf32> to vector<6x4xf32>
    %227 = vector.shape_cast %226 : vector<6x4xf32> to vector<1x6x4xf32>
    %228 = vector.broadcast %227 : vector<1x6x4xf32> to vector<8x6x4xf32>
    "tpu.trace_start"() <{level = 10 : i32, message = "hwk,hkc->hwc"}> : () -> ()
    %cst_153 = arith.constant dense<0.000000e+00> : vector<8x2x4xf32>
    %229 = tpu.matmul %224, %228, %cst_153 {dimension_numbers = #tpu.dot_dimension_numbers<[2], [1], [1], [2], [0, 0, 0, 1, 1, 2], [0], [0]>} : vector<8x2x6xf32>, vector<8x6x4xf32>, vector<8x2x4xf32> -> vector<8x2x4xf32>
    "tpu.trace_stop"() : () -> ()
    %230 = arith.addf %219, %229 : vector<8x2x4xf32>
    %c0_154 = arith.constant 0 : index
    %c0_155 = arith.constant 0 : index
    %c0_156 = arith.constant 0 : index
    %c18_157 = arith.constant 18 : index
    %231 = vector.load %arg1[%c0_154, %c0_155, %c0_156, %c18_157] : memref<1x18x3x24xf32, #tpu.memory_space<vmem>>, vector<1x18x2x6xf32>
    %232 = vector.shape_cast %231 : vector<1x18x2x6xf32> to vector<18x2x6xf32>
    %233 = vector.shape_cast %232 : vector<18x2x6xf32> to vector<9x2x2x6xf32>
    %234 = vector.extract_strided_slice %233 {offsets = [1, 1, 0, 0], sizes = [8, 1, 2, 6], strides = [1, 1, 1, 1]} : vector<9x2x2x6xf32> to vector<8x1x2x6xf32>
    %235 = vector.shape_cast %234 : vector<8x1x2x6xf32> to vector<8x2x6xf32>
    %c3_158 = arith.constant 3 : index
    %c0_159 = arith.constant 0 : index
    %c0_160 = arith.constant 0 : index
    %236 = vector.load %arg2[%c3_158, %c0_159, %c0_160] : memref<4x12x4xf32, #tpu.memory_space<vmem>>, vector<1x6x4xf32>
    %237 = vector.shape_cast %236 : vector<1x6x4xf32> to vector<6x4xf32>
    %238 = vector.shape_cast %237 : vector<6x4xf32> to vector<1x6x4xf32>
    %239 = vector.broadcast %238 : vector<1x6x4xf32> to vector<8x6x4xf32>
    "tpu.trace_start"() <{level = 10 : i32, message = "hwk,hkc->hwc"}> : () -> ()
    %cst_161 = arith.constant dense<0.000000e+00> : vector<8x2x4xf32>
    %240 = tpu.matmul %235, %239, %cst_161 {dimension_numbers = #tpu.dot_dimension_numbers<[2], [1], [1], [2], [0, 0, 0, 1, 1, 2], [0], [0]>} : vector<8x2x6xf32>, vector<8x6x4xf32>, vector<8x2x4xf32> -> vector<8x2x4xf32>
    "tpu.trace_stop"() : () -> ()
    %241 = arith.addf %230, %240 : vector<8x2x4xf32>
    %c0_162 = arith.constant 0 : index
    %c0_163 = arith.constant 0 : index
    %c1_164 = arith.constant 1 : index
    %c0_165 = arith.constant 0 : index
    %242 = vector.load %arg1[%c0_162, %c0_163, %c1_164, %c0_165] : memref<1x18x3x24xf32, #tpu.memory_space<vmem>>, vector<1x18x2x6xf32>
    %243 = vector.shape_cast %242 : vector<1x18x2x6xf32> to vector<18x2x6xf32>
    %244 = vector.shape_cast %243 : vector<18x2x6xf32> to vector<9x2x2x6xf32>
    %245 = vector.extract_strided_slice %244 {offsets = [1, 1, 0, 0], sizes = [8, 1, 2, 6], strides = [1, 1, 1, 1]} : vector<9x2x2x6xf32> to vector<8x1x2x6xf32>
    %246 = vector.shape_cast %245 : vector<8x1x2x6xf32> to vector<8x2x6xf32>
    %c3_166 = arith.constant 3 : index
    %c6_167 = arith.constant 6 : index
    %c0_168 = arith.constant 0 : index
    %247 = vector.load %arg2[%c3_166, %c6_167, %c0_168] : memref<4x12x4xf32, #tpu.memory_space<vmem>>, vector<1x6x4xf32>
    %248 = vector.shape_cast %247 : vector<1x6x4xf32> to vector<6x4xf32>
    %249 = vector.shape_cast %248 : vector<6x4xf32> to vector<1x6x4xf32>
    %250 = vector.broadcast %249 : vector<1x6x4xf32> to vector<8x6x4xf32>
    "tpu.trace_start"() <{level = 10 : i32, message = "hwk,hkc->hwc"}> : () -> ()
    %cst_169 = arith.constant dense<0.000000e+00> : vector<8x2x4xf32>
    %251 = tpu.matmul %246, %250, %cst_169 {dimension_numbers = #tpu.dot_dimension_numbers<[2], [1], [1], [2], [0, 0, 0, 1, 1, 2], [0], [0]>} : vector<8x2x6xf32>, vector<8x6x4xf32>, vector<8x2x4xf32> -> vector<8x2x4xf32>
    "tpu.trace_stop"() : () -> ()
    %252 = arith.addf %241, %251 : vector<8x2x4xf32>
    %253 = vector.broadcast %4 : vector<1x1x4xf32> to vector<8x2x4xf32>
    %254 = arith.addf %252, %253 : vector<8x2x4xf32>
    %255 = arith.negf %254 : vector<8x2x4xf32>
    %256 = math.exp %255 : vector<8x2x4xf32>
    %cst_170 = arith.constant 1.000000e+00 : f32
    %257 = vector.broadcast %cst_170 : f32 to vector<8x2x4xf32>
    %258 = arith.addf %257, %256 : vector<8x2x4xf32>
    %259 = arith.divf %257, %258 : vector<8x2x4xf32>
    %260 = arith.mulf %254, %259 : vector<8x2x4xf32>
    %c1_171 = arith.constant 1 : index
    %c0_172 = arith.constant 0 : index
    %c4 = arith.constant 4 : index
    %261 = vector.load %arg9[%c1_171, %c0_172, %c4] : memref<10x3x16xf32, #tpu.memory_space<vmem>>, vector<8x2x4xf32>
    tpu.vector_store %arg9[%c1_171, %c0_172, %c4], %57 {strides = array<i32>} : memref<10x3x16xf32, #tpu.memory_space<vmem>>, vector<8x2x4xf32>,
    %c1_173 = arith.constant 1 : index
    %c0_174 = arith.constant 0 : index
    %c8 = arith.constant 8 : index
    %262 = vector.load %arg9[%c1_173, %c0_174, %c8] : memref<10x3x16xf32, #tpu.memory_space<vmem>>, vector<8x2x4xf32>
    tpu.vector_store %arg9[%c1_173, %c0_174, %c8], %110 {strides = array<i32>} : memref<10x3x16xf32, #tpu.memory_space<vmem>>, vector<8x2x4xf32>,
    %c1_175 = arith.constant 1 : index
    %c0_176 = arith.constant 0 : index
    %c12_177 = arith.constant 12 : index
    %263 = vector.load %arg9[%c1_175, %c0_176, %c12_177] : memref<10x3x16xf32, #tpu.memory_space<vmem>>, vector<8x2x4xf32>
    tpu.vector_store %arg9[%c1_175, %c0_176, %c12_177], %163 {strides = array<i32>} : memref<10x3x16xf32, #tpu.memory_space<vmem>>, vector<8x2x4xf32>,
    %c1_178 = arith.constant 1 : index
    %c1_179 = arith.constant 1 : index
    %c0_180 = arith.constant 0 : index
    %264 = vector.load %arg9[%c1_178, %c1_179, %c0_180] : memref<10x3x16xf32, #tpu.memory_space<vmem>>, vector<8x2x4xf32>
    tpu.vector_store %arg9[%c1_178, %c1_179, %c0_180], %260 {strides = array<i32>} : memref<10x3x16xf32, #tpu.memory_space<vmem>>, vector<8x2x4xf32>,
    %c0_181 = arith.constant 0 : index
    %c0_182 = arith.constant 0 : index
    %c0_183 = arith.constant 0 : index
    %265 = vector.load %arg5[%c0_181, %c0_182, %c0_183] : memref<1x1x4xf32, #tpu.memory_space<vmem>>, vector<1x1x4xf32>
    %cst_184 = arith.constant 0.000000e+00 : f32
    %266 = vector.broadcast %cst_184 : f32 to vector<4x2x4xf32>
    %c0_185 = arith.constant 0 : index
    %c0_186 = arith.constant 0 : index
    %c0_187 = arith.constant 0 : index
    %267 = vector.load %arg9[%c0_185, %c0_186, %c0_187] : memref<10x3x16xf32, #tpu.memory_space<vmem>>, vector<10x2x16xf32>
    %268 = vector.shape_cast %267 : vector<10x2x16xf32> to vector<5x2x2x16xf32>
    %269 = vector.extract_strided_slice %268 {offsets = [0, 0, 0, 0], sizes = [4, 1, 2, 16], strides = [1, 1, 1, 1]} : vector<5x2x2x16xf32> to vector<4x1x2x16xf32>
    %270 = vector.shape_cast %269 : vector<4x1x2x16xf32> to vector<4x2x16xf32>
    %c0_188 = arith.constant 0 : index
    %c0_189 = arith.constant 0 : index
    %c0_190 = arith.constant 0 : index
    %271 = vector.load %arg4[%c0_188, %c0_189, %c0_190] : memref<4x16x4xf32, #tpu.memory_space<vmem>>, vector<1x16x4xf32>
    %272 = vector.shape_cast %271 : vector<1x16x4xf32> to vector<16x4xf32>
    %273 = vector.shape_cast %272 : vector<16x4xf32> to vector<1x16x4xf32>
    %274 = vector.broadcast %273 : vector<1x16x4xf32> to vector<4x16x4xf32>
    "tpu.trace_start"() <{level = 10 : i32, message = "hwk,hkc->hwc"}> : () -> ()
    %cst_191 = arith.constant dense<0.000000e+00> : vector<4x2x4xf32>
    %275 = tpu.matmul %270, %274, %cst_191 {dimension_numbers = #tpu.dot_dimension_numbers<[2], [1], [1], [2], [0, 0, 0, 1, 1, 2], [0], [0]>} : vector<4x2x16xf32>, vector<4x16x4xf32>, vector<4x2x4xf32> -> vector<4x2x4xf32>
    "tpu.trace_stop"() : () -> ()
    %276 = arith.addf %266, %275 : vector<4x2x4xf32>
    %c0_192 = arith.constant 0 : index
    %c0_193 = arith.constant 0 : index
    %c0_194 = arith.constant 0 : index
    %277 = vector.load %arg9[%c0_192, %c0_193, %c0_194] : memref<10x3x16xf32, #tpu.memory_space<vmem>>, vector<10x2x16xf32>
    %278 = vector.shape_cast %277 : vector<10x2x16xf32> to vector<5x2x2x16xf32>
    %279 = vector.extract_strided_slice %278 {offsets = [0, 1, 0, 0], sizes = [4, 1, 2, 16], strides = [1, 1, 1, 1]} : vector<5x2x2x16xf32> to vector<4x1x2x16xf32>
    %280 = vector.shape_cast %279 : vector<4x1x2x16xf32> to vector<4x2x16xf32>
    %c1_195 = arith.constant 1 : index
    %c0_196 = arith.constant 0 : index
    %c0_197 = arith.constant 0 : index
    %281 = vector.load %arg4[%c1_195, %c0_196, %c0_197] : memref<4x16x4xf32, #tpu.memory_space<vmem>>, vector<1x16x4xf32>
    %282 = vector.shape_cast %281 : vector<1x16x4xf32> to vector<16x4xf32>
    %283 = vector.shape_cast %282 : vector<16x4xf32> to vector<1x16x4xf32>
    %284 = vector.broadcast %283 : vector<1x16x4xf32> to vector<4x16x4xf32>
    "tpu.trace_start"() <{level = 10 : i32, message = "hwk,hkc->hwc"}> : () -> ()
    %cst_198 = arith.constant dense<0.000000e+00> : vector<4x2x4xf32>
    %285 = tpu.matmul %280, %284, %cst_198 {dimension_numbers = #tpu.dot_dimension_numbers<[2], [1], [1], [2], [0, 0, 0, 1, 1, 2], [0], [0]>} : vector<4x2x16xf32>, vector<4x16x4xf32>, vector<4x2x4xf32> -> vector<4x2x4xf32>
    "tpu.trace_stop"() : () -> ()
    %286 = arith.addf %276, %285 : vector<4x2x4xf32>
    %c0_199 = arith.constant 0 : index
    %c0_200 = arith.constant 0 : index
    %c0_201 = arith.constant 0 : index
    %287 = vector.load %arg9[%c0_199, %c0_200, %c0_201] : memref<10x3x16xf32, #tpu.memory_space<vmem>>, vector<10x2x16xf32>
    %288 = vector.shape_cast %287 : vector<10x2x16xf32> to vector<5x2x2x16xf32>
    %289 = vector.extract_strided_slice %288 {offsets = [1, 0, 0, 0], sizes = [4, 1, 2, 16], strides = [1, 1, 1, 1]} : vector<5x2x2x16xf32> to vector<4x1x2x16xf32>
    %290 = vector.shape_cast %289 : vector<4x1x2x16xf32> to vector<4x2x16xf32>
    %c2_202 = arith.constant 2 : index
    %c0_203 = arith.constant 0 : index
    %c0_204 = arith.constant 0 : index
    %291 = vector.load %arg4[%c2_202, %c0_203, %c0_204] : memref<4x16x4xf32, #tpu.memory_space<vmem>>, vector<1x16x4xf32>
    %292 = vector.shape_cast %291 : vector<1x16x4xf32> to vector<16x4xf32>
    %293 = vector.shape_cast %292 : vector<16x4xf32> to vector<1x16x4xf32>
    %294 = vector.broadcast %293 : vector<1x16x4xf32> to vector<4x16x4xf32>
    "tpu.trace_start"() <{level = 10 : i32, message = "hwk,hkc->hwc"}> : () -> ()
    %cst_205 = arith.constant dense<0.000000e+00> : vector<4x2x4xf32>
    %295 = tpu.matmul %290, %294, %cst_205 {dimension_numbers = #tpu.dot_dimension_numbers<[2], [1], [1], [2], [0, 0, 0, 1, 1, 2], [0], [0]>} : vector<4x2x16xf32>, vector<4x16x4xf32>, vector<4x2x4xf32> -> vector<4x2x4xf32>
    "tpu.trace_stop"() : () -> ()
    %296 = arith.addf %286, %295 : vector<4x2x4xf32>
    %c0_206 = arith.constant 0 : index
    %c0_207 = arith.constant 0 : index
    %c0_208 = arith.constant 0 : index
    %297 = vector.load %arg9[%c0_206, %c0_207, %c0_208] : memref<10x3x16xf32, #tpu.memory_space<vmem>>, vector<10x2x16xf32>
    %298 = vector.shape_cast %297 : vector<10x2x16xf32> to vector<5x2x2x16xf32>
    %299 = vector.extract_strided_slice %298 {offsets = [1, 1, 0, 0], sizes = [4, 1, 2, 16], strides = [1, 1, 1, 1]} : vector<5x2x2x16xf32> to vector<4x1x2x16xf32>
    %300 = vector.shape_cast %299 : vector<4x1x2x16xf32> to vector<4x2x16xf32>
    %c3_209 = arith.constant 3 : index
    %c0_210 = arith.constant 0 : index
    %c0_211 = arith.constant 0 : index
    %301 = vector.load %arg4[%c3_209, %c0_210, %c0_211] : memref<4x16x4xf32, #tpu.memory_space<vmem>>, vector<1x16x4xf32>
    %302 = vector.shape_cast %301 : vector<1x16x4xf32> to vector<16x4xf32>
    %303 = vector.shape_cast %302 : vector<16x4xf32> to vector<1x16x4xf32>
    %304 = vector.broadcast %303 : vector<1x16x4xf32> to vector<4x16x4xf32>
    "tpu.trace_start"() <{level = 10 : i32, message = "hwk,hkc->hwc"}> : () -> ()
    %cst_212 = arith.constant dense<0.000000e+00> : vector<4x2x4xf32>
    %305 = tpu.matmul %300, %304, %cst_212 {dimension_numbers = #tpu.dot_dimension_numbers<[2], [1], [1], [2], [0, 0, 0, 1, 1, 2], [0], [0]>} : vector<4x2x16xf32>, vector<4x16x4xf32>, vector<4x2x4xf32> -> vector<4x2x4xf32>
    "tpu.trace_stop"() : () -> ()
    %306 = arith.addf %296, %305 : vector<4x2x4xf32>
    %307 = vector.broadcast %265 : vector<1x1x4xf32> to vector<4x2x4xf32>
    %308 = arith.addf %306, %307 : vector<4x2x4xf32>
    %309 = arith.negf %308 : vector<4x2x4xf32>
    %310 = math.exp %309 : vector<4x2x4xf32>
    %cst_213 = arith.constant 1.000000e+00 : f32
    %311 = vector.broadcast %cst_213 : f32 to vector<4x2x4xf32>
    %312 = arith.addf %311, %310 : vector<4x2x4xf32>
    %313 = arith.divf %311, %312 : vector<4x2x4xf32>
    %314 = arith.mulf %308, %313 : vector<4x2x4xf32>
    %cst_214 = arith.constant 0.000000e+00 : f32
    %315 = vector.broadcast %cst_214 : f32 to vector<4x2x4xf32>
    %c0_215 = arith.constant 0 : index
    %c0_216 = arith.constant 0 : index
    %c8_217 = arith.constant 8 : index
    %316 = vector.load %arg9[%c0_215, %c0_216, %c8_217] : memref<10x3x16xf32, #tpu.memory_space<vmem>>, vector<10x2x8xf32>
    %317 = vector.shape_cast %316 : vector<10x2x8xf32> to vector<5x2x2x8xf32>
    %318 = vector.extract_strided_slice %317 {offsets = [0, 0, 0, 0], sizes = [4, 1, 2, 8], strides = [1, 1, 1, 1]} : vector<5x2x2x8xf32> to vector<4x1x2x8xf32>
    %319 = vector.shape_cast %318 : vector<4x1x2x8xf32> to vector<4x2x8xf32>
    %c0_218 = arith.constant 0 : index
    %c0_219 = arith.constant 0 : index
    %c0_220 = arith.constant 0 : index
    %320 = vector.load %arg4[%c0_218, %c0_219, %c0_220] : memref<4x16x4xf32, #tpu.memory_space<vmem>>, vector<1x8x4xf32>
    %321 = vector.shape_cast %320 : vector<1x8x4xf32> to vector<8x4xf32>
    %322 = vector.shape_cast %321 : vector<8x4xf32> to vector<1x8x4xf32>
    %323 = vector.broadcast %322 : vector<1x8x4xf32> to vector<4x8x4xf32>
    "tpu.trace_start"() <{level = 10 : i32, message = "hwk,hkc->hwc"}> : () -> ()
    %cst_221 = arith.constant dense<0.000000e+00> : vector<4x2x4xf32>
    %324 = tpu.matmul %319, %323, %cst_221 {dimension_numbers = #tpu.dot_dimension_numbers<[2], [1], [1], [2], [0, 0, 0, 1, 1, 2], [0], [0]>} : vector<4x2x8xf32>, vector<4x8x4xf32>, vector<4x2x4xf32> -> vector<4x2x4xf32>
    "tpu.trace_stop"() : () -> ()
    %325 = arith.addf %315, %324 : vector<4x2x4xf32>
    %c0_222 = arith.constant 0 : index
    %c1_223 = arith.constant 1 : index
    %c0_224 = arith.constant 0 : index
    %326 = vector.load %arg9[%c0_222, %c1_223, %c0_224] : memref<10x3x16xf32, #tpu.memory_space<vmem>>, vector<10x2x8xf32>
    %327 = vector.shape_cast %326 : vector<10x2x8xf32> to vector<5x2x2x8xf32>
    %328 = vector.extract_strided_slice %327 {offsets = [0, 0, 0, 0], sizes = [4, 1, 2, 8], strides = [1, 1, 1, 1]} : vector<5x2x2x8xf32> to vector<4x1x2x8xf32>
    %329 = vector.shape_cast %328 : vector<4x1x2x8xf32> to vector<4x2x8xf32>
    %c0_225 = arith.constant 0 : index
    %c8_226 = arith.constant 8 : index
    %c0_227 = arith.constant 0 : index
    %330 = vector.load %arg4[%c0_225, %c8_226, %c0_227] : memref<4x16x4xf32, #tpu.memory_space<vmem>>, vector<1x8x4xf32>
    %331 = vector.shape_cast %330 : vector<1x8x4xf32> to vector<8x4xf32>
    %332 = vector.shape_cast %331 : vector<8x4xf32> to vector<1x8x4xf32>
    %333 = vector.broadcast %332 : vector<1x8x4xf32> to vector<4x8x4xf32>
    "tpu.trace_start"() <{level = 10 : i32, message = "hwk,hkc->hwc"}> : () -> ()
    %cst_228 = arith.constant dense<0.000000e+00> : vector<4x2x4xf32>
    %334 = tpu.matmul %329, %333, %cst_228 {dimension_numbers = #tpu.dot_dimension_numbers<[2], [1], [1], [2], [0, 0, 0, 1, 1, 2], [0], [0]>} : vector<4x2x8xf32>, vector<4x8x4xf32>, vector<4x2x4xf32> -> vector<4x2x4xf32>
    "tpu.trace_stop"() : () -> ()
    %335 = arith.addf %325, %334 : vector<4x2x4xf32>
    %c0_229 = arith.constant 0 : index
    %c0_230 = arith.constant 0 : index
    %c8_231 = arith.constant 8 : index
    %336 = vector.load %arg9[%c0_229, %c0_230, %c8_231] : memref<10x3x16xf32, #tpu.memory_space<vmem>>, vector<10x2x8xf32>
    %337 = vector.shape_cast %336 : vector<10x2x8xf32> to vector<5x2x2x8xf32>
    %338 = vector.extract_strided_slice %337 {offsets = [0, 1, 0, 0], sizes = [4, 1, 2, 8], strides = [1, 1, 1, 1]} : vector<5x2x2x8xf32> to vector<4x1x2x8xf32>
    %339 = vector.shape_cast %338 : vector<4x1x2x8xf32> to vector<4x2x8xf32>
    %c1_232 = arith.constant 1 : index
    %c0_233 = arith.constant 0 : index
    %c0_234 = arith.constant 0 : index
    %340 = vector.load %arg4[%c1_232, %c0_233, %c0_234] : memref<4x16x4xf32, #tpu.memory_space<vmem>>, vector<1x8x4xf32>
    %341 = vector.shape_cast %340 : vector<1x8x4xf32> to vector<8x4xf32>
    %342 = vector.shape_cast %341 : vector<8x4xf32> to vector<1x8x4xf32>
    %343 = vector.broadcast %342 : vector<1x8x4xf32> to vector<4x8x4xf32>
    "tpu.trace_start"() <{level = 10 : i32, message = "hwk,hkc->hwc"}> : () -> ()
    %cst_235 = arith.constant dense<0.000000e+00> : vector<4x2x4xf32>
    %344 = tpu.matmul %339, %343, %cst_235 {dimension_numbers = #tpu.dot_dimension_numbers<[2], [1], [1], [2], [0, 0, 0, 1, 1, 2], [0], [0]>} : vector<4x2x8xf32>, vector<4x8x4xf32>, vector<4x2x4xf32> -> vector<4x2x4xf32>
    "tpu.trace_stop"() : () -> ()
    %345 = arith.addf %335, %344 : vector<4x2x4xf32>
    %c0_236 = arith.constant 0 : index
    %c1_237 = arith.constant 1 : index
    %c0_238 = arith.constant 0 : index
    %346 = vector.load %arg9[%c0_236, %c1_237, %c0_238] : memref<10x3x16xf32, #tpu.memory_space<vmem>>, vector<10x2x8xf32>
    %347 = vector.shape_cast %346 : vector<10x2x8xf32> to vector<5x2x2x8xf32>
    %348 = vector.extract_strided_slice %347 {offsets = [0, 1, 0, 0], sizes = [4, 1, 2, 8], strides = [1, 1, 1, 1]} : vector<5x2x2x8xf32> to vector<4x1x2x8xf32>
    %349 = vector.shape_cast %348 : vector<4x1x2x8xf32> to vector<4x2x8xf32>
    %c1_239 = arith.constant 1 : index
    %c8_240 = arith.constant 8 : index
    %c0_241 = arith.constant 0 : index
    %350 = vector.load %arg4[%c1_239, %c8_240, %c0_241] : memref<4x16x4xf32, #tpu.memory_space<vmem>>, vector<1x8x4xf32>
    %351 = vector.shape_cast %350 : vector<1x8x4xf32> to vector<8x4xf32>
    %352 = vector.shape_cast %351 : vector<8x4xf32> to vector<1x8x4xf32>
    %353 = vector.broadcast %352 : vector<1x8x4xf32> to vector<4x8x4xf32>
    "tpu.trace_start"() <{level = 10 : i32, message = "hwk,hkc->hwc"}> : () -> ()
    %cst_242 = arith.constant dense<0.000000e+00> : vector<4x2x4xf32>
    %354 = tpu.matmul %349, %353, %cst_242 {dimension_numbers = #tpu.dot_dimension_numbers<[2], [1], [1], [2], [0, 0, 0, 1, 1, 2], [0], [0]>} : vector<4x2x8xf32>, vector<4x8x4xf32>, vector<4x2x4xf32> -> vector<4x2x4xf32>
    "tpu.trace_stop"() : () -> ()
    %355 = arith.addf %345, %354 : vector<4x2x4xf32>
    %c0_243 = arith.constant 0 : index
    %c0_244 = arith.constant 0 : index
    %c8_245 = arith.constant 8 : index
    %356 = vector.load %arg9[%c0_243, %c0_244, %c8_245] : memref<10x3x16xf32, #tpu.memory_space<vmem>>, vector<10x2x8xf32>
    %357 = vector.shape_cast %356 : vector<10x2x8xf32> to vector<5x2x2x8xf32>
    %358 = vector.extract_strided_slice %357 {offsets = [1, 0, 0, 0], sizes = [4, 1, 2, 8], strides = [1, 1, 1, 1]} : vector<5x2x2x8xf32> to vector<4x1x2x8xf32>
    %359 = vector.shape_cast %358 : vector<4x1x2x8xf32> to vector<4x2x8xf32>
    %c2_246 = arith.constant 2 : index
    %c0_247 = arith.constant 0 : index
    %c0_248 = arith.constant 0 : index
    %360 = vector.load %arg4[%c2_246, %c0_247, %c0_248] : memref<4x16x4xf32, #tpu.memory_space<vmem>>, vector<1x8x4xf32>
    %361 = vector.shape_cast %360 : vector<1x8x4xf32> to vector<8x4xf32>
    %362 = vector.shape_cast %361 : vector<8x4xf32> to vector<1x8x4xf32>
    %363 = vector.broadcast %362 : vector<1x8x4xf32> to vector<4x8x4xf32>
    "tpu.trace_start"() <{level = 10 : i32, message = "hwk,hkc->hwc"}> : () -> ()
    %cst_249 = arith.constant dense<0.000000e+00> : vector<4x2x4xf32>
    %364 = tpu.matmul %359, %363, %cst_249 {dimension_numbers = #tpu.dot_dimension_numbers<[2], [1], [1], [2], [0, 0, 0, 1, 1, 2], [0], [0]>} : vector<4x2x8xf32>, vector<4x8x4xf32>, vector<4x2x4xf32> -> vector<4x2x4xf32>
    "tpu.trace_stop"() : () -> ()
    %365 = arith.addf %355, %364 : vector<4x2x4xf32>
    %c0_250 = arith.constant 0 : index
    %c1_251 = arith.constant 1 : index
    %c0_252 = arith.constant 0 : index
    %366 = vector.load %arg9[%c0_250, %c1_251, %c0_252] : memref<10x3x16xf32, #tpu.memory_space<vmem>>, vector<10x2x8xf32>
    %367 = vector.shape_cast %366 : vector<10x2x8xf32> to vector<5x2x2x8xf32>
    %368 = vector.extract_strided_slice %367 {offsets = [1, 0, 0, 0], sizes = [4, 1, 2, 8], strides = [1, 1, 1, 1]} : vector<5x2x2x8xf32> to vector<4x1x2x8xf32>
    %369 = vector.shape_cast %368 : vector<4x1x2x8xf32> to vector<4x2x8xf32>
    %c2_253 = arith.constant 2 : index
    %c8_254 = arith.constant 8 : index
    %c0_255 = arith.constant 0 : index
    %370 = vector.load %arg4[%c2_253, %c8_254, %c0_255] : memref<4x16x4xf32, #tpu.memory_space<vmem>>, vector<1x8x4xf32>
    %371 = vector.shape_cast %370 : vector<1x8x4xf32> to vector<8x4xf32>
    %372 = vector.shape_cast %371 : vector<8x4xf32> to vector<1x8x4xf32>
    %373 = vector.broadcast %372 : vector<1x8x4xf32> to vector<4x8x4xf32>
    "tpu.trace_start"() <{level = 10 : i32, message = "hwk,hkc->hwc"}> : () -> ()
    %cst_256 = arith.constant dense<0.000000e+00> : vector<4x2x4xf32>
    %374 = tpu.matmul %369, %373, %cst_256 {dimension_numbers = #tpu.dot_dimension_numbers<[2], [1], [1], [2], [0, 0, 0, 1, 1, 2], [0], [0]>} : vector<4x2x8xf32>, vector<4x8x4xf32>, vector<4x2x4xf32> -> vector<4x2x4xf32>
    "tpu.trace_stop"() : () -> ()
    %375 = arith.addf %365, %374 : vector<4x2x4xf32>
    %c0_257 = arith.constant 0 : index
    %c0_258 = arith.constant 0 : index
    %c8_259 = arith.constant 8 : index
    %376 = vector.load %arg9[%c0_257, %c0_258, %c8_259] : memref<10x3x16xf32, #tpu.memory_space<vmem>>, vector<10x2x8xf32>
    %377 = vector.shape_cast %376 : vector<10x2x8xf32> to vector<5x2x2x8xf32>
    %378 = vector.extract_strided_slice %377 {offsets = [1, 1, 0, 0], sizes = [4, 1, 2, 8], strides = [1, 1, 1, 1]} : vector<5x2x2x8xf32> to vector<4x1x2x8xf32>
    %379 = vector.shape_cast %378 : vector<4x1x2x8xf32> to vector<4x2x8xf32>
    %c3_260 = arith.constant 3 : index
    %c0_261 = arith.constant 0 : index
    %c0_262 = arith.constant 0 : index
    %380 = vector.load %arg4[%c3_260, %c0_261, %c0_262] : memref<4x16x4xf32, #tpu.memory_space<vmem>>, vector<1x8x4xf32>
    %381 = vector.shape_cast %380 : vector<1x8x4xf32> to vector<8x4xf32>
    %382 = vector.shape_cast %381 : vector<8x4xf32> to vector<1x8x4xf32>
    %383 = vector.broadcast %382 : vector<1x8x4xf32> to vector<4x8x4xf32>
    "tpu.trace_start"() <{level = 10 : i32, message = "hwk,hkc->hwc"}> : () -> ()
    %cst_263 = arith.constant dense<0.000000e+00> : vector<4x2x4xf32>
    %384 = tpu.matmul %379, %383, %cst_263 {dimension_numbers = #tpu.dot_dimension_numbers<[2], [1], [1], [2], [0, 0, 0, 1, 1, 2], [0], [0]>} : vector<4x2x8xf32>, vector<4x8x4xf32>, vector<4x2x4xf32> -> vector<4x2x4xf32>
    "tpu.trace_stop"() : () -> ()
    %385 = arith.addf %375, %384 : vector<4x2x4xf32>
    %c0_264 = arith.constant 0 : index
    %c1_265 = arith.constant 1 : index
    %c0_266 = arith.constant 0 : index
    %386 = vector.load %arg9[%c0_264, %c1_265, %c0_266] : memref<10x3x16xf32, #tpu.memory_space<vmem>>, vector<10x2x8xf32>
    %387 = vector.shape_cast %386 : vector<10x2x8xf32> to vector<5x2x2x8xf32>
    %388 = vector.extract_strided_slice %387 {offsets = [1, 1, 0, 0], sizes = [4, 1, 2, 8], strides = [1, 1, 1, 1]} : vector<5x2x2x8xf32> to vector<4x1x2x8xf32>
    %389 = vector.shape_cast %388 : vector<4x1x2x8xf32> to vector<4x2x8xf32>
    %c3_267 = arith.constant 3 : index
    %c8_268 = arith.constant 8 : index
    %c0_269 = arith.constant 0 : index
    %390 = vector.load %arg4[%c3_267, %c8_268, %c0_269] : memref<4x16x4xf32, #tpu.memory_space<vmem>>, vector<1x8x4xf32>
    %391 = vector.shape_cast %390 : vector<1x8x4xf32> to vector<8x4xf32>
    %392 = vector.shape_cast %391 : vector<8x4xf32> to vector<1x8x4xf32>
    %393 = vector.broadcast %392 : vector<1x8x4xf32> to vector<4x8x4xf32>
    "tpu.trace_start"() <{level = 10 : i32, message = "hwk,hkc->hwc"}> : () -> ()
    %cst_270 = arith.constant dense<0.000000e+00> : vector<4x2x4xf32>
    %394 = tpu.matmul %389, %393, %cst_270 {dimension_numbers = #tpu.dot_dimension_numbers<[2], [1], [1], [2], [0, 0, 0, 1, 1, 2], [0], [0]>} : vector<4x2x8xf32>, vector<4x8x4xf32>, vector<4x2x4xf32> -> vector<4x2x4xf32>
    "tpu.trace_stop"() : () -> ()
    %395 = arith.addf %385, %394 : vector<4x2x4xf32>
    %396 = vector.broadcast %265 : vector<1x1x4xf32> to vector<4x2x4xf32>
    %397 = arith.addf %395, %396 : vector<4x2x4xf32>
    %398 = arith.negf %397 : vector<4x2x4xf32>
    %399 = math.exp %398 : vector<4x2x4xf32>
    %cst_271 = arith.constant 1.000000e+00 : f32
    %400 = vector.broadcast %cst_271 : f32 to vector<4x2x4xf32>
    %401 = arith.addf %400, %399 : vector<4x2x4xf32>
    %402 = arith.divf %400, %401 : vector<4x2x4xf32>
    %403 = arith.mulf %397, %402 : vector<4x2x4xf32>
    %c1_272 = arith.constant 1 : index
    %c0_273 = arith.constant 0 : index
    %c4_274 = arith.constant 4 : index
    %404 = vector.load %arg10[%c1_272, %c0_273, %c4_274] : memref<6x3x8xf32, #tpu.memory_space<vmem>>, vector<4x2x4xf32>
    tpu.vector_store %arg10[%c1_272, %c0_273, %c4_274], %314 {strides = array<i32>} : memref<6x3x8xf32, #tpu.memory_space<vmem>>, vector<4x2x4xf32>,
    %c1_275 = arith.constant 1 : index
    %c1_276 = arith.constant 1 : index
    %c0_277 = arith.constant 0 : index
    %405 = vector.load %arg10[%c1_275, %c1_276, %c0_277] : memref<6x3x8xf32, #tpu.memory_space<vmem>>, vector<4x2x4xf32>
    tpu.vector_store %arg10[%c1_275, %c1_276, %c0_277], %403 {strides = array<i32>} : memref<6x3x8xf32, #tpu.memory_space<vmem>>, vector<4x2x4xf32>,
    %c0_278 = arith.constant 0 : index
    %c0_279 = arith.constant 0 : index
    %c0_280 = arith.constant 0 : index
    %406 = vector.load %arg7[%c0_278, %c0_279, %c0_280] : memref<1x1x8xf32, #tpu.memory_space<vmem>>, vector<1x1x8xf32>
    %cst_281 = arith.constant 0.000000e+00 : f32
    %407 = vector.broadcast %cst_281 : f32 to vector<2x2x8xf32>
    %c0_282 = arith.constant 0 : index
    %c0_283 = arith.constant 0 : index
    %c0_284 = arith.constant 0 : index
    %408 = vector.load %arg10[%c0_282, %c0_283, %c0_284] : memref<6x3x8xf32, #tpu.memory_space<vmem>>, vector<6x2x8xf32>
    %409 = vector.shape_cast %408 : vector<6x2x8xf32> to vector<3x2x2x8xf32>
    %410 = vector.extract_strided_slice %409 {offsets = [0, 0, 0, 0], sizes = [2, 1, 2, 8], strides = [1, 1, 1, 1]} : vector<3x2x2x8xf32> to vector<2x1x2x8xf32>
    %411 = vector.shape_cast %410 : vector<2x1x2x8xf32> to vector<2x2x8xf32>
    %c0_285 = arith.constant 0 : index
    %c0_286 = arith.constant 0 : index
    %c0_287 = arith.constant 0 : index
    %412 = vector.load %arg6[%c0_285, %c0_286, %c0_287] : memref<4x16x8xf32, #tpu.memory_space<vmem>>, vector<1x8x8xf32>
    %413 = vector.shape_cast %412 : vector<1x8x8xf32> to vector<8x8xf32>
    %414 = vector.shape_cast %413 : vector<8x8xf32> to vector<1x8x8xf32>
    %415 = vector.broadcast %414 : vector<1x8x8xf32> to vector<2x8x8xf32>
    "tpu.trace_start"() <{level = 10 : i32, message = "hwk,hkc->hwc"}> : () -> ()
    %cst_288 = arith.constant dense<0.000000e+00> : vector<2x2x8xf32>
    %416 = tpu.matmul %411, %415, %cst_288 {dimension_numbers = #tpu.dot_dimension_numbers<[2], [1], [1], [2], [0, 0, 0, 1, 1, 2], [0], [0]>} : vector<2x2x8xf32>, vector<2x8x8xf32>, vector<2x2x8xf32> -> vector<2x2x8xf32>
    "tpu.trace_stop"() : () -> ()
    %417 = arith.addf %407, %416 : vector<2x2x8xf32>
    %c0_289 = arith.constant 0 : index
    %c1_290 = arith.constant 1 : index
    %c0_291 = arith.constant 0 : index
    %418 = vector.load %arg10[%c0_289, %c1_290, %c0_291] : memref<6x3x8xf32, #tpu.memory_space<vmem>>, vector<6x2x8xf32>
    %419 = vector.shape_cast %418 : vector<6x2x8xf32> to vector<3x2x2x8xf32>
    %420 = vector.extract_strided_slice %419 {offsets = [0, 0, 0, 0], sizes = [2, 1, 2, 8], strides = [1, 1, 1, 1]} : vector<3x2x2x8xf32> to vector<2x1x2x8xf32>
    %421 = vector.shape_cast %420 : vector<2x1x2x8xf32> to vector<2x2x8xf32>
    %c0_292 = arith.constant 0 : index
    %c8_293 = arith.constant 8 : index
    %c0_294 = arith.constant 0 : index
    %422 = vector.load %arg6[%c0_292, %c8_293, %c0_294] : memref<4x16x8xf32, #tpu.memory_space<vmem>>, vector<1x8x8xf32>
    %423 = vector.shape_cast %422 : vector<1x8x8xf32> to vector<8x8xf32>
    %424 = vector.shape_cast %423 : vector<8x8xf32> to vector<1x8x8xf32>
    %425 = vector.broadcast %424 : vector<1x8x8xf32> to vector<2x8x8xf32>
    "tpu.trace_start"() <{level = 10 : i32, message = "hwk,hkc->hwc"}> : () -> ()
    %cst_295 = arith.constant dense<0.000000e+00> : vector<2x2x8xf32>
    %426 = tpu.matmul %421, %425, %cst_295 {dimension_numbers = #tpu.dot_dimension_numbers<[2], [1], [1], [2], [0, 0, 0, 1, 1, 2], [0], [0]>} : vector<2x2x8xf32>, vector<2x8x8xf32>, vector<2x2x8xf32> -> vector<2x2x8xf32>
    "tpu.trace_stop"() : () -> ()
    %427 = arith.addf %417, %426 : vector<2x2x8xf32>
    %c0_296 = arith.constant 0 : index
    %c0_297 = arith.constant 0 : index
    %c0_298 = arith.constant 0 : index
    %428 = vector.load %arg10[%c0_296, %c0_297, %c0_298] : memref<6x3x8xf32, #tpu.memory_space<vmem>>, vector<6x2x8xf32>
    %429 = vector.shape_cast %428 : vector<6x2x8xf32> to vector<3x2x2x8xf32>
    %430 = vector.extract_strided_slice %429 {offsets = [0, 1, 0, 0], sizes = [2, 1, 2, 8], strides = [1, 1, 1, 1]} : vector<3x2x2x8xf32> to vector<2x1x2x8xf32>
    %431 = vector.shape_cast %430 : vector<2x1x2x8xf32> to vector<2x2x8xf32>
    %c1_299 = arith.constant 1 : index
    %c0_300 = arith.constant 0 : index
    %c0_301 = arith.constant 0 : index
    %432 = vector.load %arg6[%c1_299, %c0_300, %c0_301] : memref<4x16x8xf32, #tpu.memory_space<vmem>>, vector<1x8x8xf32>
    %433 = vector.shape_cast %432 : vector<1x8x8xf32> to vector<8x8xf32>
    %434 = vector.shape_cast %433 : vector<8x8xf32> to vector<1x8x8xf32>
    %435 = vector.broadcast %434 : vector<1x8x8xf32> to vector<2x8x8xf32>
    "tpu.trace_start"() <{level = 10 : i32, message = "hwk,hkc->hwc"}> : () -> ()
    %cst_302 = arith.constant dense<0.000000e+00> : vector<2x2x8xf32>
    %436 = tpu.matmul %431, %435, %cst_302 {dimension_numbers = #tpu.dot_dimension_numbers<[2], [1], [1], [2], [0, 0, 0, 1, 1, 2], [0], [0]>} : vector<2x2x8xf32>, vector<2x8x8xf32>, vector<2x2x8xf32> -> vector<2x2x8xf32>
    "tpu.trace_stop"() : () -> ()
    %437 = arith.addf %427, %436 : vector<2x2x8xf32>
    %c0_303 = arith.constant 0 : index
    %c1_304 = arith.constant 1 : index
    %c0_305 = arith.constant 0 : index
    %438 = vector.load %arg10[%c0_303, %c1_304, %c0_305] : memref<6x3x8xf32, #tpu.memory_space<vmem>>, vector<6x2x8xf32>
    %439 = vector.shape_cast %438 : vector<6x2x8xf32> to vector<3x2x2x8xf32>
    %440 = vector.extract_strided_slice %439 {offsets = [0, 1, 0, 0], sizes = [2, 1, 2, 8], strides = [1, 1, 1, 1]} : vector<3x2x2x8xf32> to vector<2x1x2x8xf32>
    %441 = vector.shape_cast %440 : vector<2x1x2x8xf32> to vector<2x2x8xf32>
    %c1_306 = arith.constant 1 : index
    %c8_307 = arith.constant 8 : index
    %c0_308 = arith.constant 0 : index
    %442 = vector.load %arg6[%c1_306, %c8_307, %c0_308] : memref<4x16x8xf32, #tpu.memory_space<vmem>>, vector<1x8x8xf32>
    %443 = vector.shape_cast %442 : vector<1x8x8xf32> to vector<8x8xf32>
    %444 = vector.shape_cast %443 : vector<8x8xf32> to vector<1x8x8xf32>
    %445 = vector.broadcast %444 : vector<1x8x8xf32> to vector<2x8x8xf32>
    "tpu.trace_start"() <{level = 10 : i32, message = "hwk,hkc->hwc"}> : () -> ()
    %cst_309 = arith.constant dense<0.000000e+00> : vector<2x2x8xf32>
    %446 = tpu.matmul %441, %445, %cst_309 {dimension_numbers = #tpu.dot_dimension_numbers<[2], [1], [1], [2], [0, 0, 0, 1, 1, 2], [0], [0]>} : vector<2x2x8xf32>, vector<2x8x8xf32>, vector<2x2x8xf32> -> vector<2x2x8xf32>
    "tpu.trace_stop"() : () -> ()
    %447 = arith.addf %437, %446 : vector<2x2x8xf32>
    %c0_310 = arith.constant 0 : index
    %c0_311 = arith.constant 0 : index
    %c0_312 = arith.constant 0 : index
    %448 = vector.load %arg10[%c0_310, %c0_311, %c0_312] : memref<6x3x8xf32, #tpu.memory_space<vmem>>, vector<6x2x8xf32>
    %449 = vector.shape_cast %448 : vector<6x2x8xf32> to vector<3x2x2x8xf32>
    %450 = vector.extract_strided_slice %449 {offsets = [1, 0, 0, 0], sizes = [2, 1, 2, 8], strides = [1, 1, 1, 1]} : vector<3x2x2x8xf32> to vector<2x1x2x8xf32>
    %451 = vector.shape_cast %450 : vector<2x1x2x8xf32> to vector<2x2x8xf32>
    %c2_313 = arith.constant 2 : index
    %c0_314 = arith.constant 0 : index
    %c0_315 = arith.constant 0 : index
    %452 = vector.load %arg6[%c2_313, %c0_314, %c0_315] : memref<4x16x8xf32, #tpu.memory_space<vmem>>, vector<1x8x8xf32>
    %453 = vector.shape_cast %452 : vector<1x8x8xf32> to vector<8x8xf32>
    %454 = vector.shape_cast %453 : vector<8x8xf32> to vector<1x8x8xf32>
    %455 = vector.broadcast %454 : vector<1x8x8xf32> to vector<2x8x8xf32>
    "tpu.trace_start"() <{level = 10 : i32, message = "hwk,hkc->hwc"}> : () -> ()
    %cst_316 = arith.constant dense<0.000000e+00> : vector<2x2x8xf32>
    %456 = tpu.matmul %451, %455, %cst_316 {dimension_numbers = #tpu.dot_dimension_numbers<[2], [1], [1], [2], [0, 0, 0, 1, 1, 2], [0], [0]>} : vector<2x2x8xf32>, vector<2x8x8xf32>, vector<2x2x8xf32> -> vector<2x2x8xf32>
    "tpu.trace_stop"() : () -> ()
    %457 = arith.addf %447, %456 : vector<2x2x8xf32>
    %c0_317 = arith.constant 0 : index
    %c1_318 = arith.constant 1 : index
    %c0_319 = arith.constant 0 : index
    %458 = vector.load %arg10[%c0_317, %c1_318, %c0_319] : memref<6x3x8xf32, #tpu.memory_space<vmem>>, vector<6x2x8xf32>
    %459 = vector.shape_cast %458 : vector<6x2x8xf32> to vector<3x2x2x8xf32>
    %460 = vector.extract_strided_slice %459 {offsets = [1, 0, 0, 0], sizes = [2, 1, 2, 8], strides = [1, 1, 1, 1]} : vector<3x2x2x8xf32> to vector<2x1x2x8xf32>
    %461 = vector.shape_cast %460 : vector<2x1x2x8xf32> to vector<2x2x8xf32>
    %c2_320 = arith.constant 2 : index
    %c8_321 = arith.constant 8 : index
    %c0_322 = arith.constant 0 : index
    %462 = vector.load %arg6[%c2_320, %c8_321, %c0_322] : memref<4x16x8xf32, #tpu.memory_space<vmem>>, vector<1x8x8xf32>
    %463 = vector.shape_cast %462 : vector<1x8x8xf32> to vector<8x8xf32>
    %464 = vector.shape_cast %463 : vector<8x8xf32> to vector<1x8x8xf32>
    %465 = vector.broadcast %464 : vector<1x8x8xf32> to vector<2x8x8xf32>
    "tpu.trace_start"() <{level = 10 : i32, message = "hwk,hkc->hwc"}> : () -> ()
    %cst_323 = arith.constant dense<0.000000e+00> : vector<2x2x8xf32>
    %466 = tpu.matmul %461, %465, %cst_323 {dimension_numbers = #tpu.dot_dimension_numbers<[2], [1], [1], [2], [0, 0, 0, 1, 1, 2], [0], [0]>} : vector<2x2x8xf32>, vector<2x8x8xf32>, vector<2x2x8xf32> -> vector<2x2x8xf32>
    "tpu.trace_stop"() : () -> ()
    %467 = arith.addf %457, %466 : vector<2x2x8xf32>
    %c0_324 = arith.constant 0 : index
    %c0_325 = arith.constant 0 : index
    %c0_326 = arith.constant 0 : index
    %468 = vector.load %arg10[%c0_324, %c0_325, %c0_326] : memref<6x3x8xf32, #tpu.memory_space<vmem>>, vector<6x2x8xf32>
    %469 = vector.shape_cast %468 : vector<6x2x8xf32> to vector<3x2x2x8xf32>
    %470 = vector.extract_strided_slice %469 {offsets = [1, 1, 0, 0], sizes = [2, 1, 2, 8], strides = [1, 1, 1, 1]} : vector<3x2x2x8xf32> to vector<2x1x2x8xf32>
    %471 = vector.shape_cast %470 : vector<2x1x2x8xf32> to vector<2x2x8xf32>
    %c3_327 = arith.constant 3 : index
    %c0_328 = arith.constant 0 : index
    %c0_329 = arith.constant 0 : index
    %472 = vector.load %arg6[%c3_327, %c0_328, %c0_329] : memref<4x16x8xf32, #tpu.memory_space<vmem>>, vector<1x8x8xf32>
    %473 = vector.shape_cast %472 : vector<1x8x8xf32> to vector<8x8xf32>
    %474 = vector.shape_cast %473 : vector<8x8xf32> to vector<1x8x8xf32>
    %475 = vector.broadcast %474 : vector<1x8x8xf32> to vector<2x8x8xf32>
    "tpu.trace_start"() <{level = 10 : i32, message = "hwk,hkc->hwc"}> : () -> ()
    %cst_330 = arith.constant dense<0.000000e+00> : vector<2x2x8xf32>
    %476 = tpu.matmul %471, %475, %cst_330 {dimension_numbers = #tpu.dot_dimension_numbers<[2], [1], [1], [2], [0, 0, 0, 1, 1, 2], [0], [0]>} : vector<2x2x8xf32>, vector<2x8x8xf32>, vector<2x2x8xf32> -> vector<2x2x8xf32>
    "tpu.trace_stop"() : () -> ()
    %477 = arith.addf %467, %476 : vector<2x2x8xf32>
    %c0_331 = arith.constant 0 : index
    %c1_332 = arith.constant 1 : index
    %c0_333 = arith.constant 0 : index
    %478 = vector.load %arg10[%c0_331, %c1_332, %c0_333] : memref<6x3x8xf32, #tpu.memory_space<vmem>>, vector<6x2x8xf32>
    %479 = vector.shape_cast %478 : vector<6x2x8xf32> to vector<3x2x2x8xf32>
    %480 = vector.extract_strided_slice %479 {offsets = [1, 1, 0, 0], sizes = [2, 1, 2, 8], strides = [1, 1, 1, 1]} : vector<3x2x2x8xf32> to vector<2x1x2x8xf32>
    %481 = vector.shape_cast %480 : vector<2x1x2x8xf32> to vector<2x2x8xf32>
    %c3_334 = arith.constant 3 : index
    %c8_335 = arith.constant 8 : index
    %c0_336 = arith.constant 0 : index
    %482 = vector.load %arg6[%c3_334, %c8_335, %c0_336] : memref<4x16x8xf32, #tpu.memory_space<vmem>>, vector<1x8x8xf32>
    %483 = vector.shape_cast %482 : vector<1x8x8xf32> to vector<8x8xf32>
    %484 = vector.shape_cast %483 : vector<8x8xf32> to vector<1x8x8xf32>
    %485 = vector.broadcast %484 : vector<1x8x8xf32> to vector<2x8x8xf32>
    "tpu.trace_start"() <{level = 10 : i32, message = "hwk,hkc->hwc"}> : () -> ()
    %cst_337 = arith.constant dense<0.000000e+00> : vector<2x2x8xf32>
    %486 = tpu.matmul %481, %485, %cst_337 {dimension_numbers = #tpu.dot_dimension_numbers<[2], [1], [1], [2], [0, 0, 0, 1, 1, 2], [0], [0]>} : vector<2x2x8xf32>, vector<2x8x8xf32>, vector<2x2x8xf32> -> vector<2x2x8xf32>
    "tpu.trace_stop"() : () -> ()
    %487 = arith.addf %477, %486 : vector<2x2x8xf32>
    %488 = vector.broadcast %406 : vector<1x1x8xf32> to vector<2x2x8xf32>
    %489 = arith.addf %487, %488 : vector<2x2x8xf32>
    %c0_338 = arith.constant 0 : index
    %c0_339 = arith.constant 0 : index
    %c0_340 = arith.constant 0 : index
    %c0_341 = arith.constant 0 : index
    %490 = vector.load %arg8[%c0_338, %c0_339, %c0_340, %c0_341] : memref<1x2x2x8xf32, #tpu.memory_space<vmem>>, vector<1x2x2x8xf32>
    %491 = vector.shape_cast %490 : vector<1x2x2x8xf32> to vector<2x2x8xf32>
    %492 = vector.shape_cast %489 : vector<2x2x8xf32> to vector<1x2x2x8xf32>
    tpu.vector_store %arg8[%c0_338, %c0_339, %c0_340, %c0_341], %492 {strides = array<i32>} : memref<1x2x2x8xf32, #tpu.memory_space<vmem>>, vector<1x2x2x8xf32>,
    return
  }
  func.func @transform_0(%arg0: i32) -> (i32, i32, i32, i32) {
    %c0_i32 = arith.constant 0 : i32
    %c0_i32_0 = arith.constant 0 : i32
    %c0_i32_1 = arith.constant 0 : i32
    %c0_i32_2 = arith.constant 0 : i32
    return %arg0, %c0_i32, %c0_i32_0, %c0_i32_1 : i32, i32, i32, i32
  }
  func.func @transform_1(%arg0: i32) -> (i32, i32, i32) {
    %c0_i32 = arith.constant 0 : i32
    %c0_i32_0 = arith.constant 0 : i32
    %c0_i32_1 = arith.constant 0 : i32
    %c0_i32_2 = arith.constant 0 : i32
    return %c0_i32, %c0_i32_0, %c0_i32_1 : i32, i32, i32
  }
  func.func @transform_2(%arg0: i32) -> (i32, i32, i32) {
    %c0_i32 = arith.constant 0 : i32
    %c0_i32_0 = arith.constant 0 : i32
    %c0_i32_1 = arith.constant 0 : i32
    %c0_i32_2 = arith.constant 0 : i32
    return %c0_i32, %c0_i32_0, %c0_i32_1 : i32, i32, i32
  }
  func.func @transform_3(%arg0: i32) -> (i32, i32, i32) {
    %c0_i32 = arith.constant 0 : i32
    %c0_i32_0 = arith.constant 0 : i32
    %c0_i32_1 = arith.constant 0 : i32
    %c0_i32_2 = arith.constant 0 : i32
    return %c0_i32, %c0_i32_0, %c0_i32_1 : i32, i32, i32
  }
  func.func @transform_4(%arg0: i32) -> (i32, i32, i32) {
    %c0_i32 = arith.constant 0 : i32
    %c0_i32_0 = arith.constant 0 : i32
    %c0_i32_1 = arith.constant 0 : i32
    %c0_i32_2 = arith.constant 0 : i32
    return %c0_i32, %c0_i32_0, %c0_i32_1 : i32, i32, i32
  }
  func.func @transform_5(%arg0: i32) -> (i32, i32, i32) {
    %c0_i32 = arith.constant 0 : i32
    %c0_i32_0 = arith.constant 0 : i32
    %c0_i32_1 = arith.constant 0 : i32
    %c0_i32_2 = arith.constant 0 : i32
    return %c0_i32, %c0_i32_0, %c0_i32_1 : i32, i32, i32
  }
  func.func @transform_6(%arg0: i32) -> (i32, i32, i32) {
    %c0_i32 = arith.constant 0 : i32
    %c0_i32_0 = arith.constant 0 : i32
    %c0_i32_1 = arith.constant 0 : i32
    %c0_i32_2 = arith.constant 0 : i32
    return %c0_i32, %c0_i32_0, %c0_i32_1 : i32, i32, i32
  }
  func.func @transform_7(%arg0: i32) -> (i32, i32, i32, i32) {
    %c0_i32 = arith.constant 0 : i32
    %c0_i32_0 = arith.constant 0 : i32
    %c0_i32_1 = arith.constant 0 : i32
    %c0_i32_2 = arith.constant 0 : i32
    return %arg0, %c0_i32, %c0_i32_0, %c0_i32_1 : i32, i32, i32, i32
  }
}

</mosaic_0001>

<bundles_post_ra>
// kernel: tpu_custom_call.1
= control target key start
LH: loop header
LB: loop body
LE: loop exit
PB: predicated region body
PF: predicated region fallthrough
CT: control target
= control target key end

     0   :  { %12 = vsyncpa [#allocation5], 0  ;;  %s10562_s0 = inlined_call_operand.vmem [shape: f32[2,18,3,24], index: 0, kind: input, shape index: {}]   ;;  %s10563_s1 = inlined_call_operand.vmem [shape: f32[4,12,4], index: 1, kind: input, shape index: {}]   ;;  %s10564_s2 = inlined_call_operand.vmem [shape: f32[1,1,4], index: 2, kind: input, shape index: {}]   ;;  %s10565_s3 = inlined_call_operand.vmem [shape: f32[4,16,4], index: 3, kind: input, shape index: {}]   ;;  %s10566_s4 = inlined_call_operand.vmem [shape: f32[1,1,4], index: 4, kind: input, shape index: {}]   ;;  %s10567_s5 = inlined_call_operand.vmem [shape: f32[4,16,8], index: 5, kind: input, shape index: {}]   ;;  %s10568_s6 = inlined_call_operand.vmem [shape: f32[1,1,8], index: 6, kind: input, shape index: {}]   ;;  %s10569_s7 = inlined_call_operand.hbm [shape: f32[2,2,2,8], index: 7, kind: output, shape index: {}]  }
   0x1   :  { %14 = vsyncpa [#allocation5 + $0x1], 0  ;;  %s8066_s24 = smov 0   ;;  %s8068_s25 = smov 0  }
   0x2   :  { %s8070_s26 = smov 0   ;;  %s8072_s27 = smov 0  }
   0x3 LB: > { %s8087_s28 = sadd.s32 4294967295, %s8014_s27   ;;  %s7259_s29 = sadd.s32 4294967294, %s8014_s27   ;;  %s8014_s27 = sphi %s8072_s27, %s10625_s27   ;;  %s8010_s26 = sphi %s8070_s26, %s10624_s26   ;;  %s8006_s25 = sphi %s8068_s25, %s10623_s25   ;;  %s8002_s24 = sphi %s8066_s24, %s10622_s24  }
   0x4   : > { %s8091_s30 = sadd.s32 1, %s8014_s27   ;;  %s179_s8 = sadd.s32 1, %s8010_s26 }
   0x5   : > { %s176_s9 = ssub.s32 %s8014_s27, %s8091_s30  ;;  %p189_p0 = scmp.ne.s32.totalorder %s8010_s26, %s8006_s25 }
   0x6   : > { %p177_p1 = scmp.eq.s32.totalorder %s176_s9, 0  ;;  %p190_p2 = scmp.eq.s32.totalorder %s8087_s28, 1 }
   0x7   : > { %p195_p3 = scmp.ne.s32.totalorder %s8006_s25, %s8002_s24  ;;  %p196_p4 = scmp.eq.s32.totalorder %s7259_s29, 1 }
   0x8   : > { %s8102_s10 = scalar_select %p177_p1, %s8010_s26, %s179_s8  }
   0x9   : > { %p8104_p5 = por %p190_p2, %p189_p0  ;;  %p8108_p6 = por %p196_p4, %p195_p3 }
   0xa   : > { %p7262_p7 = scmp.ge.s32.totalorder %s8014_s27, 1  ;;  %p240_p8 = scmp.lt.s32.totalorder %s8014_s27, 3 }
   0xc   : > { %p241_p9 = pnand %p7262_p7, %p240_p8 }
   0xd   : > { %p272_p10 = scmp.lt.s32.totalorder (!%p241_p9), %s8087_s28, 1  ;;  %s8016_s22 = smov (!%p241_p9), 122  }
   0xe   : > { %244 = sbr.rel (%p241_p9) target bundleno = 1103 (0x44f), region = 48  ;;  %s8017_s23 = smov (!%p241_p9), 116  }
   0xf   : > { %s8021_s20 = smov (!%p241_p9), 8   ;;  %s8023_s8 = smov (!%p241_p9), 120  }
  0x10   : > { %s269_s13 = sand.u32 (!%p241_p9), 1, %s8006_s25   ;;  %s7736_s16 = sshll.u32 (!%p241_p9), %s8087_s28, 2 }
  0x11   : > { %s7263_s14 = sshll.u32 (!%p241_p9), %s269_s13, 2 }
  0x13   : > { %v7266_v0 = vld [vmem:[%s10563_s1 + $0x18] sm:$0xf]  ;;  %vm321_vm0 = vcmask 1043456   ;;  %v8121_v1 = vld [vmem:[%s10563_s1 + $0x10] sm:$0xff]  ;;  %s273_s17 = scalar_select %p272_p10, %s8087_s28, 1  ;;  %vm317_vm1 = vcmask 97280  }
  0x14   : > { %7273 = vmatpush.msk.msra.mxu3 %vm321_vm0, %v7266_v0  ;;  %7269 = vmatpush.msk.msra.mxu1 %vm321_vm0, %v7266_v0  ;;  %v305_v11 = vld [vmem:[%s10563_s1 + $0x8] sm:$0xf]  ;;  %v8166_v12 = vld [vmem:[%s10563_s1] sm:$0xff]  ;;  %v7318_v39 = vld [vmem:[%s10563_s1 + $0x38] sm:$0xf]  ;;  %s7182_s28 = scalar_lea.sflag [#allocation5], %s269_s13 }
  0x15   : > { %7271 = vmatpush.msk.msra.mxu2 %vm321_vm0, %v7266_v0  ;;  %7267 = vmatpush.msk.msra.mxu0 %vm321_vm0, %v7266_v0  ;;  %s7737_s18 = smul.u32 72, %s273_s17  ;;  %v8203_v23 = vld [vmem:[%s10563_s1 + $0x28] sm:$0xf]  ;;  %v8212_v25 = vld [vmem:[%s10563_s1 + $0x20] sm:$0xff]  ;;  %v8271_v41 = vld [vmem:[%s10563_s1 + $0x30] sm:$0xff]  ;;  %s8018_s17 = smov 110  }
  0x16   : > { %409 = vmatpush.msra.mxu3 %v8121_v1  ;;  %363 = vmatpush.msra.mxu1 %v8121_v1 }
  0x17   : > { %386 = vmatpush.msra.mxu2 %v8121_v1  ;;  %s8137_s21 = scalar_lea.vmem %s10562_s0, %s7737_s18  ;;  %340 = vmatpush.msra.mxu0 %v8121_v1 }
  0x18   : > { %7281 = vmatpush.msk.msrb.mxu3 %vm321_vm0, %v7266_v0  ;;  %7277 = vmatpush.msk.msrb.mxu1 %vm321_vm0, %v7266_v0  ;;  %v1290_v2 = vld [vmem:[%s8137_s21 + $0x24] sm:$0x3]  ;;  %v1289_v3 = vld [vmem:[%s8137_s21 + $0x1c] sm:$0x3]  ;;  %v307_v6 = vld [vmem:[%s8137_s21 + $0xc] sm:$0x3] }
  0x19   : > { %7279 = vmatpush.msk.msrb.mxu2 %vm321_vm0, %v7266_v0  ;;  %v1286_v4 = vld [vmem:[%s8137_s21 + $0x4] sm:$0x3]  ;;  %1400 = vrot.lane.b32.xlu2 %v1290_v2, %s8016_s22  ;;  %v309_v5 = vld [vmem:[%s8137_s21 + $0x1c] sm:$0x3]  ;;  %v308_v7 = vld [vmem:[%s8137_s21 + $0x14] sm:$0x3] }
  0x1a   : > { %501 = vmatpush.msrb.mxu3 %v8121_v1  ;;  %455 = vmatpush.msrb.mxu1 %v8121_v1  ;;  %v1292_v8 = vld [vmem:[%s8137_s21 + $0x34] sm:$0x3]  ;;  %v1287_v9 = vld [vmem:[%s8137_s21 + $0xc] sm:$0x3]  ;;  %v313_v13 = vld [vmem:[%s8137_s21 + $0x3c] sm:$0x3] }
  0x1b   : > { %478 = vmatpush.msrb.mxu2 %v8121_v1  ;;  %1375 = vrot.lane.b32.xlu1 %v1289_v3, %s8016_s22  ;;  %v1288_v10 = vld [vmem:[%s8137_s21 + $0x14] sm:$0x3]  ;;  %v311_v14 = vld [vmem:[%s8137_s21 + $0x2c] sm:$0x3]  ;;  %v306_v15 = vld [vmem:[%s8137_s21 + $0x4] sm:$0x3] }
  0x1c   : > { %1297 = vrot.lane.b32.xlu0 %v1286_v4, %s8016_s22  ;;  %7275 = vmatpush.msk.msrb.mxu0 %vm321_vm0, %v7266_v0  ;;  %v312_v16 = vld [vmem:[%s8137_s21 + $0x34] sm:$0x3]  ;;  %v1291_v17 = vld [vmem:[%s8137_s21 + $0x2c] sm:$0x3]  ;;  %v1276_v18 = vld [vmem:[%s8137_s21] sm:$0x3] }
  0x1d   : > { %7274 = vmatmul.msk.f32.vlgmr.msra.gmra.mxu3 %vm317_vm1, %v309_v5  ;;  %7270 = vmatmul.msk.f32.vlgmr.msra.gmra.mxu1 %vm317_vm1, %v307_v6  ;;  %v1293_v19 = vld [vmem:[%s8137_s21 + $0x3c] sm:$0x3]  ;;  %v299_v20 = vld [vmem:[%s8137_s21 + $0x18] sm:$0x3]  ;;  %v297_v21 = vld [vmem:[%s8137_s21 + $0x8] sm:$0x3] }
  0x1e   : > { %432 = vmatpush.msrb.mxu0 %v8121_v1  ;;  %7272 = vmatmul.msk.f32.vlgmr.msra.gmra.mxu2 %vm317_vm1, %v308_v7  ;;  %v310_v22 = vld [vmem:[%s8137_s21 + $0x24] sm:$0x3]  ;;  %v298_v24 = vld [vmem:[%s8137_s21 + $0x10] sm:$0x3]  ;;  %v1279_v26 = vld [vmem:[%s8137_s21 + $0x18] sm:$0x3] }
  0x1f   : > { %7289 = vmatpush.msk.msra.mxu3 %vm321_vm0, %v305_v11  ;;  %7285 = vmatpush.msk.msra.mxu1 %vm321_vm0, %v305_v11  ;;  %v1277_v27 = vld [vmem:[%s8137_s21 + $0x8] sm:$0x3]  ;;  %v1278_v28 = vld [vmem:[%s8137_s21 + $0x10] sm:$0x3]  ;;  %v303_v29 = vld [vmem:[%s8137_s21 + $0x38] sm:$0x3] }
  0x20   : > { %7268 = vmatmul.msk.f32.vlgmr.msra.gmra.mxu0 %vm317_vm1, %v306_v15  ;;  %7287 = vmatpush.msk.msra.mxu2 %vm321_vm0, %v305_v11  ;;  %v301_v30 = vld [vmem:[%s8137_s21 + $0x28] sm:$0x3]  ;;  %v296_v31 = vld [vmem:[%s8137_s21] sm:$0x3]  ;;  %v302_v32 = vld [vmem:[%s8137_s21 + $0x30] sm:$0x3] }
  0x21   : > { %1450 = vrot.lane.b32.xlu2 %v1292_v8, %s8016_s22  ;;  %596 = vmatpush.msra.mxu3 %v8166_v12  ;;  %v1282_v33 = vld [vmem:[%s8137_s21 + $0x30] sm:$0x3]  ;;  %v1283_v34 = vld [vmem:[%s8137_s21 + $0x38] sm:$0x3]  ;;  %v1280_v35 = vld [vmem:[%s8137_s21 + $0x20] sm:$0x3] }
  0x22   : > { %550 = vmatpush.msra.mxu1 %v8166_v12  ;;  %573 = vmatpush.msra.mxu2 %v8166_v12  ;;  %v696_v36 = vld [vmem:[%s8137_s21 + $0x20] sm:$0x3]  ;;  %v694_v37 = vld [vmem:[%s8137_s21 + $0x10] sm:$0x3]  ;;  %v695_v40 = vld [vmem:[%s8137_s21 + $0x18] sm:$0x3] }
  0x23   : > { %1325 = vrot.lane.b32.xlu1 %v1287_v9, %s8016_s22  ;;  %7283 = vmatpush.msk.msra.mxu0 %vm321_vm0, %v305_v11  ;;  %v300_v38 = vld [vmem:[%s8137_s21 + $0x20] sm:$0x3]  ;;  %v1702_v42 = vld [vmem:[%s8137_s21 + $0x8] sm:$0x3]  ;;  %v1704_v43 = vld [vmem:[%s8137_s21 + $0x18] sm:$0x3] }
  0x24   : > { %1350 = vrot.lane.b32.xlu0 %v1288_v10, %s8016_s22  ;;  %v1281_v44 = vld [vmem:[%s8137_s21 + $0x28] sm:$0x3]  ;;  %v700_v45 = vld [vmem:[%s8137_s21 + $0x40] sm:$0x3]  ;;  %v698_v46 = vld [vmem:[%s8137_s21 + $0x30] sm:$0x3] }
  0x25   : > { %7282 = vmatmul.msk.f32.vlgmr.msrb.gmra.mxu3 %vm317_vm1, %v313_v13  ;;  %7278 = vmatmul.msk.f32.vlgmr.msrb.gmra.mxu1 %vm317_vm1, %v311_v14  ;;  %v693_v47 = vld [vmem:[%s8137_s21 + $0x8] sm:$0x3]  ;;  %v699_v48 = vld [vmem:[%s8137_s21 + $0x38] sm:$0x3]  ;;  %v1703_v49 = vld [vmem:[%s8137_s21 + $0x10] sm:$0x3] }
  0x26   : > { %7297 = vmatpush.msk.msrb.mxu3 %vm321_vm0, %v305_v11  ;;  %7280 = vmatmul.msk.f32.vlgmr.msrb.gmra.mxu2 %vm317_vm1, %v312_v16  ;;  %v1706_v50 = vld [vmem:[%s8137_s21 + $0x28] sm:$0x3]  ;;  %v1705_v51 = vld [vmem:[%s8137_s21 + $0x20] sm:$0x3]  ;;  %v902_v52 = vld [vmem:[%s8137_s21 + $0x24] sm:$0x3] }
  0x27   : > { %7293 = vmatpush.msk.msrb.mxu1 %vm321_vm0, %v305_v11  ;;  %7295 = vmatpush.msk.msrb.mxu2 %vm321_vm0, %v305_v11  ;;  %v900_v53 = vld [vmem:[%s8137_s21 + $0x14] sm:$0x3]  ;;  %v697_v54 = vld [vmem:[%s8137_s21 + $0x28] sm:$0x3]  ;;  %v901_v55 = vld [vmem:[%s8137_s21 + $0x1c] sm:$0x3] }
  0x28   : > { %688 = vmatpush.msrb.mxu3 %v8166_v12  ;;  %7276 = vmatmul.msk.f32.vlgmr.msrb.gmra.mxu0 %vm317_vm1, %v310_v22  ;;  %v1709_v56 = vld [vmem:[%s8137_s21 + $0x40] sm:$0x3]  ;;  %v1707_v57 = vld [vmem:[%s8137_s21 + $0x30] sm:$0x3]  ;;  %v1708_v58 = vld [vmem:[%s8137_s21 + $0x38] sm:$0x3] }
  0x29   : > { %642 = vmatpush.msrb.mxu1 %v8166_v12  ;;  %1500 = vrot.lane.b32.xlu2 %v1276_v18, %s8016_s22  ;;  %v906_v59 = vld [vmem:[%s8137_s21 + $0x44] sm:$0x3]  ;;  %v904_v60 = vld [vmem:[%s8137_s21 + $0x34] sm:$0x3]  ;;  %v899_v61 = vld [vmem:[%s8137_s21 + $0xc] sm:$0x3] }
  0x2a   : > { %665 = vmatpush.msrb.mxu2 %v8166_v12  ;;  %527 = vmatpush.msra.mxu0 %v8166_v12  ;;  %v905_v62 = vld [vmem:[%s8137_s21 + $0x3c] sm:$0x3]  ;;  %v1926_v0 = vld [vmem:[%s8137_s21 + $0x24] sm:$0x3]  ;;  %v1923_v2 = vld [vmem:[%s8137_s21 + $0xc] sm:$0x3] }
  0x2b   : > { %1425 = vrot.lane.b32.xlu1 %v1291_v17, %s8016_s22  ;;  %v1925_v63 = vld [vmem:[%s8137_s21 + $0x1c] sm:$0x3]  ;;  %v903_v3 = vld [vmem:[%s8137_s21 + $0x2c] sm:$0x3]  ;;  %v1924_v6 = vld [vmem:[%s8137_s21 + $0x14] sm:$0x3] }
  0x2c   : > { %1475 = vrot.lane.b32.xlu0 %v1293_v19, %s8016_s22  ;;  %7291 = vmatpush.msk.msrb.mxu0 %vm321_vm0, %v305_v11  ;;  %v1927_v4 = vld [vmem:[%s8137_s21 + $0x2c] sm:$0x3]  ;;  %v1929_v5 = vld [vmem:[%s8137_s21 + $0x3c] sm:$0x3]  ;;  %v1928_v7 = vld [vmem:[%s8137_s21 + $0x34] sm:$0x3] }
  0x2d   : > { %7290 = vmatmul.msk.f32.vlgmr.msra.gmra.mxu3 %vm317_vm1, %v299_v20  ;;  %7286 = vmatmul.msk.f32.vlgmr.msra.gmra.mxu1 %vm317_vm1, %v297_v21  ;;  %v2322_v8 = vld [vmem:[%s8137_s21 + $0x4] sm:$0x3]  ;;  %v7344_v10 = vld [vmem:[%s10563_s1 + $0x18] sm:$0xf]  ;;  %v2325_v11 = vld [vmem:[%s8137_s21 + $0x1c] sm:$0x3] }
  0x2e   : > { %7307 = vmatpush.msk.msra.mxu3 %vm321_vm0, %v8203_v23  ;;  %7288 = vmatmul.msk.f32.vlgmr.msra.gmra.mxu2 %vm317_vm1, %v298_v24  ;;  %v1930_v9 = vld [vmem:[%s8137_s21 + $0x44] sm:$0x3]  ;;  %v2323_v13 = vld [vmem:[%s8137_s21 + $0xc] sm:$0x3]  ;;  %v2324_v14 = vld [vmem:[%s8137_s21 + $0x14] sm:$0x3] }
  0x2f   : > { %7303 = vmatpush.msk.msra.mxu1 %vm321_vm0, %v8203_v23  ;;  %7305 = vmatpush.msk.msra.mxu2 %vm321_vm0, %v8203_v23  ;;  %v2328_v16 = vld [vmem:[%s8137_s21 + $0x34] sm:$0x3]  ;;  %v2329_v17 = vld [vmem:[%s8137_s21 + $0x3c] sm:$0x3]  ;;  %v2326_v18 = vld [vmem:[%s8137_s21 + $0x24] sm:$0x3] }
  0x30   : > { %794 = vmatpush.msra.mxu3 %v8212_v25  ;;  %7284 = vmatmul.msk.f32.vlgmr.msra.gmra.mxu0 %vm317_vm1, %v296_v31  ;;  %v2312_v20 = vld [vmem:[%s8137_s21] sm:$0x3]  ;;  %v2314_v21 = vld [vmem:[%s8137_s21 + $0x10] sm:$0x3]  ;;  %v2327_v22 = vld [vmem:[%s8137_s21 + $0x2c] sm:$0x3] }
  0x31   : > { %1528 = vrot.lane.b32.xlu2 %v1277_v27, %s8016_s22  ;;  %748 = vmatpush.msra.mxu1 %v8212_v25  ;;  %v2313_v24 = vld [vmem:[%s8137_s21 + $0x8] sm:$0x3]  ;;  %v2315_v27 = vld [vmem:[%s8137_s21 + $0x18] sm:$0x3] }
  0x32   : > { %771 = vmatpush.msra.mxu2 %v8212_v25  ;;  %619 = vmatpush.msrb.mxu0 %v8166_v12 }
  0x33   : > { %1578 = vrot.lane.b32.xlu1 %v1279_v26, %s8016_s22  ;;  %v2316_v26 = vld [vmem:[%s8137_s21 + $0x20] sm:$0x3] }
  0x34   : > { %1553 = vrot.lane.b32.xlu0 %v1278_v28, %s8016_s22  ;;  %7301 = vmatpush.msk.msra.mxu0 %vm321_vm0, %v8203_v23 }
  0x35   : > { %7298 = vmatmul.msk.f32.vlgmr.msrb.gmra.mxu3 %vm317_vm1, %v303_v29  ;;  %7294 = vmatmul.msk.f32.vlgmr.msrb.gmra.mxu1 %vm317_vm1, %v301_v30  ;;  %v1285_v30 = vld [vmem:[%s10563_s1 + $0x8] sm:$0xf] }
  0x36   : > { %7315 = vmatpush.msk.msrb.mxu3 %vm321_vm0, %v8203_v23  ;;  %7296 = vmatmul.msk.f32.vlgmr.msrb.gmra.mxu2 %vm317_vm1, %v302_v32  ;;  %v2319_v32 = vld [vmem:[%s8137_s21 + $0x38] sm:$0x3] }
  0x37   : > { %7311 = vmatpush.msk.msrb.mxu1 %vm321_vm0, %v8203_v23  ;;  %7313 = vmatpush.msk.msrb.mxu2 %vm321_vm0, %v8203_v23 }
  0x38   : > { %886 = vmatpush.msrb.mxu3 %v8212_v25  ;;  %7292 = vmatmul.msk.f32.vlgmr.msrb.gmra.mxu0 %vm317_vm1, %v300_v38  ;;  %v2740_v38 = vld [vmem:[%s8137_s21 + $0x18] sm:$0x3] }
  0x39   : > { %840 = vmatpush.msrb.mxu1 %v8212_v25  ;;  %1678 = vrot.lane.b32.xlu2 %v1283_v34, %s8016_s22  ;;  %v2318_v34 = vld [vmem:[%s8137_s21 + $0x30] sm:$0x3] }
  0x3a   : > { %863 = vmatpush.msrb.mxu2 %v8212_v25  ;;  %725 = vmatpush.msra.mxu0 %v8212_v25 }
  0x3b   : > { %1653 = vrot.lane.b32.xlu1 %v1282_v33, %s8016_s22  ;;  %v2317_v33 = vld [vmem:[%s8137_s21 + $0x28] sm:$0x3] }
  0x3c   : > { %1603 = vrot.lane.b32.xlu0 %v1280_v35, %s8016_s22  ;;  %7309 = vmatpush.msk.msrb.mxu0 %vm321_vm0, %v8203_v23 }
  0x3d   : > { %7308 = vmatmul.msk.f32.vlgmr.msra.gmra.mxu3 %vm317_vm1, %v696_v36  ;;  %7304 = vmatmul.msk.f32.vlgmr.msra.gmra.mxu1 %vm317_vm1, %v694_v37 }
  0x3e   : > { %7325 = vmatpush.msk.msra.mxu3 %vm321_vm0, %v7318_v39  ;;  %7306 = vmatmul.msk.f32.vlgmr.msra.gmra.mxu2 %vm317_vm1, %v695_v40  ;;  %v2738_v40 = vld [vmem:[%s8137_s21 + $0x8] sm:$0x3] }
  0x3f   : > { %7321 = vmatpush.msk.msra.mxu1 %vm321_vm0, %v7318_v39  ;;  %7323 = vmatpush.msk.msra.mxu2 %vm321_vm0, %v7318_v39 }
  0x40   : > { %1000 = vmatpush.msra.mxu3 %v8271_v41  ;;  %7302 = vmatmul.msk.f32.vlgmr.msra.gmra.mxu0 %vm317_vm1, %v693_v47  ;;  %v2742_v47 = vld [vmem:[%s8137_s21 + $0x28] sm:$0x3] }
  0x41   : > { %954 = vmatpush.msra.mxu1 %v8271_v41  ;;  %1766 = vrot.lane.b32.xlu2 %v1704_v43, %s8016_s22 }
  0x42   : > { %977 = vmatpush.msra.mxu2 %v8271_v41  ;;  %817 = vmatpush.msrb.mxu0 %v8212_v25 }
  0x43   : > { %1713 = vrot.lane.b32.xlu1 %v1702_v42, %s8016_s22 }
  0x44   : > { %1628 = vrot.lane.b32.xlu0 %v1281_v44, %s8016_s22  ;;  %7319 = vmatpush.msk.msra.mxu0 %vm321_vm0, %v7318_v39 }
  0x45   : > { %7316 = vmatmul.msk.f32.vlgmr.msrb.gmra.mxu3 %vm317_vm1, %v700_v45  ;;  %7312 = vmatmul.msk.f32.vlgmr.msrb.gmra.mxu1 %vm317_vm1, %v698_v46  ;;  %v8442_v46 = vld [vmem:[%s10563_s1 + $0x28] sm:$0xf] }
  0x46   : > { %7333 = vmatpush.msk.msrb.mxu3 %vm321_vm0, %v7318_v39  ;;  %7314 = vmatmul.msk.f32.vlgmr.msrb.gmra.mxu2 %vm317_vm1, %v699_v48  ;;  %v2744_v48 = vld [vmem:[%s8137_s21 + $0x38] sm:$0x3] }
  0x47   : > { %7329 = vmatpush.msk.msrb.mxu1 %vm321_vm0, %v7318_v39  ;;  %7331 = vmatpush.msk.msrb.mxu2 %vm321_vm0, %v7318_v39 }
  0x48   : > { %1092 = vmatpush.msrb.mxu3 %v8271_v41  ;;  %7310 = vmatmul.msk.f32.vlgmr.msrb.gmra.mxu0 %vm317_vm1, %v697_v54 }
  0x49   : > { %1046 = vmatpush.msrb.mxu1 %v8271_v41  ;;  %1816 = vrot.lane.b32.xlu2 %v1706_v50, %s8016_s22 }
  0x4a   : > { %1069 = vmatpush.msrb.mxu2 %v8271_v41  ;;  %931 = vmatpush.msra.mxu0 %v8271_v41 }
  0x4b   : > { %1741 = vrot.lane.b32.xlu1 %v1703_v49, %s8016_s22  ;;  %v2739_v49 = vld [vmem:[%s8137_s21 + $0x10] sm:$0x3] }
  0x4c   : > { %1791 = vrot.lane.b32.xlu0 %v1705_v51, %s8016_s22  ;;  %7327 = vmatpush.msk.msrb.mxu0 %vm321_vm0, %v7318_v39  ;;  %v2741_v39 = vld [vmem:[%s8137_s21 + $0x20] sm:$0x3] }
  0x4d   : > { %7326 = vmatmul.msk.f32.vlgmr.msra.gmra.mxu3 %vm317_vm1, %v902_v52  ;;  %7322 = vmatmul.msk.f32.vlgmr.msra.gmra.mxu1 %vm317_vm1, %v900_v53 }
  0x4e   : > { %7324 = vmatmul.msk.f32.vlgmr.msra.gmra.mxu2 %vm317_vm1, %v901_v55  ;;  %1023 = vmatpush.msrb.mxu0 %v8271_v41  ;;  %v2743_v55 = vld [vmem:[%s8137_s21 + $0x30] sm:$0x3] }
  0x4f   : > { %7351 = vmatpush.msk.msra.mxu3 %vm321_vm0, %v7344_v10  ;;  %7347 = vmatpush.msk.msra.mxu1 %vm321_vm0, %v7344_v10 }
  0x50   : > { %7320 = vmatmul.msk.f32.vlgmr.msra.gmra.mxu0 %vm317_vm1, %v899_v61  ;;  %7349 = vmatpush.msk.msra.mxu2 %vm321_vm0, %v7344_v10 }
  0x51   : > { %1841 = vrot.lane.b32.xlu2 %v1707_v57, %s8016_s22  ;;  %7345 = vmatpush.msk.msra.mxu0 %vm321_vm0, %v7344_v10 }
  0x52   : > { %1394 = vmatpush.msra.mxu3 %v8121_v1  ;;  %1344 = vmatpush.msra.mxu1 %v8121_v1 }
  0x53   : > { %1891 = vrot.lane.b32.xlu1 %v1709_v56, %s8016_s22  ;;  %1319 = vmatpush.msra.mxu0 %v8121_v1  ;;  %v2959_v56 = vld [vmem:[%s8137_s21 + $0xc] sm:$0x3] }
  0x54   : > { %1866 = vrot.lane.b32.xlu0 %v1708_v58, %s8016_s22  ;;  %1369 = vmatpush.msra.mxu2 %v8121_v1 }
  0x55   : > { %7334 = vmatmul.msk.f32.vlgmr.msrb.gmra.mxu3 %vm317_vm1, %v906_v59  ;;  %7330 = vmatmul.msk.f32.vlgmr.msrb.gmra.mxu1 %vm317_vm1, %v904_v60 }
  0x56   : > { %7332 = vmatmul.msk.f32.vlgmr.msrb.gmra.mxu2 %vm317_vm1, %v905_v62  ;;  %7355 = vmatpush.msk.msrb.mxu1 %vm321_vm0, %v7344_v10 }
  0x57   : > { %7357 = vmatpush.msk.msrb.mxu2 %vm321_vm0, %v7344_v10  ;;  %7359 = vmatpush.msk.msrb.mxu3 %vm321_vm0, %v7344_v10 }
  0x58   : > { %7328 = vmatmul.msk.f32.vlgmr.msrb.gmra.mxu0 %vm317_vm1, %v903_v3  ;;  %1444 = vmatpush.msrb.mxu1 %v8121_v1 }
  0x59   : > { %2012 = vrot.lane.b32.xlu2 %v1926_v0, %s8016_s22  ;;  %7353 = vmatpush.msk.msrb.mxu0 %vm321_vm0, %v7344_v10  ;;  %v2960_v0 = vld [vmem:[%s8137_s21 + $0x14] sm:$0x3]  ;;  %v7396_v10 = vld [vmem:[%s10563_s1 + $0x38] sm:$0xf] }
  0x5a   : > { %1469 = vmatpush.msrb.mxu2 %v8121_v1  ;;  %1494 = vmatpush.msrb.mxu3 %v8121_v1 }
  0x5b   : > { %1987 = vrot.lane.b32.xlu1 %v1925_v63, %s8016_s22  ;;  %1419 = vmatpush.msrb.mxu0 %v8121_v1  ;;  %v2962_v63 = vld [vmem:[%s8137_s21 + $0x24] sm:$0x3] }
  0x5c   : > { %1934 = vrot.lane.b32.xlu0 %v1923_v2, %s8016_s22  ;;  %v2961_v2 = vld [vmem:[%s8137_s21 + $0x1c] sm:$0x3] }
  0x61   : > { %2087 = vrot.lane.b32.xlu2 %v1929_v5, %s8016_s22 }
  0x63   : > { %2037 = vrot.lane.b32.xlu1 %v1927_v4, %s8016_s22 }
  0x64   : > { %1962 = vrot.lane.b32.xlu0 %v1924_v6, %s8016_s22 }
  0x69   : > { %2333 = vrot.lane.b32.xlu2 %v2322_v8, %s8017_s23 }
  0x6b   : > { %2062 = vrot.lane.b32.xlu1 %v1928_v7, %s8016_s22 }
  0x6c   : > { %2112 = vrot.lane.b32.xlu0 %v1930_v9, %s8016_s22 }
  0x71   : > { %2361 = vrot.lane.b32.xlu2 %v2323_v13, %s8017_s23  ;;  %v2966_v13 = vld [vmem:[%s8137_s21 + $0x44] sm:$0x3] }
  0x73   : > { %2411 = vrot.lane.b32.xlu1 %v2325_v11, %s8017_s23  ;;  %v1401_v15 = vpop.permute.xlu2 %1400  ;;  %v2965_v11 = vld [vmem:[%s8137_s21 + $0x3c] sm:$0x3] }
  0x74   : > { %2386 = vrot.lane.b32.xlu0 %v2324_v14, %s8017_s23  ;;  %v2963_v14 = vld [vmem:[%s8137_s21 + $0x2c] sm:$0x3] }
  0x79   : > { %2511 = vrot.lane.b32.xlu2 %v2329_v17, %s8017_s23 }
  0x7b   : > { %2486 = vrot.lane.b32.xlu1 %v2328_v16, %s8017_s23  ;;  %v1451_v19 = vpop.permute.xlu2 %1450 }
  0x7c   : > { %2436 = vrot.lane.b32.xlu0 %v2326_v18, %s8017_s23 }
  0x81   : > { %2589 = vrot.lane.b32.xlu2 %v2314_v21, %s8017_s23  ;;  %v3348_v21 = vld [vmem:[%s8137_s21] sm:$0x3] }
  0x83   : > { %2536 = vrot.lane.b32.xlu1 %v2312_v20, %s8017_s23  ;;  %v1501_v23 = vpop.permute.xlu2 %1500 }
  0x84   : > { %2461 = vrot.lane.b32.xlu0 %v2327_v22, %s8017_s23  ;;  %v3350_v22 = vld [vmem:[%s8137_s21 + $0x10] sm:$0x3] }
  0x89   : > { %2639 = vrot.lane.b32.xlu2 %v2316_v26, %s8017_s23 }
  0x8b   : > { %2564 = vrot.lane.b32.xlu1 %v2313_v24, %s8017_s23  ;;  %v1529_v29 = vpop.permute.xlu2 %1528 }
  0x8c   : > { %2614 = vrot.lane.b32.xlu0 %v2315_v27, %s8017_s23 }
  0x8d   : > { %v1376_v28 = vpop.permute.xlu1 %1375 }
  0x8e   : > { %v1298_v31 = vpop.permute.xlu0 %1297  ;;  %7352 = vmatmul.msk.f32.vlgmr.msra.gmra.mxu3 %vm317_vm1, %v1376_v28 }
  0x8f   : > { %7346 = vmatmul.msk.f32.vlgmr.msra.gmra.mxu0 %vm317_vm1, %v1298_v31  ;;  %7367 = vmatpush.msk.msra.mxu3 %vm321_vm0, %v1285_v30  ;;  %v3352_v31 = vld [vmem:[%s8137_s21 + $0x20] sm:$0x3] }
  0x90   : > { %7361 = vmatpush.msk.msra.mxu0 %vm321_vm0, %v1285_v30 }
  0x91   : > { %1597 = vmatpush.msra.mxu3 %v8166_v12  ;;  %2664 = vrot.lane.b32.xlu2 %v2317_v33, %s8017_s23 }
  0x92   : > { %1522 = vmatpush.msra.mxu0 %v8166_v12 }
  0x93   : > { %2714 = vrot.lane.b32.xlu1 %v2319_v32, %s8017_s23  ;;  %v8415_v36 = vpop.permute.xlu2 %1678 }
  0x94   : > { %2689 = vrot.lane.b32.xlu0 %v2318_v34, %s8017_s23  ;;  %v3351_v34 = vld [vmem:[%s8137_s21 + $0x18] sm:$0x3] }
  0x95   : > { %v1326_v35 = vpop.permute.xlu1 %1325 }
  0x96   : > { %v1351_v37 = vpop.permute.xlu0 %1350  ;;  %7348 = vmatmul.msk.f32.vlgmr.msra.gmra.mxu1 %vm317_vm1, %v1326_v35 }
  0x97   : > { %7350 = vmatmul.msk.f32.vlgmr.msra.gmra.mxu2 %vm317_vm1, %v1351_v37  ;;  %7354 = vmatmul.msk.f32.vlgmr.msrb.gmra.mxu0 %vm317_vm1, %v1401_v15 }
  0x98   : > { %7363 = vmatpush.msk.msra.mxu1 %vm321_vm0, %v1285_v30  ;;  %7365 = vmatpush.msk.msra.mxu2 %vm321_vm0, %v1285_v30 }
  0x99   : > { %7369 = vmatpush.msk.msrb.mxu0 %vm321_vm0, %v1285_v30  ;;  %2827 = vrot.lane.b32.xlu2 %v2741_v39, %s8017_s23 }
  0x9a   : > { %1547 = vmatpush.msra.mxu1 %v8166_v12  ;;  %1572 = vmatpush.msra.mxu2 %v8166_v12  ;;  %v8435_v45 = vpop.f32.mrf.mxu1 }
  0x9b   : > { %2802 = vrot.lane.b32.xlu1 %v2740_v38, %s8017_s23  ;;  %1622 = vmatpush.msrb.mxu0 %v8166_v12  ;;  %v8432_v43 = vpop.permute.xlu2 %1766  ;;  %v8596_v38 = vld [vmem:[%s10563_s1 + $0x18] sm:$0xf] }
  0x9c   : > { %2749 = vrot.lane.b32.xlu0 %v2738_v40, %s8017_s23 }
  0x9d   : > { %v1426_v42 = vpop.permute.xlu1 %1425  ;;  %v8454_v50 = vpop.f32.mrf.mxu0 }
  0x9e   : > { %v1476_v44 = vpop.permute.xlu0 %1475  ;;  %7356 = vmatmul.msk.f32.vlgmr.msrb.gmra.mxu1 %vm317_vm1, %v1426_v42  ;;  %v3355_v42 = vld [vmem:[%s8137_s21 + $0x38] sm:$0x3] }
  0x9f   : > { %7358 = vmatmul.msk.f32.vlgmr.msrb.gmra.mxu2 %vm317_vm1, %v1451_v19  ;;  %7360 = vmatmul.msk.f32.vlgmr.msrb.gmra.mxu3 %vm317_vm1, %v1476_v44 }
  0xa0   : > { %7362 = vmatmul.msk.f32.vlgmr.msra.gmra.mxu0 %vm317_vm1, %v1501_v23  ;;  %7373 = vmatpush.msk.msrb.mxu2 %vm321_vm0, %v1285_v30  ;;  %v8505_v3 = vpop.f32.mrf.mxu3  ;;  %v2964_v23 = vld [vmem:[%s8137_s21 + $0x34] sm:$0x3] }
  0xa1   : > { %7375 = vmatpush.msk.msrb.mxu3 %vm321_vm0, %v1285_v30  ;;  %7371 = vmatpush.msk.msrb.mxu1 %vm321_vm0, %v1285_v30  ;;  %v8458_v51 = vpop.f32.mrf.mxu2  ;;  %v3349_v30 = vld [vmem:[%s8137_s21 + $0x8] sm:$0x3] }
  0xa2   : > { %1672 = vmatpush.msrb.mxu2 %v8166_v12  ;;  %7379 = vmatpush.msk.msra.mxu0 %vm321_vm0, %v8442_v46  ;;  %v8473_v57 = vpop.f32.mrf.mxu1 }
  0xa3   : > { %2852 = vrot.lane.b32.xlu1 %v2742_v47, %s8017_s23  ;;  %2902 = vrot.lane.b32.xlu2 %v2744_v48, %s8017_s23  ;;  %v8462_v53 = vpop.permute.xlu2 %1816 }
  0xa4   : > { %2777 = vrot.lane.b32.xlu0 %v2739_v49, %s8017_s23  ;;  %1697 = vmatpush.msrb.mxu3 %v8166_v12 }
  0xa5   : > { %v1579_v52 = vpop.permute.xlu1 %1578  ;;  %1647 = vmatpush.msrb.mxu1 %v8166_v12  ;;  %1735 = vmatpush.msra.mxu0 %v8212_v25  ;;  %v2745_v12 = vld [vmem:[%s8137_s21 + $0x40] sm:$0x3]  ;;  %v8482_v58 = vpop.f32.mrf.mxu0 }
  0xa6   : > { %v1554_v54 = vpop.permute.xlu0 %1553  ;;  %7364 = vmatmul.msk.f32.vlgmr.msra.gmra.mxu1 %vm317_vm1, %v1529_v29 }
  0xa7   : > { %7366 = vmatmul.msk.f32.vlgmr.msra.gmra.mxu2 %vm317_vm1, %v1554_v54  ;;  %7368 = vmatmul.msk.f32.vlgmr.msra.gmra.mxu3 %vm317_vm1, %v1579_v52  ;;  %v3760_v54 = vld [vmem:[%s8137_s21 + $0x14] sm:$0x3] }
  0xa8   : > { %7383 = vmatpush.msk.msra.mxu2 %vm321_vm0, %v8442_v46  ;;  %7381 = vmatpush.msk.msra.mxu1 %vm321_vm0, %v8442_v46  ;;  %v8541_v16 = vpop.f32.mrf.mxu3 }
  0xa9   : > { %7385 = vmatpush.msk.msra.mxu3 %vm321_vm0, %v8442_v46  ;;  %v8486_v59 = vpop.f32.mrf.mxu2 }
  0xaa   : > { %1785 = vmatpush.msra.mxu2 %v8212_v25  ;;  %1760 = vmatpush.msra.mxu1 %v8212_v25  ;;  %v8508_v4 = vpop.f32.mrf.mxu1 }
  0xab   : > { %2877 = vrot.lane.b32.xlu1 %v2743_v55, %s8017_s23  ;;  %2970 = vrot.lane.b32.xlu2 %v2959_v56, %s8017_s23  ;;  %v8490_v61 = vpop.permute.xlu2 %1841  ;;  %v3761_v55 = vld [vmem:[%s8137_s21 + $0x1c] sm:$0x3] }
  0xac   : > { %2927 = vrot.lane.b32.xlu0 %v2745_v12, %s8017_s23  ;;  %1810 = vmatpush.msra.mxu3 %v8212_v25  ;;  %v3758_v12 = vld [vmem:[%s8137_s21 + $0x4] sm:$0x3] }
  0xad   : > { %v1654_v60 = vpop.permute.xlu1 %1653  ;;  %v8516_v6 = vpop.f32.mrf.mxu0 }
  0xae   : > { %v1604_v62 = vpop.permute.xlu0 %1603 }
  0xaf   : > { %7370 = vmatmul.msk.f32.vlgmr.msrb.gmra.mxu0 %vm317_vm1, %v1604_v62  ;;  %7374 = vmatmul.msk.f32.vlgmr.msrb.gmra.mxu2 %vm317_vm1, %v1654_v60 }
  0xb0   : > { %7376 = vmatmul.msk.f32.vlgmr.msrb.gmra.mxu3 %vm317_vm1, %v8415_v36  ;;  %7387 = vmatpush.msk.msrb.mxu0 %vm321_vm0, %v8442_v46  ;;  %v8571_v29 = vpop.f32.mrf.mxu3 }
  0xb1   : > { %7391 = vmatpush.msk.msrb.mxu2 %vm321_vm0, %v8442_v46  ;;  %7393 = vmatpush.msk.msrb.mxu3 %vm321_vm0, %v8442_v46  ;;  %v8512_v5 = vpop.f32.mrf.mxu2 }
  0xb2   : > { %1835 = vmatpush.msrb.mxu0 %v8212_v25  ;;  %v8543_v17 = vpop.f32.mrf.mxu1 }
  0xb3   : > { %3048 = vrot.lane.b32.xlu1 %v2962_v63, %s8017_s23  ;;  %2998 = vrot.lane.b32.xlu2 %v2960_v0, %s8017_s23  ;;  %v8518_v8 = vpop.permute.xlu2 %2012 }
  0xb4   : > { %3023 = vrot.lane.b32.xlu0 %v2961_v2, %s8017_s23  ;;  %1885 = vmatpush.msrb.mxu2 %v8212_v25 }
  0xb5   : > { %v1714_v7 = vpop.permute.xlu1 %1713  ;;  %1910 = vmatpush.msrb.mxu3 %v8212_v25  ;;  %v8549_v20 = vpop.f32.mrf.mxu0 }
  0xb6   : > { %v1629_v9 = vpop.permute.xlu0 %1628 }
  0xb7   : > { %7372 = vmatmul.msk.f32.vlgmr.msrb.gmra.mxu1 %vm317_vm1, %v1629_v9  ;;  %7380 = vmatmul.msk.f32.vlgmr.msra.gmra.mxu0 %vm317_vm1, %v1714_v7  ;;  %v8660_v7 = vld [vmem:[%s10563_s1 + $0x8] sm:$0xf]  ;;  %v3764_v9 = vld [vmem:[%s8137_s21 + $0x34] sm:$0x3] }
  0xb8   : > { %7384 = vmatmul.msk.f32.vlgmr.msra.gmra.mxu2 %vm317_vm1, %v8432_v43  ;;  %7389 = vmatpush.msk.msrb.mxu1 %vm321_vm0, %v8442_v46  ;;  %v8600_v40 = vpop.f32.mrf.mxu3  ;;  %v3353_v43 = vld [vmem:[%s8137_s21 + $0x28] sm:$0x3] }
  0xb9   : > { %7397 = vmatpush.msk.msra.mxu0 %vm321_vm0, %v7396_v10  ;;  %7401 = vmatpush.msk.msra.mxu2 %vm321_vm0, %v7396_v10  ;;  %v8538_v15 = vpop.f32.mrf.mxu2 }
  0xba   : > { %1860 = vmatpush.msrb.mxu1 %v8212_v25  ;;  %v750_v32 = vpop.f32.mrf.mxu1  ;;  %v668_v56 = vadd.f32 %v8538_v15, %v8486_v59 }
  0xbb   : > { %3123 = vrot.lane.b32.xlu1 %v2965_v11, %s8017_s23  ;;  %3148 = vrot.lane.b32.xlu2 %v2966_v13, %s8017_s23  ;;  %v8546_v19 = vpop.permute.xlu2 %2087  ;;  %v8671_v11 = vld [vmem:[%s10564_s2] ss:$0 sm:$0xff]  ;;  %v645_v13 = vadd.f32 %v8543_v17, %v8473_v57 }
  0xbc   : > { %3073 = vrot.lane.b32.xlu0 %v2963_v14, %s8017_s23  ;;  %1956 = vmatpush.msra.mxu0 %v8271_v41  ;;  %v3759_v14 = vld [vmem:[%s8137_s21 + $0xc] sm:$0x3] }
  0xbd   : > { %v1742_v18 = vpop.permute.xlu1 %1741  ;;  %2006 = vmatpush.msra.mxu2 %v8271_v41  ;;  %v8580_v33 = vpop.f32.mrf.mxu0 }
  0xbe   : > { %v1792_v25 = vpop.permute.xlu0 %1791 }
  0xbf   : > { %7382 = vmatmul.msk.f32.vlgmr.msra.gmra.mxu1 %vm317_vm1, %v1742_v18  ;;  %7386 = vmatmul.msk.f32.vlgmr.msra.gmra.mxu3 %vm317_vm1, %v1792_v25  ;;  %v622_v18 = vadd.f32 %v8549_v20, %v8482_v58  ;;  %v8688_v25 = vld [vmem:[%s10563_s1] sm:$0xff] }
  0xc0   : > { %7388 = vmatmul.msk.f32.vlgmr.msrb.gmra.mxu0 %vm317_vm1, %v8462_v53  ;;  %7403 = vmatpush.msk.msra.mxu3 %vm321_vm0, %v7396_v10  ;;  %v553_v53 = vadd.f32 %v8508_v4, %v8435_v45  ;;  %v576_v45 = vadd.f32 %v8512_v5, %v8458_v51  ;;  %v8644_v60 = vpop.f32.mrf.mxu3 }
  0xc1   : > { %7399 = vmatpush.msk.msra.mxu1 %vm321_vm0, %v7396_v10  ;;  %7405 = vmatpush.msk.msrb.mxu0 %vm321_vm0, %v7396_v10  ;;  %v8564_v24 = vpop.f32.mrf.mxu2 }
  0xc2   : > { %2031 = vmatpush.msra.mxu3 %v8271_v41  ;;  %v8613_v44 = vpop.f32.mrf.mxu1  ;;  %v893_v2 = vadd.f32 %v8564_v24, %v576_v45 }
  0xc3   : > { %3556 = vrot.lane.b32.xlu1 %v3348_v21, %s8018_s17  ;;  %3609 = vrot.lane.b32.xlu2 %v3350_v22, %s8018_s17  ;;  %v8568_v27 = vpop.permute.xlu2 %2333  ;;  %v896_v58 = vadd.f32 %v8613_v44, %v645_v13 }
  0xc4   : > { %3098 = vrot.lane.b32.xlu0 %v2964_v23, %s8017_s23  ;;  %1981 = vmatpush.msra.mxu1 %v8271_v41  ;;  %s271_s23 = scalar_lea.vmem [#allocation4], %s7263_s14  ;;  %s7972_s14 = scalar_lea.hbm %s10569_s7, 8 }
  0xc5   : > { %v1892_v26 = vpop.permute.xlu1 %1891  ;;  %2056 = vmatpush.msrb.mxu0 %v8271_v41  ;;  %v8616_v46 = vpop.f32.mrf.mxu0  ;;  %s7194_s29 = sshll.u32 %s271_s23, 4  ;;  %s7195_s29 = int_to_ptr.vmem [resolvable:$true] %s7194_s29 }
  0xc6   : > { %v1867_v28 = vpop.permute.xlu0 %1866  ;;  %v895_v24 = vadd.f32 %v8616_v46, %v622_v18 }
  0xc7   : > { %7390 = vmatmul.msk.f32.vlgmr.msrb.gmra.mxu1 %vm317_vm1, %v8490_v61  ;;  %7392 = vmatmul.msk.f32.vlgmr.msrb.gmra.mxu2 %vm317_vm1, %v1867_v28  ;;  %v892_v61 = vadd.f32 %v750_v32, %v553_v53  ;;  %v3765_v32 = vld [vmem:[%s8137_s21 + $0x3c] sm:$0x3] }
  0xc8   : > { %7394 = vmatmul.msk.f32.vlgmr.msrb.gmra.mxu3 %vm317_vm1, %v1892_v26  ;;  %7409 = vmatpush.msk.msrb.mxu2 %vm321_vm0, %v7396_v10  ;;  %v8692_v57 = vpop.f32.mrf.mxu3 }
  0xc9   : > { %7407 = vmatpush.msk.msrb.mxu1 %vm321_vm0, %v7396_v10  ;;  %7411 = vmatpush.msk.msrb.mxu3 %vm321_vm0, %v7396_v10  ;;  %v865_v35 = vpop.f32.mrf.mxu2 }
  0xca   : > { %2106 = vmatpush.msrb.mxu2 %v8271_v41  ;;  %v956_v59 = vpop.f32.mrf.mxu1  ;;  %v897_v0 = vadd.f32 %v865_v35, %v668_v56 }
  0xcb   : > { %3584 = vrot.lane.b32.xlu1 %v3349_v30, %s8018_s17  ;;  %3659 = vrot.lane.b32.xlu2 %v3352_v31, %s8018_s17  ;;  %v8590_v37 = vpop.permute.xlu2 %2361  ;;  %v1098_v10 = vadd.f32 %v956_v59, %v892_v61  ;;  %v3763_v30 = vld [vmem:[%s8137_s21 + $0x2c] sm:$0x3]  ;;  %v4182_v31 = vld [vmem:[%s8137_s21 + $0x8] sm:$0x3] }
  0xcc   : > { %3634 = vrot.lane.b32.xlu0 %v3351_v34, %s8018_s17  ;;  %2081 = vmatpush.msrb.mxu1 %v8271_v41 }
  0xcd   : > { %v1988_v36 = vpop.permute.xlu1 %1987  ;;  %2131 = vmatpush.msrb.mxu3 %v8271_v41  ;;  %v3354_v41 = vld [vmem:[%s8137_s21 + $0x30] sm:$0x3]  ;;  %v8651_v62 = vpop.f32.mrf.mxu0  ;;  %v8696_v17 = vadd.f32 %v8671_v11, %v1098_v10 }
  0xce   : > { %v1935_v39 = vpop.permute.xlu0 %1934 }
  0xcf   : > { %7398 = vmatmul.msk.f32.vlgmr.msra.gmra.mxu0 %vm317_vm1, %v1935_v39  ;;  %7402 = vmatmul.msk.f32.vlgmr.msra.gmra.mxu2 %vm317_vm1, %v1988_v36  ;;  %v7336_v28 = vmul.f32 -1.442695, %v8696_v17  ;;  %v599_v36 = vadd.f32 %v8571_v29, %v8505_v3  ;;  %v530_v39 = vadd.f32 %v8516_v6, %v8454_v50  ;;  %v4185_v50 = vld [vmem:[%s8137_s21 + $0x20] sm:$0x3]  ;;  %v4183_v6 = vld [vmem:[%s8137_s21 + $0x10] sm:$0x3] }
  0xd0   : > { %7404 = vmatmul.msk.f32.vlgmr.msra.gmra.mxu3 %vm317_vm1, %v8518_v8  ;;  %7423 = vmatpush.msk.msra.mxu0 %vm321_vm0, %v8596_v38  ;;  %v3762_v8 = vld [vmem:[%s8137_s21 + $0x24] sm:$0x3]  ;;  %v1002_v46 = vpop.f32.mrf.mxu3 }
  0xd1   : > { %7427 = vmatpush.msk.msra.mxu2 %vm321_vm0, %v8596_v38  ;;  %7429 = vmatpush.msk.msra.mxu3 %vm321_vm0, %v8596_v38  ;;  %v979_v47 = vpop.f32.mrf.mxu2  ;;  %7790 = vpow2.f32 %v7336_v28 }
  0xd2   : > { %2355 = vmatpush.msra.mxu0 %v8121_v1 }
  0xd3   : > { %3734 = vrot.lane.b32.xlu1 %v3355_v42, %s8018_s17  ;;  %3684 = vrot.lane.b32.xlu2 %v3353_v43, %s8018_s17  ;;  %v8622_v49 = vpop.permute.xlu2 %2511  ;;  %v894_v43 = vadd.f32 %v8644_v60, %v599_v36 }
  0xd4   : > { %3709 = vrot.lane.b32.xlu0 %v3354_v41, %s8018_s17  ;;  %2405 = vmatpush.msra.mxu2 %v8121_v1 }
  0xd5   : > { %v2038_v48 = vpop.permute.xlu1 %2037  ;;  %2430 = vmatpush.msra.mxu3 %v8121_v1 }
  0xd6   : > { %v1963_v52 = vpop.permute.xlu0 %1962 }
  0xd7   : > { %7400 = vmatmul.msk.f32.vlgmr.msra.gmra.mxu1 %vm317_vm1, %v1963_v52  ;;  %7406 = vmatmul.msk.f32.vlgmr.msrb.gmra.mxu0 %vm317_vm1, %v2038_v48  ;;  %v4184_v52 = vld [vmem:[%s8137_s21 + $0x18] sm:$0x3]  ;;  %v7791_v53 = vpop.eup %7790 }
  0xd8   : > { %7410 = vmatmul.msk.f32.vlgmr.msrb.gmra.mxu2 %vm317_vm1, %v8546_v19  ;;  %7425 = vmatpush.msk.msra.mxu1 %vm321_vm0, %v8596_v38  ;;  %v1099_v19 = vadd.f32 %v979_v47, %v893_v2  ;;  %v891_v47 = vadd.f32 %v8580_v33, %v530_v39  ;;  %v8766_v56 = vadd.f32 1.0, %v7791_v53 }
  0xd9   : > { %7431 = vmatpush.msk.msrb.mxu0 %vm321_vm0, %v8596_v38  ;;  %7435 = vmatpush.msk.msrb.mxu2 %vm321_vm0, %v8596_v38  ;;  %v1071_v5 = vpop.f32.mrf.mxu2 }
  0xda   : > { %2380 = vmatpush.msra.mxu1 %v8121_v1  ;;  %v1103_v15 = vadd.f32 %v1071_v5, %v897_v0  ;;  %v8708_v26 = vadd.f32 %v8671_v11, %v1099_v19  ;;  %v8780_v0 = vld [vmem:[%s10563_s1 + $0x28] sm:$0xf]  ;;  %vm1168_vm2 = vweird.f32 %v8766_v56 }
  0xdb   : > { %3821 = vrot.lane.b32.xlu1 %v3760_v54, %s8018_s17  ;;  %3846 = vrot.lane.b32.xlu2 %v3761_v55, %s8018_s17  ;;  %v8653_v51 = vpop.permute.xlu2 %2589  ;;  %v1100_v54 = vadd.f32 %v1002_v46, %v894_v43  ;;  %v4607_v43 = vld [vmem:[%s8137_s21 + $0x14] sm:$0x3] }
  0xdc   : > { %3768 = vrot.lane.b32.xlu0 %v3758_v12, %s8018_s17  ;;  %2455 = vmatpush.msrb.mxu0 %v8121_v1  ;;  %v8703_v22 = vadd.f32 %v8671_v11, %v1103_v15  ;;  %v1097_v12 = vadd.f32 %v8651_v62, %v891_v47  ;;  %v4188_v62 = vld [vmem:[%s8137_s21 + $0x38] sm:$0x3] }
  0xdd   : > { %v2063_v63 = vpop.permute.xlu1 %2062  ;;  %2505 = vmatpush.msrb.mxu2 %v8121_v1  ;;  %v8773_v61 = vadd.f32 %v8671_v11, %v1100_v54 }
  0xde   : > { %v2113_v4 = vpop.permute.xlu0 %2112  ;;  %v7341_v35 = vmul.f32 -1.442695, %v8703_v22  ;;  %v8794_v5 = vadd.f32 %v8671_v11, %v1097_v12 }
  0xdf   : > { %7408 = vmatmul.msk.f32.vlgmr.msrb.gmra.mxu1 %vm317_vm1, %v2063_v63  ;;  %7412 = vmatmul.msk.f32.vlgmr.msrb.gmra.mxu3 %vm317_vm1, %v2113_v4  ;;  %v4189_v4 = vld [vmem:[%s8137_s21 + $0x40] sm:$0x3] }
  0xe0   : > { %7424 = vmatmul.msk.f32.vlgmr.msra.gmra.mxu0 %vm317_vm1, %v8568_v27  ;;  %7437 = vmatpush.msk.msrb.mxu3 %vm321_vm0, %v8596_v38  ;;  %v1048_v27 = vpop.f32.mrf.mxu1  ;;  %7792 = vpow2.f32 %v7341_v35  ;;  %v7335_v13 = vmul.f32 -1.442695, %v8794_v5 }
  0xe1   : > { %7433 = vmatpush.msk.msrb.mxu1 %vm321_vm0, %v8596_v38  ;;  %7439 = vmatpush.msk.msra.mxu0 %vm321_vm0, %v8660_v7  ;;  %v1102_v34 = vadd.f32 %v1048_v27, %v896_v58 }
  0xe2   : > { %2530 = vmatpush.msrb.mxu3 %v8121_v1 }
  0xe3   : > { %3871 = vrot.lane.b32.xlu1 %v3762_v8, %s8018_s17  ;;  %3921 = vrot.lane.b32.xlu2 %v3764_v9, %s8018_s17  ;;  %v8700_v21 = vpop.permute.xlu2 %2639  ;;  %v8736_v3 = vadd.f32 %v8671_v11, %v1102_v34  ;;  %v4186_v8 = vld [vmem:[%s8137_s21 + $0x28] sm:$0x3]  ;;  %v7338_v9 = vmul.f32 -1.442695, %v8773_v61 }
  0xe4   : > { %3796 = vrot.lane.b32.xlu0 %v3759_v14, %s8018_s17  ;;  %2480 = vmatpush.msrb.mxu1 %v8121_v1  ;;  %v1025_v1 = vpop.f32.mrf.mxu0 }
  0xe5   : > { %v2412_v20 = vpop.permute.xlu1 %2411  ;;  %2558 = vmatpush.msra.mxu0 %v8688_v25  ;;  %v1101_v38 = vadd.f32 %v1025_v1, %v895_v24  ;;  %v7340_v48 = vmul.f32 -1.442695, %v8736_v3  ;;  %v4608_v24 = vld [vmem:[%s8137_s21 + $0x1c] sm:$0x3]  ;;  %v4187_v1 = vld [vmem:[%s8137_s21 + $0x30] sm:$0x3] }
  0xe6   : > { %v2387_v23 = vpop.permute.xlu0 %2386  ;;  %v7793_v55 = vpop.eup %7792 }
  0xe7   : > { %7428 = vmatmul.msk.f32.vlgmr.msra.gmra.mxu2 %vm317_vm1, %v2387_v23  ;;  %7426 = vmatmul.msk.f32.vlgmr.msra.gmra.mxu1 %vm317_vm1, %v8590_v37  ;;  %v7337_v37 = vmul.f32 -1.442695, %v8708_v26  ;;  %v8743_v44 = vadd.f32 %v8671_v11, %v1101_v38  ;;  %v8775_v59 = vadd.f32 1.0, %v7793_v55  ;;  %v4606_v23 = vld [vmem:[%s8137_s21 + $0xc] sm:$0x3] }
  0xe8   : > { %7430 = vmatmul.msk.f32.vlgmr.msra.gmra.mxu3 %vm317_vm1, %v2412_v20  ;;  %7443 = vmatpush.msk.msra.mxu2 %vm321_vm0, %v8660_v7 }
  0xe9   : > { %7441 = vmatpush.msk.msra.mxu1 %vm321_vm0, %v8660_v7  ;;  %7445 = vmatpush.msk.msra.mxu3 %vm321_vm0, %v8660_v7  ;;  %7794 = vpow2.f32 %v7337_v37  ;;  %vm1243_vm4 = vweird.f32 %v8775_v59 }
  0xea   : > { %2608 = vmatpush.msra.mxu2 %v8688_v25  ;;  %7796 = vpow2.f32 %v7340_v48 }
  0xeb   : > { %3896 = vrot.lane.b32.xlu1 %v3763_v30, %s8018_s17  ;;  %4192 = vrot.lane.b32.xlu2 %v4182_v31, %s8018_s17  ;;  %v8738_v42 = vpop.permute.xlu2 %2664 }
  0xec   : > { %3946 = vrot.lane.b32.xlu0 %v3765_v32, %s8018_s17  ;;  %2583 = vmatpush.msra.mxu1 %v8688_v25 }
  0xed   : > { %v2487_v29 = vpop.permute.xlu1 %2486  ;;  %2633 = vmatpush.msra.mxu3 %v8688_v25 }
  0xee   : > { %v2437_v41 = vpop.permute.xlu0 %2436 }
  0xef   : > { %7432 = vmatmul.msk.f32.vlgmr.msrb.gmra.mxu0 %vm317_vm1, %v2437_v41  ;;  %7436 = vmatmul.msk.f32.vlgmr.msrb.gmra.mxu2 %vm317_vm1, %v2487_v29  ;;  %v7795_v33 = vpop.eup %7794  ;;  %v4610_v41 = vld [vmem:[%s8137_s21 + $0x2c] sm:$0x3] }
  0xf0   : > { %7438 = vmatmul.msk.f32.vlgmr.msrb.gmra.mxu3 %vm317_vm1, %v8622_v49  ;;  %7447 = vmatpush.msk.msrb.mxu0 %vm321_vm0, %v8660_v7  ;;  %v7339_v49 = vmul.f32 -1.442695, %v8743_v44  ;;  %v8782_v2 = vadd.f32 1.0, %v7795_v33 }
  0xf1   : > { %7451 = vmatpush.msk.msrb.mxu2 %vm321_vm0, %v8660_v7  ;;  %7453 = vmatpush.msk.msrb.mxu3 %vm321_vm0, %v8660_v7 }
  0xf2   : > { %2658 = vmatpush.msrb.mxu0 %v8688_v25  ;;  %7798 = vpow2.f32 %v7339_v49  ;;  %v1189_v12 = vand.u32 2147483648, %v8782_v2  ;;  %vm1183_vm6 = vweird.f32 %v8782_v2 }
  0xf3   : > { %4270 = vrot.lane.b32.xlu1 %v4185_v50, %s8018_s17  ;;  %4220 = vrot.lane.b32.xlu2 %v4183_v6, %s8018_s17  ;;  %v8769_v60 = vpop.permute.xlu2 %2827  ;;  %7800 = vrcp.f32 %v8766_v56  ;;  %v4609_v6 = vld [vmem:[%s8137_s21 + $0x24] sm:$0x3] }
  0xf4   : > { %4245 = vrot.lane.b32.xlu0 %v4184_v52, %s8018_s17  ;;  %2708 = vmatpush.msrb.mxu2 %v8688_v25  ;;  %7802 = vrcp.f32 %v8775_v59  ;;  %v1174_v52 = vand.u32 2147483648, %v8766_v56 }
  0xf5   : > { %v2537_v45 = vpop.permute.xlu1 %2536  ;;  %2733 = vmatpush.msrb.mxu3 %v8688_v25  ;;  %7804 = vrcp.f32 %v8782_v2 }
  0xf6   : > { %v2462_v63 = vpop.permute.xlu0 %2461  ;;  %7806 = vpow2.f32 %v7338_v9  ;;  %v1247_v9 = vand.u32 2147483647, %v8775_v59 }
  0xf7   : > { %7434 = vmatmul.msk.f32.vlgmr.msrb.gmra.mxu1 %vm317_vm1, %v2462_v63  ;;  %7440 = vmatmul.msk.f32.vlgmr.msra.gmra.mxu0 %vm317_vm1, %v2537_v45  ;;  %7808 = vpow2.f32 %v7335_v13  ;;  %v1172_v45 = vand.u32 2147483647, %v8766_v56  ;;  %v8903_v63 = vld [vmem:[%s10563_s1 + $0x38] sm:$0xf] }
  0xf8   : > { %7444 = vmatmul.msk.f32.vlgmr.msra.gmra.mxu2 %vm317_vm1, %v8653_v51  ;;  %7449 = vmatpush.msk.msrb.mxu1 %vm321_vm0, %v8660_v7  ;;  %v8804_v51 = vld [vmem:[%s10563_s1 + $0x20] sm:$0xff]  ;;  %v7797_v7 = vpop.eup %7796  ;;  %vm8971_vm12 = vcmp.eq.f32.partialorder %v1247_v9, 8.507059e+37 }
  0xf9   : > { %7457 = vmatpush.msk.msra.mxu0 %vm321_vm0, %v8780_v0  ;;  %7461 = vmatpush.msk.msra.mxu2 %vm321_vm0, %v8780_v0  ;;  %v7799_v10 = vpop.eup %7798  ;;  %v8818_v18 = vadd.f32 1.0, %v7797_v7  ;;  %vm8959_vm11 = vcmp.eq.f32.partialorder %v1172_v45, 8.507059e+37 }
  0xfa   : > { %2683 = vmatpush.msrb.mxu1 %v8688_v25  ;;  %v8820_v25 = vpop.eup %7800  ;;  %v8822_v58 = vadd.f32 1.0, %v7799_v10  ;;  %v8926_v10 = vld [vmem:[%s10563_s1 + $0x30] sm:$0xff] }
  0xfb   : > { %4345 = vrot.lane.b32.xlu1 %v4188_v62, %s8018_s17  ;;  %4370 = vrot.lane.b32.xlu2 %v4189_v4, %s8018_s17  ;;  %v8826_v20 = vpop.eup %7802  ;;  %7810 = vrcp.f32 %v8818_v18  ;;  %vm1169_vm3 = vweird.f32 %v8820_v25  ;;  %v1249_v62 = vand.u32 2147483648, %v8775_v59  ;;  %vm1228_vm14 = vweird.f32 %v8818_v18 }
  0xfc   : > { %4295 = vrot.lane.b32.xlu0 %v4186_v8, %s8018_s17  ;;  %2771 = vmatpush.msra.mxu0 %v8804_v51  ;;  %v8834_v27 = vpop.eup %7804  ;;  %7812 = vrcp.f32 %v8822_v58  ;;  %v1239_v28 = vmul.f32 %v8826_v20, %v8775_v59  ;;  %vm1244_vm5 = vweird.f32 %v8826_v20  ;;  %vm8919_vm8 = vmor %vm1168_vm2, %vm1169_vm3  ;;  %vm1213_vm2 = vweird.f32 %v8822_v58  ;;  %v9077_v59 = vld [vmem:[%s10563_s1 + $0x6] sm:$0x3f] }
  0xfd   : > { %v2565_v14 = vpop.permute.xlu1 %2564  ;;  %v8815_v15 = vpop.permute.xlu2 %2902  ;;  %2821 = vmatpush.msra.mxu2 %v8804_v51  ;;  %v1179_v31 = vmul.f32 %v8834_v27, %v8782_v2  ;;  %vm1184_vm7 = vweird.f32 %v8834_v27  ;;  %vm8936_vm9 = vmor %vm1243_vm4, %vm1244_vm5 }
  0xfe   : > { %v2615_v19 = vpop.permute.xlu0 %2614  ;;  %v7807_v30 = vpop.eup %7806  ;;  %v1240_v39 = vsub.f32 1.0, %v1239_v28  ;;  %vm8951_vm10 = vmor %vm1183_vm6, %vm1184_vm7  ;;  %v1190_v28 = vor.u32 1.1754944e-38, %v1189_v12  ;;  %v1219_v12 = vand.u32 2147483648, %v8822_v58 }
  0xff   : > { %7442 = vmatmul.msk.f32.vlgmr.msra.gmra.mxu1 %vm317_vm1, %v2565_v14  ;;  %7446 = vmatmul.msk.f32.vlgmr.msra.gmra.mxu3 %vm317_vm1, %v2615_v19  ;;  %v7809_v37 = vpop.eup %7808  ;;  %v8857_v38 = vadd.f32 1.0, %v7807_v30  ;;  %v1180_v46 = vsub.f32 1.0, %v1179_v31  ;;  %v4613_v14 = vld [vmem:[%s8137_s21 + $0x44] sm:$0x3]  ;;  %v4611_v19 = vld [vmem:[%s8137_s21 + $0x34] sm:$0x3] }
 0x100   : > { %7448 = vmatmul.msk.f32.vlgmr.msrb.gmra.mxu0 %vm317_vm1, %v8700_v21  ;;  %7463 = vmatpush.msk.msra.mxu3 %vm321_vm0, %v8780_v0  ;;  %v1164_v21 = vmul.f32 %v8820_v25, %v8766_v56  ;;  %v1241_v48 = vmul.f32 %v8826_v20, %v1240_v39  ;;  %v1175_v31 = vor.u32 1.1754944e-38, %v1174_v52  ;;  %v8979_v39 = vpop.f32.mrf.mxu3  ;;  %v1220_v7 = vor.u32 1.1754944e-38, %v1219_v12 }
 0x101   : > { %7459 = vmatpush.msk.msra.mxu1 %vm321_vm0, %v8780_v0  ;;  %7465 = vmatpush.msk.msrb.mxu0 %vm321_vm0, %v8780_v0  ;;  %v8862_v29 = vpop.eup %7810  ;;  %7814 = vrcp.f32 %v8857_v38  ;;  %v1181_v54 = vmul.f32 %v8834_v27, %v1180_v46 }
 0x102   : > { %2846 = vmatpush.msra.mxu3 %v8804_v51  ;;  %v1165_v36 = vsub.f32 1.0, %v1164_v21  ;;  %v8869_v50 = vpop.eup %7812  ;;  %v1224_v53 = vmul.f32 %v8862_v29, %v8818_v18  ;;  %v1242_v8 = vadd.f32 %v8826_v20, %v1241_v48  ;;  %v1250_v21 = vor.u32 1.1754944e-38, %v1249_v62 }
 0x103   : > { %4616 = vrot.lane.b32.xlu1 %v4606_v23, %s8018_s17  ;;  %4669 = vrot.lane.b32.xlu2 %v4608_v24, %s8018_s17  ;;  %v1209_v49 = vmul.f32 %v8869_v50, %v8822_v58  ;;  %v1182_v23 = vadd.f32 %v8834_v27, %v1181_v54  ;;  %vm1229_vm15 = vweird.f32 %v8862_v29  ;;  %vm1214_vm3 = vweird.f32 %v8869_v50 }
 0x104   : > { %4320 = vrot.lane.b32.xlu0 %v4187_v1, %s8018_s17  ;;  %2796 = vmatpush.msra.mxu1 %v8804_v51  ;;  %v1166_v47 = vmul.f32 %v8820_v25, %v1165_v36  ;;  %v1225_v13 = vsub.f32 1.0, %v1224_v53  ;;  %vm9022_vm4 = vmor %vm1228_vm14, %vm1229_vm15  ;;  %v1217_v62 = vand.u32 2147483647, %v8822_v58 }
 0x105   : > { %v2715_v32 = vpop.permute.xlu1 %2714  ;;  %v8854_v34 = vpop.permute.xlu2 %2970  ;;  %2871 = vmatpush.msrb.mxu0 %v8804_v51  ;;  %v1210_v24 = vsub.f32 1.0, %v1209_v49  ;;  %vm9034_vm5 = vmor %vm1213_vm2, %vm1214_vm3  ;;  %vm3366_vm2 = vcmask 48128  }
 0x106   : > { %v2690_v35 = vpop.permute.xlu0 %2689  ;;  %v1167_v4 = vadd.f32 %v8820_v25, %v1166_v47  ;;  %vm9059_vm7 = vcmp.eq.f32.partialorder %v1217_v62, 8.507059e+37  ;;  %v3357_v62 = vld [vmem:[%s8137_s21 + $0x1] sm:$0x3] }
 0x107   : > { %7450 = vmatmul.msk.f32.vlgmr.msrb.gmra.mxu1 %vm317_vm1, %v8738_v42  ;;  %7452 = vmatmul.msk.f32.vlgmr.msrb.gmra.mxu2 %vm317_vm1, %v2690_v35  ;;  %v8876_v42 = vadd.f32 1.0, %v7809_v37  ;;  %v8943_v1 = vpop.eup %7814  ;;  %v1226_v37 = vmul.f32 %v8862_v29, %v1225_v13 }
 0x108   : > { %7454 = vmatmul.msk.f32.vlgmr.msrb.gmra.mxu3 %vm317_vm1, %v2715_v32  ;;  %7469 = vmatpush.msk.msrb.mxu2 %vm321_vm0, %v8780_v0  ;;  %v1246_v32 = vsel %vm8936_vm9, %v8826_v20, %v1242_v8  ;;  %v1171_v36 = vsel %vm8919_vm8, %v8820_v25, %v1167_v4  ;;  %v1194_v25 = vmul.f32 %v8943_v1, %v8857_v38  ;;  %vm1198_vm8 = vweird.f32 %v8857_v38 }
 0x109   : > { %7471 = vmatpush.msk.msrb.mxu3 %vm321_vm0, %v8780_v0  ;;  %7467 = vmatpush.msk.msrb.mxu1 %vm321_vm0, %v8780_v0  ;;  %7816 = vrcp.f32 %v8876_v42  ;;  %v1251_v48 = vsel %vm8971_vm12, %v1250_v21, %v1246_v32  ;;  %v1176_v52 = vsel %vm8959_vm11, %v1175_v31, %v1171_v36  ;;  %v1227_v49 = vadd.f32 %v8862_v29, %v1226_v37 }
 0x10a   : > { %2921 = vmatpush.msrb.mxu2 %v8804_v51  ;;  %v1195_v4 = vsub.f32 1.0, %v1194_v25  ;;  %v1274_v8 = vmul.f32 %v1251_v48, %v8703_v22  ;;  %vm1199_vm9 = vweird.f32 %v8943_v1  ;;  %v1202_v31 = vand.u32 2147483647, %v8857_v38 }
 0x10b   : > { %4644 = vrot.lane.b32.xlu1 %v4607_v43, %s8018_s17  ;;  %4719 = vrot.lane.b32.xlu2 %v4610_v41, %s8018_s17  ;;  %v1186_v43 = vsel %vm8951_vm10, %v8834_v27, %v1182_v23  ;;  %v1211_v41 = vmul.f32 %v8869_v50, %v1210_v24  ;;  %v1234_v27 = vand.u32 2147483648, %v8818_v18  ;;  %v1231_v58 = vsel %vm9022_vm4, %v8862_v29, %v1227_v49  ;;  %vm9091_vm11 = vmor %vm1198_vm8, %vm1199_vm9 }
 0x10c   : > { %4694 = vrot.lane.b32.xlu0 %v4609_v6, %s8018_s17  ;;  %2896 = vmatpush.msrb.mxu1 %v8804_v51  ;;  %vm3370_vm10 = vcmask 1045504   ;;  %vm1153_vm12 = vweird.f32 %v8876_v42 }
 0x10d   : > { %v2803_v55 = vpop.permute.xlu1 %2802  ;;  %v8894_v33 = vpop.permute.xlu2 %2998  ;;  %2946 = vmatpush.msrb.mxu3 %v8804_v51  ;;  %v1187_v51 = vand.u32 2147483647, %v8782_v2  ;;  %v1235_v22 = vor.u32 1.1754944e-38, %v1234_v27 }
 0x10e   : > { %v2750_v0 = vpop.permute.xlu0 %2749  ;;  %v8964_v2 = vpop.f32.mrf.mxu0 }
 0x10f   : > { %7458 = vmatmul.msk.f32.vlgmr.msra.gmra.mxu0 %vm317_vm1, %v2750_v0  ;;  %7462 = vmatmul.msk.f32.vlgmr.msra.gmra.mxu2 %vm317_vm1, %v2803_v55  ;;  %vm8985_vm13 = vcmp.eq.f32.partialorder %v1187_v51, 8.507059e+37  ;;  %v9005_v53 = vpop.eup %7816  ;;  %v1232_v55 = vand.u32 2147483647, %v8818_v18  ;;  %v1212_v0 = vadd.f32 %v8869_v50, %v1211_v41 }
 0x110   : > { %7464 = vmatmul.msk.f32.vlgmr.msra.gmra.mxu3 %vm317_vm1, %v8769_v60  ;;  %7475 = vmatpush.msk.msra.mxu0 %vm321_vm0, %v8903_v63  ;;  %v4612_v60 = vld [vmem:[%s8137_s21 + $0x3c] sm:$0x3]  ;;  %v1191_v54 = vsel %vm8985_vm13, %v1190_v28, %v1186_v43  ;;  %v1149_v29 = vmul.f32 %v9005_v53, %v8876_v42  ;;  %v1204_v28 = vand.u32 2147483648, %v8857_v38  ;;  %vm1154_vm13 = vweird.f32 %v9005_v53 }
 0x111   : > { %7481 = vmatpush.msk.msra.mxu3 %vm321_vm0, %v8903_v63  ;;  %7479 = vmatpush.msk.msra.mxu2 %vm321_vm0, %v8903_v63  ;;  %vm1233_vm6 = vcmp.eq.f32.partialorder %v1232_v55, 8.507059e+37  ;;  %v9053_v13 = vpop.f32.mrf.mxu3  ;;  %vm1155_vm14 = vmor %vm1153_vm12, %vm1154_vm13 }
 0x112   : > { %2992 = vmatpush.msra.mxu0 %v8926_v10  ;;  %v1150_v32 = vsub.f32 1.0, %v1149_v29  ;;  %v1205_v38 = vor.u32 1.1754944e-38, %v1204_v28  ;;  %v3363_v29 = vld [vmem:[%s8137_s21 + $0x31] sm:$0x3] }
 0x113   : > { %4794 = vrot.lane.b32.xlu1 %v4613_v14, %s8018_s17  ;;  %4744 = vrot.lane.b32.xlu2 %v4611_v19, %s8018_s17  ;;  %v9042_v18 = vpop.f32.mrf.mxu1  ;;  %v1196_v19 = vmul.f32 %v8943_v1, %v1195_v4  ;;  %v3361_v14 = vld [vmem:[%s8137_s21 + $0x21] sm:$0x3] }
 0x114   : > { %4769 = vrot.lane.b32.xlu0 %v4612_v60, %s8018_s17  ;;  %3042 = vmatpush.msra.mxu2 %v8926_v10  ;;  %s8019_s17 = smov 4  }
 0x115   : > { %v2853_v46 = vpop.permute.xlu1 %2852  ;;  %v8993_v6 = vpop.permute.xlu2 %3148  ;;  %3067 = vmatpush.msra.mxu3 %v8926_v10  ;;  %v1197_v30 = vadd.f32 %v8943_v1, %v1196_v19 }
 0x116   : > { %v2778_v47 = vpop.permute.xlu0 %2777  ;;  %v9067_v56 = vpop.f32.mrf.mxu0 }
 0x117   : > { %7460 = vmatmul.msk.f32.vlgmr.msra.gmra.mxu1 %vm317_vm1, %v2778_v47  ;;  %7466 = vmatmul.msk.f32.vlgmr.msrb.gmra.mxu0 %vm317_vm1, %v2853_v46  ;;  %v1157_v47 = vand.u32 2147483647, %v8876_v42 }
 0x118   : > { %7470 = vmatmul.msk.f32.vlgmr.msrb.gmra.mxu2 %vm317_vm1, %v8815_v15  ;;  %7477 = vmatpush.msk.msra.mxu1 %vm321_vm0, %v8903_v63  ;;  %v1269_v15 = vmul.f32 %v1176_v52, %v8696_v17  ;;  %v1270_v17 = vmul.f32 %v1191_v54, %v8708_v26  ;;  %v1216_v26 = vsel %vm9034_vm5, %v8869_v50, %v1212_v0 }
 0x119   : > { %7483 = vmatpush.msk.msrb.mxu0 %vm321_vm0, %v8903_v63  ;;  %7487 = vmatpush.msk.msrb.mxu2 %vm321_vm0, %v8903_v63  ;;  %v1236_v50 = vsel %vm1233_vm6, %v1235_v22, %v1231_v58  ;;  %v1221_v21 = vsel %vm9059_vm7, %v1220_v7, %v1216_v26  ;;  %vm1158_vm15 = vcmp.eq.f32.partialorder %v1157_v47, 8.507059e+37  ;;  %v3358_v26 = vld [vmem:[%s8137_s21 + $0x9] sm:$0x3]  ;;  %vm5231_vm6 = vcmask 58400  }
 0x11a   : > { %v9044_v51 = vpop.f32.mrf.mxu2  ;;  %3017 = vmatpush.msra.mxu1 %v8926_v10  ;;  %v1273_v35 = vmul.f32 %v1236_v50, %v8736_v3 }
 0x11b   : > { %5218 = vrot.lane.b32.xlu2 %v1274_v8, %s8019_s17  ;;  %5208 = vrot.lane.b32.xlu1 %v1269_v15, %s8019_s17  ;;  %v9105_v3 = vpop.f32.mrf.mxu1  ;;  %v3359_v8 = vld [vmem:[%s8137_s21 + $0x11] sm:$0x3]  ;;  %v3360_v15 = vld [vmem:[%s8137_s21 + $0x19] sm:$0x3] }
 0x11c   : > { %5210 = vrot.lane.b32.xlu0 %v1270_v17, %s8019_s17  ;;  %3092 = vmatpush.msrb.mxu0 %v8926_v10  ;;  %v3356_v17 = vld [vmem:[%s10563_s1] sm:$0x3f] }
 0x11d   : > { %v2878_v23 = vpop.permute.xlu1 %2877  ;;  %3142 = vmatpush.msrb.mxu2 %v8926_v10  ;;  %v9070_v60 = vpop.permute.xlu2 %3609 }
 0x11e   : > { %v2928_v24 = vpop.permute.xlu0 %2927  ;;  %v9122_v46 = vpop.f32.mrf.mxu0 }
 0x11f   : > { %7468 = vmatmul.msk.f32.vlgmr.msrb.gmra.mxu1 %vm317_vm1, %v2878_v23  ;;  %7472 = vmatmul.msk.f32.vlgmr.msrb.gmra.mxu3 %vm317_vm1, %v2928_v24  ;;  %v3364_v23 = vld [vmem:[%s8137_s21 + $0x39] sm:$0x3] }
 0x120   : > { %7476 = vmatmul.msk.f32.vlgmr.msra.gmra.mxu0 %vm317_vm1, %v8854_v34  ;;  %7489 = vmatpush.msk.msrb.mxu3 %vm321_vm0, %v8903_v63  ;;  %v1272_v34 = vmul.f32 %v1221_v21, %v8743_v44  ;;  %v1151_v44 = vmul.f32 %v9005_v53, %v1150_v32 }
 0x121   : > { %7485 = vmatpush.msk.msrb.mxu1 %vm321_vm0, %v8903_v63  ;;  %7499 = vmatpush.msk.msra.mxu0 %vm3370_vm10, %v9077_v59  ;;  %v1201_v63 = vsel %vm9091_vm11, %v8943_v1, %v1197_v30  ;;  %vm1203_vm0 = vcmp.eq.f32.partialorder %v1202_v31, 8.507059e+37  ;;  %v1159_v1 = vand.u32 2147483648, %v8876_v42  ;;  %v3362_v31 = vld [vmem:[%s8137_s21 + $0x29] sm:$0x3] }
 0x122   : > { %3167 = vmatpush.msrb.mxu3 %v8926_v10  ;;  %v9101_v37 = vpop.f32.mrf.mxu2  ;;  %v9112_v43 = vpop.f32.mrf.mxu3  ;;  %v1152_v27 = vadd.f32 %v9005_v53, %v1151_v44 }
 0x123   : > { %5216 = vrot.lane.b32.xlu1 %v1273_v35, %s8019_s17  ;;  %3117 = vmatpush.msrb.mxu1 %v8926_v10  ;;  %v1206_v10 = vsel %vm1203_vm0, %v1205_v38, %v1201_v63  ;;  %v1160_v48 = vor.u32 1.1754944e-38, %v1159_v1  ;;  %v9140_v12 = vpop.f32.mrf.mxu1  ;;  %v1525_v38 = vadd.f32 %v9122_v46, %v8964_v2 }
 0x124   : > { %5214 = vrot.lane.b32.xlu0 %v1272_v34, %s8019_s17  ;;  %v1156_v52 = vsel %vm1155_vm14, %v9005_v53, %v1152_v27  ;;  %v9201_v34 = vld [vmem:[%s10563_s1 + $0x10] sm:$0x3f] }
 0x125   : > { %v3049_v20 = vpop.permute.xlu1 %3048  ;;  %v9114_v25 = vpop.permute.xlu2 %3659 }
 0x126   : > { %v3024_v41 = vpop.permute.xlu0 %3023 }
 0x127   : > { %7478 = vmatmul.msk.f32.vlgmr.msra.gmra.mxu1 %vm317_vm1, %v8894_v33  ;;  %7480 = vmatmul.msk.f32.vlgmr.msra.gmra.mxu2 %vm317_vm1, %v3024_v41  ;;  %v1271_v33 = vmul.f32 %v1206_v10, %v8773_v61  ;;  %v1161_v61 = vsel %vm1158_vm15, %v1160_v48, %v1156_v52  ;;  %v1550_v48 = vadd.f32 %v9140_v12, %v9042_v18 }
 0x128   : > { %7482 = vmatmul.msk.f32.vlgmr.msra.gmra.mxu3 %vm317_vm1, %v3049_v20  ;;  %7503 = vmatpush.msk.msra.mxu2 %vm3370_vm10, %v9077_v59  ;;  %v1268_v0 = vmul.f32 %v1161_v61, %v8794_v5 }
 0x129   : > { %7505 = vmatpush.msk.msra.mxu3 %vm3370_vm10, %v9077_v59  ;;  %7501 = vmatpush.msk.msra.mxu1 %vm3370_vm10, %v9077_v59 }
 0x12a   : > { %v9136_v54 = vpop.f32.mrf.mxu2  ;;  %v9144_v45 = vpop.f32.mrf.mxu3 }
 0x12b   : > { %v1575_v27 = vadd.f32 %v9136_v54, %v9044_v51 }
 0x12c   : > { %5212 = vrot.lane.b32.xlu0 %v1271_v33, %s8019_s17  ;;  %v9146_v53 = vpop.f32.mrf.mxu0  ;;  %v1600_v33 = vadd.f32 %v9144_v45, %v9053_v13 }
 0x12d   : > { %v3124_v42 = vpop.permute.xlu1 %3123  ;;  %v9138_v55 = vpop.permute.xlu2 %3684  ;;  %v1625_v51 = vadd.f32 %v9146_v53, %v9067_v56 }
 0x12e   : > { %v3074_v49 = vpop.permute.xlu0 %3073 }
 0x12f   : > { %7484 = vmatmul.msk.f32.vlgmr.msrb.gmra.mxu0 %vm317_vm1, %v3074_v49  ;;  %7488 = vmatmul.msk.f32.vlgmr.msrb.gmra.mxu2 %vm317_vm1, %v3124_v42 }
 0x130   : > { %7490 = vmatmul.msk.f32.vlgmr.msrb.gmra.mxu3 %vm317_vm1, %v8993_v6  ;;  %7507 = vmatpush.msk.msrb.mxu0 %vm3370_vm10, %v9077_v59 }
 0x131   : > { %7513 = vmatpush.msk.msrb.mxu3 %vm3370_vm10, %v9077_v59  ;;  %7511 = vmatpush.msk.msrb.mxu2 %vm3370_vm10, %v9077_v59 }
 0x132   : > { %v9166_v22 = vpop.f32.mrf.mxu2 }
 0x133   : > { %v9177_v58 = vpop.f32.mrf.mxu3 }
 0x134   : > { %5206 = vrot.lane.b32.xlu0 %v1268_v0, %s8019_s17  ;;  %v9170_v5 = vpop.f32.mrf.mxu1  ;;  %v1737_v7 = vpop.f32.mrf.mxu0 }
 0x135   : > { %v3557_v4 = vpop.permute.xlu1 %3556  ;;  %v9161_v9 = vpop.permute.xlu2 %3846  ;;  %v1915_v44 = vadd.f32 %v1737_v7, %v1525_v38 }
 0x136   : > { %v3099_v6 = vpop.permute.xlu0 %3098 }
 0x137   : > { %7486 = vmatmul.msk.f32.vlgmr.msrb.gmra.mxu1 %vm317_vm1, %v3099_v6  ;;  %7500 = vmatmul.msk.f32.vlgmr.msra.gmra.mxu0 %vm3366_vm2, %v3357_v62  ;;  %vm277_vm1 = vcmask 124928  }
 0x138   : > { %7504 = vmatmul.msk.f32.vlgmr.msra.gmra.mxu2 %vm3366_vm2, %v3359_v8  ;;  %7506 = vmatmul.msk.f32.vlgmr.msra.gmra.mxu3 %vm3366_vm2, %v3360_v15 }
 0x139   : > { %7509 = vmatpush.msk.msrb.mxu1 %vm3370_vm10, %v9077_v59  ;;  %7521 = vmatpush.msk.msra.mxu3 %vm3370_vm10, %v3356_v17 }
 0x13a   : > { %7515 = vmatpush.msk.msra.mxu0 %vm3370_vm10, %v3356_v17  ;;  %7519 = vmatpush.msk.msra.mxu2 %vm3370_vm10, %v3356_v17 }
 0x13b   : > { %v1787_v59 = vpop.f32.mrf.mxu2 }
 0x13c   : > { %v1762_v21 = vpop.f32.mrf.mxu1  ;;  %v1917_v52 = vadd.f32 %v1787_v59, %v1575_v27 }
 0x13d   : > { %v3585_v19 = vpop.permute.xlu1 %3584  ;;  %v9185_v50 = vpop.permute.xlu2 %3921  ;;  %v1916_v18 = vadd.f32 %v1762_v21, %v1550_v48  ;;  %v3981_v48 = vld [vmem:[%s8137_s21 + $0x1d] sm:$0x3] }
 0x13e   : > { %v3635_v24 = vpop.permute.xlu0 %3634  ;;  %v1837_v30 = vpop.f32.mrf.mxu0 }
 0x13f   : > { %7502 = vmatmul.msk.f32.vlgmr.msra.gmra.mxu1 %vm3366_vm2, %v3358_v26  ;;  %7508 = vmatmul.msk.f32.vlgmr.msrb.gmra.mxu0 %vm3366_vm2, %v3361_v14  ;;  %v1919_v42 = vadd.f32 %v1837_v30, %v1625_v51 }
 0x140   : > { %7512 = vmatmul.msk.f32.vlgmr.msrb.gmra.mxu2 %vm3366_vm2, %v3363_v29  ;;  %7514 = vmatmul.msk.f32.vlgmr.msrb.gmra.mxu3 %vm3366_vm2, %v3364_v23  ;;  %v1675_v29 = vadd.f32 %v9166_v22, %v9101_v37 }
 0x141   : > { %7517 = vmatpush.msk.msra.mxu1 %vm3370_vm10, %v3356_v17  ;;  %7529 = vmatpush.msk.msrb.mxu3 %vm3370_vm10, %v3356_v17 }
 0x142   : > { %v1812_v28 = vpop.f32.mrf.mxu3  ;;  %7523 = vmatpush.msk.msrb.mxu0 %vm3370_vm10, %v3356_v17  ;;  %7527 = vmatpush.msk.msrb.mxu2 %vm3370_vm10, %v3356_v17 }
 0x143   : > { %v1918_v13 = vadd.f32 %v1812_v28, %v1600_v33  ;;  %v3980_v33 = vld [vmem:[%s8137_s21 + $0x15] sm:$0x3] }
 0x144   : > { %v9221_v20 = vpop.f32.mrf.mxu1 }
 0x145   : > { %v3735_v32 = vpop.permute.xlu1 %3734  ;;  %v9196_v36 = vpop.permute.xlu2 %4192 }
 0x146   : > { %v3710_v35 = vpop.permute.xlu0 %3709 }
 0x147   : > { %7510 = vmatmul.msk.f32.vlgmr.msrb.gmra.mxu1 %vm3366_vm2, %v3362_v31  ;;  %7516 = vmatmul.msk.f32.vlgmr.msra.gmra.mxu0 %vm3366_vm2, %v3557_v4 }
 0x148   : > { %7520 = vmatmul.msk.f32.vlgmr.msra.gmra.mxu2 %vm3366_vm2, %v9070_v60  ;;  %7522 = vmatmul.msk.f32.vlgmr.msra.gmra.mxu3 %vm3366_vm2, %v3635_v24 }
 0x149   : > { %7525 = vmatpush.msk.msrb.mxu1 %vm3370_vm10, %v3356_v17  ;;  %7538 = vmatpush.msk.msra.mxu3 %vm3370_vm10, %v9201_v34  ;;  %v9261_v17 = vld [vmem:[%s10563_s1 + $0x16] sm:$0x3f] }
 0x14a   : > { %v9213_v63 = vpop.f32.mrf.mxu2  ;;  %7532 = vmatpush.msk.msra.mxu0 %vm3370_vm10, %v9201_v34  ;;  %7536 = vmatpush.msk.msra.mxu2 %vm3370_vm10, %v9201_v34 }
 0x14b   : > { %v9219_v60 = vpop.f32.mrf.mxu3  ;;  %v1921_v37 = vadd.f32 %v9213_v63, %v1675_v29 }
 0x14c   : > { %v1958_v41 = vpop.f32.mrf.mxu0 }
 0x14d   : > { %v2136_v2 = vadd.f32 %v1958_v41, %v1915_v44  ;;  %v3822_v10 = vpop.permute.xlu1 %3821  ;;  %v9223_v46 = vpop.permute.xlu2 %4220 }
 0x14e   : > { %v3769_v1 = vpop.permute.xlu0 %3768 }
 0x14f   : > { %v9228_v47 = vadd.f32 %v8671_v11, %v2136_v2  ;;  %7518 = vmatmul.msk.f32.vlgmr.msra.gmra.mxu1 %vm3366_vm2, %v3585_v19  ;;  %7524 = vmatmul.msk.f32.vlgmr.msrb.gmra.mxu0 %vm3366_vm2, %v9114_v25  ;;  %v8020_v19 = vmov 0.0  }
 0x150   : > { %7528 = vmatmul.msk.f32.vlgmr.msrb.gmra.mxu2 %vm3366_vm2, %v3710_v35  ;;  %7530 = vmatmul.msk.f32.vlgmr.msrb.gmra.mxu3 %vm3366_vm2, %v3735_v32  ;;  %285 = vst.msk [vmem:[#allocation2 + $0x1c] sm:$0x7] %vm277_vm1, %v8020_v19 }
 0x151   : > { %v7413_v54 = vmul.f32 -1.442695, %v9228_v47  ;;  %7534 = vmatpush.msk.msra.mxu1 %vm3370_vm10, %v9201_v34  ;;  %7546 = vmatpush.msk.msrb.mxu3 %vm3370_vm10, %v9201_v34  ;;  %278 = vst.msk [vmem:[#allocation2] sm:$0x7] %vm277_vm1, %v8020_v19 }
 0x152   : > { %v2008_v25 = vpop.f32.mrf.mxu2  ;;  %7540 = vmatpush.msk.msrb.mxu0 %vm3370_vm10, %v9201_v34  ;;  %7544 = vmatpush.msk.msrb.mxu2 %vm3370_vm10, %v9201_v34  ;;  %279 = vst.msk [vmem:[#allocation2 + $0x4] sm:$0x7] %vm277_vm1, %v8020_v19 }
 0x153   : > { %7818 = vpow2.f32 %v7413_v54  ;;  %v2138_v56 = vadd.f32 %v2008_v25, %v1917_v52  ;;  %v2033_v49 = vpop.f32.mrf.mxu3  ;;  %280 = vst.msk [vmem:[#allocation2 + $0x8] sm:$0x7] %vm277_vm1, %v8020_v19  ;;  %v9357_v54 = vld [vmem:[%s10563_s1 + $0x20] sm:$0x3f] }
 0x154   : > { %v2139_v12 = vadd.f32 %v2033_v49, %v1918_v13  ;;  %v1983_v61 = vpop.f32.mrf.mxu1  ;;  %v2058_v45 = vpop.f32.mrf.mxu0  ;;  %281 = vst.msk [vmem:[#allocation2 + $0xc] sm:$0x7] %vm277_vm1, %v8020_v19 }
 0x155   : > { %v9251_v53 = vadd.f32 %v8671_v11, %v2138_v56  ;;  %v2137_v0 = vadd.f32 %v1983_v61, %v1916_v18  ;;  %v2140_v62 = vadd.f32 %v2058_v45, %v1919_v42  ;;  %v3872_v4 = vpop.permute.xlu1 %3871  ;;  %v9256_v6 = vpop.permute.xlu2 %4370  ;;  %282 = vst.msk [vmem:[#allocation2 + $0x10] sm:$0x7] %vm277_vm1, %v8020_v19 }
 0x156   : > { %v9254_v8 = vadd.f32 %v8671_v11, %v2139_v12  ;;  %v3797_v15 = vpop.permute.xlu0 %3796  ;;  %283 = vst.msk [vmem:[#allocation2 + $0x14] sm:$0x7] %vm277_vm1, %v8020_v19 }
 0x157   : > { %v7415_v7 = vmul.f32 -1.442695, %v9251_v53  ;;  %v9265_v26 = vadd.f32 %v8671_v11, %v2137_v0  ;;  %v9268_v14 = vadd.f32 %v8671_v11, %v2140_v62  ;;  %7526 = vmatmul.msk.f32.vlgmr.msrb.gmra.mxu1 %vm3366_vm2, %v9138_v55  ;;  %7533 = vmatmul.msk.f32.vlgmr.msra.gmra.mxu0 %vm3366_vm2, %v3769_v1  ;;  %284 = vst.msk [vmem:[#allocation2 + $0x18] sm:$0x7] %vm277_vm1, %v8020_v19  ;;  %v3979_v0 = vld [vmem:[%s8137_s21 + $0xd] sm:$0x3] }
 0x158   : > { %v7416_v23 = vmul.f32 -1.442695, %v9254_v8  ;;  %7537 = vmatmul.msk.f32.vlgmr.msra.gmra.mxu2 %vm3366_vm2, %v3822_v10  ;;  %7539 = vmatmul.msk.f32.vlgmr.msra.gmra.mxu3 %vm3366_vm2, %v9161_v9  ;;  %286 = vst.msk [vmem:[#allocation2 + $0x20] sm:$0x7] %vm277_vm1, %v8020_v19  ;;  %v3978_v10 = vld [vmem:[%s8137_s21 + $0x5] sm:$0x3] }
 0x159   : > { %v7819_v55 = vpop.eup %7818  ;;  %7820 = vpow2.f32 %v7415_v7  ;;  %v7414_v24 = vmul.f32 -1.442695, %v9265_v26  ;;  %v7417_v59 = vmul.f32 -1.442695, %v9268_v14  ;;  %7542 = vmatpush.msk.msrb.mxu1 %vm3370_vm10, %v9201_v34  ;;  %7555 = vmatpush.msk.msra.mxu3 %vm3370_vm10, %v9261_v17  ;;  %287 = vst.msk [vmem:[#allocation2 + $0x24] sm:$0x7] %vm277_vm1, %v8020_v19 }
 0x15a   : > { %7822 = vpow2.f32 %v7416_v23  ;;  %7549 = vmatpush.msk.msra.mxu0 %vm3370_vm10, %v9261_v17  ;;  %7553 = vmatpush.msk.msra.mxu2 %vm3370_vm10, %v9261_v17  ;;  %v9298_v9 = vadd.f32 1.0, %v7819_v55 }
 0x15b   : > { %7824 = vpow2.f32 %v7414_v24  ;;  %v2108_v22 = vpop.f32.mrf.mxu2 }
 0x15c   : > { %v2142_v21 = vadd.f32 %v2108_v22, %v1921_v37  ;;  %7826 = vpow2.f32 %v7417_v59  ;;  %v9365_v18 = vpop.f32.mrf.mxu1  ;;  %v3984_v37 = vld [vmem:[%s8137_s21 + $0x35] sm:$0x3] }
 0x15d   : > { %v3897_v28 = vpop.permute.xlu1 %3896  ;;  %v9309_v32 = vpop.permute.xlu2 %4669  ;;  %7828 = vrcp.f32 %v9298_v9 }
 0x15e   : > { %v9307_v30 = vadd.f32 %v8671_v11, %v2142_v21  ;;  %v3947_v31 = vpop.permute.xlu0 %3946  ;;  %v9367_v42 = vpop.f32.mrf.mxu0 }
 0x15f   : > { %v7821_v35 = vpop.eup %7820  ;;  %7535 = vmatmul.msk.f32.vlgmr.msra.gmra.mxu1 %vm3366_vm2, %v3797_v15  ;;  %7541 = vmatmul.msk.f32.vlgmr.msrb.gmra.mxu0 %vm3366_vm2, %v3872_v4 }
 0x160   : > { %v7823_v34 = vpop.eup %7822  ;;  %v9318_v38 = vadd.f32 1.0, %v7821_v35  ;;  %7545 = vmatmul.msk.f32.vlgmr.msrb.gmra.mxu2 %vm3366_vm2, %v9185_v50  ;;  %7547 = vmatmul.msk.f32.vlgmr.msrb.gmra.mxu3 %vm3366_vm2, %v3947_v31  ;;  %v7419_v44 = vmul.f32 -1.442695, %v9307_v30 }
 0x161   : > { %v7825_v11 = vpop.eup %7824  ;;  %v9325_v63 = vadd.f32 1.0, %v7823_v34  ;;  %7551 = vmatpush.msk.msra.mxu1 %vm3370_vm10, %v9261_v17  ;;  %7563 = vmatpush.msk.msrb.mxu3 %vm3370_vm10, %v9261_v17  ;;  %v3985_v34 = vld [vmem:[%s8137_s21 + $0x3d] sm:$0x3] }
 0x162   : > { %7830 = vrcp.f32 %v9318_v38  ;;  %v9333_v50 = vadd.f32 1.0, %v7825_v11  ;;  %7557 = vmatpush.msk.msrb.mxu0 %vm3370_vm10, %v9261_v17  ;;  %7561 = vmatpush.msk.msrb.mxu2 %vm3370_vm10, %v9261_v17  ;;  %v7827_v41 = vpop.eup %7826  ;;  %v2223_v13 = vand.u32 2147483647, %v9318_v38  ;;  %v2225_v56 = vand.u32 2147483648, %v9318_v38  ;;  %v9403_v59 = vpop.f32.mrf.mxu3 }
 0x163   : > { %7832 = vrcp.f32 %v9325_v63  ;;  %v9341_v2 = vadd.f32 1.0, %v7827_v41  ;;  %v9344_v1 = vpop.eup %7828  ;;  %vm2219_vm3 = vweird.f32 %v9318_v38  ;;  %vm2234_vm5 = vweird.f32 %v9325_v63 }
 0x164   : > { %7834 = vrcp.f32 %v9333_v50  ;;  %v2185_v49 = vmul.f32 %v9344_v1, %v9298_v9  ;;  %vm9386_vm4 = vcmp.eq.f32.partialorder %v2223_v13, 8.507059e+37  ;;  %v2238_v29 = vand.u32 2147483647, %v9325_v63 }
 0x165   : > { %7836 = vpow2.f32 %v7419_v44  ;;  %v9346_v27 = vpop.permute.xlu1 %4270  ;;  %v9352_v52 = vpop.permute.xlu2 %4719  ;;  %v2226_v22 = vor.u32 1.1754944e-38, %v2225_v56  ;;  %v2208_v41 = vand.u32 2147483647, %v9333_v50  ;;  %v2210_v13 = vand.u32 2147483648, %v9333_v50 }
 0x166   : > { %v9350_v51 = vpop.permute.xlu0 %4245  ;;  %7838 = vrcp.f32 %v9341_v2  ;;  %v2186_v55 = vsub.f32 1.0, %v2185_v49  ;;  %vm9440_vm0 = vcmp.eq.f32.partialorder %v2238_v29, 8.507059e+37  ;;  %vm2204_vm12 = vweird.f32 %v9333_v50 }
 0x167   : > { %7543 = vmatmul.msk.f32.vlgmr.msrb.gmra.mxu1 %vm3366_vm2, %v3897_v28  ;;  %7550 = vmatmul.msk.f32.vlgmr.msra.gmra.mxu0 %vm3366_vm2, %v3978_v10  ;;  %v2240_v28 = vand.u32 2147483648, %v9325_v63  ;;  %vm9457_vm14 = vcmp.eq.f32.partialorder %v2208_v41, 8.507059e+37  ;;  %vm2190_vm1 = vweird.f32 %v9344_v1 }
 0x168   : > { %v9363_v25 = vpop.eup %7830  ;;  %7554 = vmatmul.msk.f32.vlgmr.msra.gmra.mxu2 %vm3366_vm2, %v3980_v33  ;;  %7556 = vmatmul.msk.f32.vlgmr.msra.gmra.mxu3 %vm3366_vm2, %v3981_v48 }
 0x169   : > { %v9374_v12 = vpop.eup %7832  ;;  %7559 = vmatpush.msk.msrb.mxu1 %vm3370_vm10, %v9261_v17  ;;  %7572 = vmatpush.msk.msra.mxu3 %vm3370_vm10, %v9357_v54  ;;  %v2215_v61 = vmul.f32 %v9363_v25, %v9318_v38  ;;  %v3982_v17 = vld [vmem:[%s8137_s21 + $0x25] sm:$0x3]  ;;  %vm2220_vm7 = vweird.f32 %v9363_v25  ;;  %v2241_v38 = vor.u32 1.1754944e-38, %v2240_v28 }
 0x16a   : > { %v9382_v45 = vpop.eup %7834  ;;  %v2230_v4 = vmul.f32 %v9374_v12, %v9325_v63  ;;  %7570 = vmatpush.msk.msra.mxu2 %vm3370_vm10, %v9357_v54  ;;  %7566 = vmatpush.msk.msra.mxu0 %vm3370_vm10, %v9357_v54  ;;  %vm2235_vm8 = vweird.f32 %v9374_v12  ;;  %vm2221_vm11 = vmor %vm2219_vm3, %vm2220_vm7  ;;  %vm2189_vm3 = vweird.f32 %v9298_v9 }
 0x16b   : > { %v7837_v15 = vpop.eup %7836  ;;  %v2216_v7 = vsub.f32 1.0, %v2215_v61  ;;  %v2200_v23 = vmul.f32 %v9382_v45, %v9333_v50  ;;  %vm2205_vm9 = vweird.f32 %v9382_v45  ;;  %v2187_v61 = vmul.f32 %v9344_v1, %v2186_v55  ;;  %vm2236_vm13 = vmor %vm2234_vm5, %vm2235_vm8 }
 0x16c   : > { %v9401_v24 = vadd.f32 1.0, %v7837_v15  ;;  %v2231_v21 = vsub.f32 1.0, %v2230_v4  ;;  %v9407_v31 = vpop.eup %7838  ;;  %v9429_v4 = vpop.f32.mrf.mxu1  ;;  %vm2206_vm15 = vmor %vm2204_vm12, %vm2205_vm9 }
 0x16d   : > { %v9409_v35 = vpop.permute.xlu1 %4345  ;;  %v2217_v11 = vmul.f32 %v9363_v25, %v2216_v7  ;;  %v2201_v44 = vsub.f32 1.0, %v2200_v23  ;;  %v9418_v33 = vpop.permute.xlu2 %4744  ;;  %v2245_v7 = vmul.f32 %v9407_v31, %v9341_v2  ;;  %vm2250_vm9 = vweird.f32 %v9407_v31 }
 0x16e   : > { %7840 = vrcp.f32 %v9401_v24  ;;  %v9416_v10 = vpop.permute.xlu0 %4295  ;;  %v2232_v48 = vmul.f32 %v9374_v12, %v2231_v21  ;;  %v9431_v15 = vpop.f32.mrf.mxu0  ;;  %vm2279_vm8 = vweird.f32 %v9401_v24 }
 0x16f   : > { %7552 = vmatmul.msk.f32.vlgmr.msra.gmra.mxu1 %vm3366_vm2, %v3979_v0  ;;  %7558 = vmatmul.msk.f32.vlgmr.msrb.gmra.mxu0 %vm3366_vm2, %v3982_v17  ;;  %v2218_v56 = vadd.f32 %v9363_v25, %v2217_v11  ;;  %v2202_v49 = vmul.f32 %v9382_v45, %v2201_v44  ;;  %v9447_v23 = vpop.f32.mrf.mxu2  ;;  %v3983_v44 = vld [vmem:[%s8137_s21 + $0x2d] sm:$0x3]  ;;  %v9510_v17 = vld [vmem:[%s10563_s1 + $0x26] sm:$0x3f] }
 0x170   : > { %7562 = vmatmul.msk.f32.vlgmr.msrb.gmra.mxu2 %vm3366_vm2, %v3984_v37  ;;  %7564 = vmatmul.msk.f32.vlgmr.msrb.gmra.mxu3 %vm3366_vm2, %v3985_v34  ;;  %v2233_v0 = vadd.f32 %v9374_v12, %v2232_v48  ;;  %v2211_v37 = vor.u32 1.1754944e-38, %v2210_v13  ;;  %v9478_v34 = vpop.f32.mrf.mxu3  ;;  %v2195_v48 = vand.u32 2147483648, %v9298_v9  ;;  %v2246_v13 = vsub.f32 1.0, %v2245_v7 }
 0x171   : > { %v2222_v55 = vsel %vm2221_vm11, %v9363_v25, %v2218_v56  ;;  %7568 = vmatpush.msk.msra.mxu1 %vm3370_vm10, %v9357_v54  ;;  %v2203_v29 = vadd.f32 %v9382_v45, %v2202_v49  ;;  %7580 = vmatpush.msk.msrb.mxu3 %vm3370_vm10, %v9357_v54 }
 0x172   : > { %v2227_v25 = vsel %vm9386_vm4, %v2226_v22, %v2222_v55  ;;  %v2237_v63 = vsel %vm2236_vm13, %v9374_v12, %v2233_v0  ;;  %7574 = vmatpush.msk.msrb.mxu0 %vm3370_vm10, %v9357_v54  ;;  %7578 = vmatpush.msk.msrb.mxu2 %vm3370_vm10, %v9357_v54  ;;  %v2188_v12 = vadd.f32 %v9344_v1, %v2187_v61  ;;  %vm9497_vm4 = vmor %vm2189_vm3, %vm2190_vm1 }
 0x173   : > { %v2306_v21 = vmul.f32 %v2227_v25, %v9251_v53  ;;  %v2242_v62 = vsel %vm9440_vm0, %v2241_v38, %v2237_v63  ;;  %v2207_v22 = vsel %vm2206_vm15, %v9382_v45, %v2203_v29  ;;  %v2247_v7 = vmul.f32 %v9407_v31, %v2246_v13  ;;  %v4405_v13 = vld [vmem:[%s8137_s21 + $0x21] sm:$0x3] }
 0x174   : > { %v7841_v28 = vpop.eup %7840  ;;  %v2307_v11 = vmul.f32 %v2242_v62, %v9254_v8  ;;  %v2212_v41 = vsel %vm9457_vm14, %v2211_v37, %v2207_v22  ;;  %v2193_v8 = vand.u32 2147483647, %v9298_v9  ;;  %v2192_v9 = vsel %vm9497_vm4, %v9344_v1, %v2188_v12  ;;  %v9515_v38 = vpop.f32.mrf.mxu1 }
 0x175   : > { %5252 = vrot.lane.b32.xlu2 %v2306_v21, %s8021_s20  ;;  %v9486_v53 = vpop.permute.xlu1 %4616  ;;  %v2305_v45 = vmul.f32 %v2212_v41, %v9265_v26  ;;  %v2275_v56 = vmul.f32 %v7841_v28, %v9401_v24  ;;  %v5219_v61 = vpop.permute.xlu2 %5218  ;;  %v691_v55 = vadd.f32 %v8600_v40, %v8541_v16  ;;  %v2285_v1 = vand.u32 2147483648, %v9401_v24 }
 0x176   : > { %5254 = vrot.lane.b32.xlu0 %v2307_v11, %s8021_s20  ;;  %v9493_v49 = vpop.permute.xlu0 %4320  ;;  %5238 = vst.msk [vmem:[#allocation2 + $0x1c] sm:$0x3] %vm5231_vm6, %v5219_v61  ;;  %v2196_v29 = vor.u32 1.1754944e-38, %v2195_v48  ;;  %vm2280_vm5 = vweird.f32 %v7841_v28  ;;  %v2283_v25 = vand.u32 2147483647, %v9401_v24  ;;  %vm2194_vm7 = vcmp.eq.f32.partialorder %v2193_v8, 8.507059e+37  ;;  %v9527_v16 = vpop.f32.mrf.mxu0 }
 0x177   : > { %7560 = vmatmul.msk.f32.vlgmr.msrb.gmra.mxu1 %vm3366_vm2, %v3983_v44  ;;  %5250 = vrot.lane.b32.xlu1 %v2305_v45, %s8021_s20  ;;  %v2276_v26 = vsub.f32 1.0, %v2275_v56  ;;  %vm2281_vm11 = vmor %vm2279_vm8, %vm2280_vm5  ;;  %v2286_v63 = vor.u32 1.1754944e-38, %v2285_v1  ;;  %vm2249_vm0 = vweird.f32 %v9341_v2  ;;  %v2255_v37 = vand.u32 2147483648, %v9341_v2  ;;  %v4404_v48 = vld [vmem:[%s8137_s21 + $0x19] sm:$0x3] }
 0x178   : > { %7571 = vmatmul.msk.f32.vlgmr.msra.gmra.mxu2 %vm3366_vm2, %v9350_v51  ;;  %7573 = vmatmul.msk.f32.vlgmr.msra.gmra.mxu3 %vm3366_vm2, %v9346_v27  ;;  %v2197_v40 = vsel %vm2194_vm7, %v2196_v29, %v2192_v9  ;;  %v9533_v27 = vpop.f32.mrf.mxu2  ;;  %v2248_v51 = vadd.f32 %v9407_v31, %v2247_v7  ;;  %vm2284_vm12 = vcmp.eq.f32.partialorder %v2283_v25, 8.507059e+37  ;;  %v2253_v22 = vand.u32 2147483647, %v9341_v2  ;;  %v9548_v12 = vpop.f32.mrf.mxu3  ;;  %vm9552_vm13 = vmor %vm2249_vm0, %vm2250_vm9  ;;  %v4402_v61 = vld [vmem:[%s8137_s21 + $0x9] sm:$0x3] }
 0x179   : > { %7567 = vmatmul.msk.f32.vlgmr.msra.gmra.mxu0 %vm3366_vm2, %v9196_v36  ;;  %v2277_v50 = vmul.f32 %v7841_v28, %v2276_v26  ;;  %7576 = vmatpush.msk.msrb.mxu1 %vm3370_vm10, %v9357_v54  ;;  %v898_v54 = vadd.f32 %v8692_v57, %v691_v55  ;;  %v2304_v24 = vmul.f32 %v2197_v40, %v9228_v47  ;;  %v4403_v7 = vld [vmem:[%s8137_s21 + $0x11] sm:$0x3]  ;;  %v4408_v1 = vld [vmem:[%s8137_s21 + $0x39] sm:$0x3]  ;;  %v4409_v29 = vld [vmem:[%s8137_s21 + $0x41] sm:$0x3] }
 0x17a   : > { %7589 = vmatpush.msk.msra.mxu3 %vm3370_vm10, %v9510_v17  ;;  %7583 = vmatpush.msk.msra.mxu0 %vm3370_vm10, %v9510_v17  ;;  %v2252_v47 = vsel %vm9552_vm13, %v9407_v31, %v2248_v51  ;;  %vm2254_vm14 = vcmp.eq.f32.partialorder %v2253_v22, 8.507059e+37  ;;  %v1700_v51 = vadd.f32 %v9177_v58, %v9112_v43  ;;  %v7616_v43 = vld [vmem:[%s10563_s1 + $0x36] sm:$0x3f] }
 0x17b   : > { %v2278_v36 = vadd.f32 %v7841_v28, %v2277_v50  ;;  %7587 = vmatpush.msk.msra.mxu2 %vm3370_vm10, %v9510_v17  ;;  %v1104_v2 = vadd.f32 %v8979_v39, %v898_v54 }
 0x17d   : > { %v2282_v21 = vsel %vm2281_vm11, %v7841_v28, %v2278_v36  ;;  %v9544_v62 = vpop.permute.xlu1 %4644  ;;  %v1650_v28 = vadd.f32 %v9170_v5, %v9105_v3  ;;  %v9587_v5 = vld [vmem:[%s10564_s2] ss:$0 sm:$0xff] }
 0x17e   : > { %v2287_v11 = vsel %vm2284_vm12, %v2286_v63, %v2282_v21  ;;  %v9550_v44 = vpop.permute.xlu0 %4694  ;;  %v9593_v31 = vpop.f32.mrf.mxu0 }
 0x17f   : > { %v2310_v41 = vmul.f32 %v2287_v11, %v9307_v30  ;;  %7569 = vmatmul.msk.f32.vlgmr.msra.gmra.mxu1 %vm3366_vm2, %v9223_v46  ;;  %5248 = vrot.lane.b32.xlu1 %v2304_v24, %s8021_s20  ;;  %v2256_v30 = vor.u32 1.1754944e-38, %v2255_v37  ;;  %v1920_v39 = vadd.f32 %v9221_v20, %v1650_v28  ;;  %v9574_v46 = vpop.f32.mrf.mxu1  ;;  %v9590_v20 = vadd.f32 %v9587_v5, %v1104_v2  ;;  %v4407_v37 = vld [vmem:[%s8137_s21 + $0x31] sm:$0x3] }
 0x180   : > { %7579 = vmatmul.msk.f32.vlgmr.msrb.gmra.mxu2 %vm3366_vm2, %v9409_v35  ;;  %7581 = vmatmul.msk.f32.vlgmr.msrb.gmra.mxu3 %vm3366_vm2, %v9256_v6  ;;  %v9595_v35 = vpop.f32.mrf.mxu2  ;;  %v1922_v24 = vadd.f32 %v9219_v60, %v1700_v51 }
 0x181   : > { %5260 = vrot.lane.b32.xlu2 %v2310_v41, %s8021_s20  ;;  %7575 = vmatmul.msk.f32.vlgmr.msrb.gmra.mxu0 %vm3366_vm2, %v9416_v10  ;;  %v2257_v3 = vsel %vm2254_vm14, %v2256_v30, %v2252_v47  ;;  %v2141_v6 = vadd.f32 %v9365_v18, %v1920_v39  ;;  %v7599_v18 = vld [vmem:[%s10563_s1 + $0x30] sm:$0x3f]  ;;  %v7342_v0 = vmul.f32 -1.442695, %v9590_v20 }
 0x182   : > { %7585 = vmatpush.msk.msra.mxu1 %vm3370_vm10, %v9510_v17  ;;  %7597 = vmatpush.msk.msrb.mxu3 %vm3370_vm10, %v9510_v17  ;;  %v2308_v45 = vmul.f32 %v2257_v3, %v9268_v14  ;;  %v9602_v56 = vpop.f32.mrf.mxu3  ;;  %v2143_v41 = vadd.f32 %v9403_v59, %v1922_v24  ;;  %v2561_v59 = vadd.f32 %v9527_v16, %v9367_v42 }
 0x183   : > { %7595 = vmatpush.msk.msrb.mxu2 %vm3370_vm10, %v9510_v17  ;;  %7591 = vmatpush.msk.msrb.mxu0 %vm3370_vm10, %v9510_v17  ;;  %v9615_v14 = vadd.f32 %v9587_v5, %v2141_v6  ;;  %7842 = vpow2.f32 %v7342_v0  ;;  %v2586_v3 = vadd.f32 %v9574_v46, %v9429_v4 }
 0x185   : > { %v9597_v10 = vpop.permute.xlu1 %4794 }
 0x186   : > { %v9604_v8 = vpop.permute.xlu0 %4769 }
 0x187   : > { %7577 = vmatmul.msk.f32.vlgmr.msrb.gmra.mxu1 %vm3366_vm2, %v9493_v49  ;;  %5256 = vrot.lane.b32.xlu1 %v2308_v45, %s8021_s20  ;;  %v7418_v49 = vmul.f32 -1.442695, %v9615_v14  ;;  %v9626_v26 = vpop.f32.mrf.mxu1  ;;  %v4828_v45 = vld [vmem:[%s8137_s21 + $0x1d] sm:$0x3] }
 0x188   : > { %7588 = vmatmul.msk.f32.vlgmr.msra.gmra.mxu2 %vm3366_vm2, %v4404_v48  ;;  %7590 = vmatmul.msk.f32.vlgmr.msra.gmra.mxu3 %vm3366_vm2, %v4405_v13 }
 0x189   : > { %7584 = vmatmul.msk.f32.vlgmr.msra.gmra.mxu0 %vm3366_vm2, %v4402_v61  ;;  %7593 = vmatpush.msk.msrb.mxu1 %vm3370_vm10, %v9510_v17  ;;  %v4406_v17 = vld [vmem:[%s8137_s21 + $0x29] sm:$0x3]  ;;  %7844 = vpow2.f32 %v7418_v49  ;;  %v7843_v36 = vpop.eup %7842 }
 0x18a   : > { %7606 = vmatpush.msk.msra.mxu3 %vm3370_vm10, %v7599_v18  ;;  %7604 = vmatpush.msk.msra.mxu2 %vm3370_vm10, %v7599_v18  ;;  %v9631_v50 = vpop.f32.mrf.mxu2  ;;  %v9651_v21 = vadd.f32 1.0, %v7843_v36 }
 0x18b   : > { %7600 = vmatpush.msk.msra.mxu0 %vm3370_vm10, %v7599_v18  ;;  %v9637_v40 = vpop.f32.mrf.mxu3 }
 0x18c   : > { %v2773_v9 = vpop.f32.mrf.mxu0  ;;  %7846 = vrcp.f32 %v9651_v21 }
 0x18d   : > { %v5209_v55 = vpop.permute.xlu1 %5208 }
 0x18e   : > { %v5211_v25 = vpop.permute.xlu0 %5210  ;;  %5233 = vst.msk [vmem:[#allocation2 + $0x8] sm:$0x3] %vm5231_vm6, %v5209_v55  ;;  %v2636_v55 = vadd.f32 %v9602_v56, %v9478_v34 }
 0x18f   : > { %5234 = vst.msk [vmem:[#allocation2 + $0xc] sm:$0x3] %vm5231_vm6, %v5211_v25  ;;  %7586 = vmatmul.msk.f32.vlgmr.msra.gmra.mxu1 %vm3366_vm2, %v4403_v7  ;;  %v7845_v11 = vpop.eup %7844 }
 0x190   : > { %7596 = vmatmul.msk.f32.vlgmr.msrb.gmra.mxu2 %vm3366_vm2, %v4408_v1  ;;  %7598 = vmatmul.msk.f32.vlgmr.msrb.gmra.mxu3 %vm3366_vm2, %v4409_v29  ;;  %v9666_v60 = vadd.f32 1.0, %v7845_v11  ;;  %v2661_v29 = vadd.f32 %v9593_v31, %v9431_v15  ;;  %v1264_v11 = vand.u32 2147483648, %v9651_v21 }
 0x191   : > { %7592 = vmatmul.msk.f32.vlgmr.msrb.gmra.mxu0 %vm3366_vm2, %v4406_v17  ;;  %7602 = vmatpush.msk.msra.mxu1 %vm3370_vm10, %v7599_v18 }
 0x192   : > { %7614 = vmatpush.msk.msrb.mxu3 %vm3370_vm10, %v7599_v18  ;;  %7608 = vmatpush.msk.msrb.mxu0 %vm3370_vm10, %v7599_v18  ;;  %v2823_v58 = vpop.f32.mrf.mxu2  ;;  %7848 = vrcp.f32 %v9666_v60  ;;  %v9682_v39 = vpop.eup %7846  ;;  %vm2264_vm4 = vweird.f32 %v9666_v60 }
 0x193   : > { %7612 = vmatpush.msk.msrb.mxu2 %vm3370_vm10, %v7599_v18  ;;  %v2848_v47 = vpop.f32.mrf.mxu3  ;;  %v1254_v4 = vmul.f32 %v9682_v39, %v9651_v21  ;;  %vm1259_vm15 = vweird.f32 %v9682_v39 }
 0x194   : > { %v2798_v54 = vpop.f32.mrf.mxu1  ;;  %v9648_v63 = vpop.f32.mrf.mxu0  ;;  %v2954_v25 = vadd.f32 %v2848_v47, %v2636_v55 }
 0x195   : > { %v5217_v22 = vpop.permute.xlu1 %5216  ;;  %v1255_v49 = vsub.f32 1.0, %v1254_v4  ;;  %v2955_v36 = vadd.f32 %v9648_v63, %v2661_v29  ;;  %v4832_v63 = vld [vmem:[%s8137_s21 + $0x3d] sm:$0x3]  ;;  %v2686_v4 = vadd.f32 %v9626_v26, %v9515_v38 }
 0x196   : > { %5237 = vst.msk [vmem:[#allocation2 + $0x18] sm:$0x3] %vm5231_vm6, %v5217_v22  ;;  %v5215_v57 = vpop.permute.xlu0 %5214  ;;  %v4827_v22 = vld [vmem:[%s8137_s21 + $0x15] sm:$0x3] }
 0x197   : > { %5236 = vst.msk [vmem:[#allocation2 + $0x14] sm:$0x3] %vm5231_vm6, %v5215_v57  ;;  %7594 = vmatmul.msk.f32.vlgmr.msrb.gmra.mxu1 %vm3366_vm2, %v4407_v37  ;;  %v1256_v56 = vmul.f32 %v9682_v39, %v1255_v49  ;;  %v4831_v49 = vld [vmem:[%s8137_s21 + $0x35] sm:$0x3] }
 0x198   : > { %7605 = vmatmul.msk.f32.vlgmr.msra.gmra.mxu2 %vm3366_vm2, %v9309_v32  ;;  %7607 = vmatmul.msk.f32.vlgmr.msra.gmra.mxu3 %vm3366_vm2, %v9550_v44  ;;  %v9676_v32 = vadd.f32 %v9587_v5, %v2143_v41  ;;  %v2951_v44 = vadd.f32 %v2773_v9, %v2561_v59  ;;  %v9709_v46 = vpop.eup %7848  ;;  %v2611_v9 = vadd.f32 %v9595_v35, %v9447_v23  ;;  %v4830_v59 = vld [vmem:[%s8137_s21 + $0x2d] sm:$0x3] }
 0x199   : > { %7601 = vmatmul.msk.f32.vlgmr.msra.gmra.mxu0 %vm3366_vm2, %v9486_v53  ;;  %7610 = vmatpush.msk.msrb.mxu1 %vm3370_vm10, %v7599_v18  ;;  %v4826_v18 = vld [vmem:[%s8137_s21 + $0xd] sm:$0x3]  ;;  %v2260_v0 = vmul.f32 %v9709_v46, %v9666_v60  ;;  %v9754_v47 = vadd.f32 %v9682_v39, %v1256_v56  ;;  %vm2265_vm1 = vweird.f32 %v9709_v46 }
 0x19a   : > { %7623 = vmatpush.msk.msra.mxu3 %vm3370_vm10, %v7616_v43  ;;  %7617 = vmatpush.msk.msra.mxu0 %vm3370_vm10, %v7616_v43  ;;  %v7420_v42 = vmul.f32 -1.442695, %v9676_v32  ;;  %v2953_v23 = vadd.f32 %v2823_v58, %v2611_v9  ;;  %v1265_v9 = vor.u32 1.1754944e-38, %v1264_v11  ;;  %vm9816_vm7 = vmor %vm2264_vm4, %vm2265_vm1  ;;  %vm5272_vm1 = vcmask 91200  }
 0x19b   : > { %7621 = vmatpush.msk.msra.mxu2 %vm3370_vm10, %v7616_v43  ;;  %v2261_v34 = vsub.f32 1.0, %v2260_v0 }
 0x19c   : > { %v9679_v2 = vpop.f32.mrf.mxu1  ;;  %7850 = vpow2.f32 %v7420_v42 }
 0x19d   : > { %v2994_v53 = vpop.f32.mrf.mxu0  ;;  %v2262_v42 = vmul.f32 %v9709_v46, %v2261_v34 }
 0x19e   : > { %v3172_v28 = vadd.f32 %v2994_v53, %v2951_v44  ;;  %v5213_v30 = vpop.permute.xlu0 %5212  ;;  %v1262_v44 = vand.u32 2147483647, %v9651_v21  ;;  %v2711_v53 = vadd.f32 %v9631_v50, %v9533_v27  ;;  %v2268_v27 = vand.u32 2147483647, %v9666_v60 }
 0x19f   : > { %5235 = vst.msk [vmem:[#allocation2 + $0x10] sm:$0x3] %vm5231_vm6, %v5213_v30  ;;  %7603 = vmatmul.msk.f32.vlgmr.msra.gmra.mxu1 %vm3366_vm2, %v9544_v62  ;;  %v9700_v62 = vpop.f32.mrf.mxu2 }
 0x1a0   : > { %v9689_v16 = vadd.f32 %v9587_v5, %v3172_v28  ;;  %7613 = vmatmul.msk.f32.vlgmr.msrb.gmra.mxu2 %vm3366_vm2, %v9604_v8  ;;  %7615 = vmatmul.msk.f32.vlgmr.msrb.gmra.mxu3 %vm3366_vm2, %v9597_v10  ;;  %v4829_v8 = vld [vmem:[%s8137_s21 + $0x25] sm:$0x3]  ;;  %vm9805_vm5 = vcmp.eq.f32.partialorder %v1262_v44, 8.507059e+37  ;;  %vm9820_vm8 = vcmp.eq.f32.partialorder %v2268_v27, 8.507059e+37 }
 0x1a1   : > { %7609 = vmatmul.msk.f32.vlgmr.msrb.gmra.mxu0 %vm3366_vm2, %v9352_v52  ;;  %7619 = vmatpush.msk.msra.mxu1 %vm3370_vm10, %v7616_v43  ;;  %v2952_v52 = vadd.f32 %v2798_v54, %v2586_v3  ;;  %v2736_v3 = vadd.f32 %v9637_v40, %v9548_v12 }
 0x1a2   : > { %v7491_v6 = vmul.f32 -1.442695, %v9689_v16  ;;  %v9703_v48 = vpop.f32.mrf.mxu3  ;;  %7625 = vmatpush.msk.msrb.mxu0 %vm3370_vm10, %v7616_v43  ;;  %7629 = vmatpush.msk.msrb.mxu2 %vm3370_vm10, %v7616_v43  ;;  %v7851_v1 = vpop.eup %7850 }
 0x1a3   : > { %7631 = vmatpush.msk.msrb.mxu3 %vm3370_vm10, %v7616_v43  ;;  %v9738_v54 = vadd.f32 1.0, %v7851_v1  ;;  %v2958_v12 = vadd.f32 %v9703_v48, %v2736_v3 }
 0x1a4   : > { %7852 = vpow2.f32 %v7491_v6  ;;  %v3019_v10 = vpop.f32.mrf.mxu1 }
 0x1a5   : > { %v3173_v13 = vadd.f32 %v3019_v10, %v2952_v52  ;;  %v2957_v52 = vadd.f32 %v9700_v62, %v2711_v53  ;;  %v2956_v62 = vadd.f32 %v9679_v2, %v2686_v4 }
 0x1a6   : > { %v5207_v61 = vpop.permute.xlu0 %5206 }
 0x1a7   : > { %v9720_v7 = vadd.f32 %v9587_v5, %v3173_v13  ;;  %5232 = vst.msk [vmem:[#allocation2 + $0x4] sm:$0x3] %vm5231_vm6, %v5207_v61  ;;  %7611 = vmatmul.msk.f32.vlgmr.msrb.gmra.mxu1 %vm3366_vm2, %v9418_v33 }
 0x1a8   : > { %7622 = vmatmul.msk.f32.vlgmr.msra.gmra.mxu2 %vm3366_vm2, %v4828_v45  ;;  %7624 = vmatmul.msk.f32.vlgmr.msra.gmra.mxu3 %vm3366_vm2, %v4829_v8  ;;  %v2263_v8 = vadd.f32 %v9709_v46, %v2262_v42 }
 0x1a9   : > { %v7492_v35 = vmul.f32 -1.442695, %v9720_v7  ;;  %7618 = vmatmul.msk.f32.vlgmr.msra.gmra.mxu0 %vm3366_vm2, %v4826_v18  ;;  %7627 = vmatpush.msk.msrb.mxu1 %vm3370_vm10, %v7616_v43  ;;  %v4833_v43 = vld [vmem:[%s8137_s21 + $0x45] sm:$0x3]  ;;  %vm1258_vm10 = vweird.f32 %v9651_v21  ;;  %s8022_s21 = smov 12  }
 0x1aa   : > { %v7853_v33 = vpop.eup %7852  ;;  %v3044_v17 = vpop.f32.mrf.mxu2  ;;  %vm9786_vm3 = vmor %vm1258_vm10, %vm1259_vm15 }
 0x1ab   : > { %v9736_v51 = vadd.f32 1.0, %v7853_v33  ;;  %7854 = vpow2.f32 %v7492_v35  ;;  %v3174_v15 = vadd.f32 %v3044_v17, %v2953_v23  ;;  %v3069_v31 = vpop.f32.mrf.mxu3  ;;  %v1261_v2 = vsel %vm9786_vm3, %v9682_v39, %v9754_v47 }
 0x1ac   : > { %v3175_v37 = vadd.f32 %v3069_v31, %v2954_v25  ;;  %v3094_v24 = vpop.f32.mrf.mxu0  ;;  %v2270_v39 = vand.u32 2147483648, %v9666_v60  ;;  %v2267_v31 = vsel %vm9816_vm7, %v9709_v46, %v2263_v8  ;;  %v9871_v8 = vsel %vm9805_vm5, %v1265_v9, %v1261_v2 }
 0x1ad   : > { %7856 = vrcp.f32 %v9736_v51  ;;  %v9744_v57 = vadd.f32 %v9587_v5, %v3174_v15  ;;  %v3176_v41 = vadd.f32 %v3094_v24, %v2955_v36  ;;  %v3231_v15 = vand.u32 2147483648, %v9736_v51 }
 0x1ae   : > { %v9750_v58 = vadd.f32 %v9587_v5, %v3175_v37  ;;  %7858 = vrcp.f32 %v9738_v54  ;;  %v3229_v60 = vand.u32 2147483647, %v9736_v51 }
 0x1af   : > { %v7493_v28 = vmul.f32 -1.442695, %v9744_v57  ;;  %v9762_v30 = vadd.f32 %v9587_v5, %v3176_v41  ;;  %7620 = vmatmul.msk.f32.vlgmr.msra.gmra.mxu1 %vm3366_vm2, %v4827_v22 }
 0x1b0   : > { %v7494_v6 = vmul.f32 -1.442695, %v9750_v58  ;;  %7630 = vmatmul.msk.f32.vlgmr.msrb.gmra.mxu2 %vm3366_vm2, %v4832_v63  ;;  %7632 = vmatmul.msk.f32.vlgmr.msrb.gmra.mxu3 %vm3366_vm2, %v4833_v43  ;;  %vm3230_vm0 = vcmp.eq.f32.partialorder %v3229_v60, 8.507059e+37 }
 0x1b1   : > { %v7855_v50 = vpop.eup %7854  ;;  %7860 = vpow2.f32 %v7493_v28  ;;  %v7495_v10 = vmul.f32 -1.442695, %v9762_v30  ;;  %7626 = vmatmul.msk.f32.vlgmr.msrb.gmra.mxu0 %vm3366_vm2, %v4830_v59  ;;  %v3232_v28 = vor.u32 1.1754944e-38, %v3231_v15 }
 0x1b2   : > { %v9779_v40 = vadd.f32 1.0, %v7855_v50  ;;  %7862 = vpow2.f32 %v7494_v6  ;;  %v3144_v13 = vpop.f32.mrf.mxu2 }
 0x1b3   : > { %v7857_v26 = vpop.eup %7856  ;;  %7864 = vpow2.f32 %v7495_v10  ;;  %v3178_v48 = vadd.f32 %v3144_v13, %v2957_v52  ;;  %v3169_v45 = vpop.f32.mrf.mxu3 }
 0x1b4   : > { %7866 = vrcp.f32 %v9779_v40  ;;  %v3179_v61 = vadd.f32 %v3169_v45, %v2958_v12  ;;  %v3119_v18 = vpop.f32.mrf.mxu1  ;;  %v9793_v0 = vpop.f32.mrf.mxu0  ;;  %v3221_v21 = vmul.f32 %v7857_v26, %v9736_v51  ;;  %vm3226_vm9 = vweird.f32 %v7857_v26 }
 0x1b5   : > { %v9798_v55 = vadd.f32 %v9587_v5, %v3178_v48  ;;  %v3177_v1 = vadd.f32 %v3119_v18, %v2956_v62  ;;  %v9809_v23 = vpop.eup %7858  ;;  %v3244_v13 = vand.u32 2147483647, %v9779_v40  ;;  %v3246_v38 = vand.u32 2147483648, %v9779_v40 }
 0x1b6   : > { %v9812_v35 = vadd.f32 %v9587_v5, %v3179_v61  ;;  %v3222_v33 = vsub.f32 1.0, %v3221_v21  ;;  %v9859_v50 = vmul.f32 %v9809_v23, %v9738_v54  ;;  %vm3240_vm13 = vweird.f32 %v9779_v40 }
 0x1b7   : > { %v7861_v34 = vpop.eup %7860  ;;  %v7497_v56 = vmul.f32 -1.442695, %v9798_v55  ;;  %v9827_v36 = vadd.f32 %v9587_v5, %v3177_v1  ;;  %7628 = vmatmul.msk.f32.vlgmr.msrb.gmra.mxu1 %vm3366_vm2, %v4831_v49  ;;  %vm3225_vm2 = vweird.f32 %v9736_v51  ;;  %v2271_v51 = vor.u32 1.1754944e-38, %v2270_v39 }
 0x1b8   : > { %v7863_v37 = vpop.eup %7862  ;;  %v9834_v24 = vadd.f32 1.0, %v7861_v34  ;;  %v3223_v22 = vmul.f32 %v7857_v26, %v3222_v33  ;;  %v7498_v63 = vmul.f32 -1.442695, %v9812_v35  ;;  %vm3227_vm11 = vmor %vm3225_vm2, %vm3226_vm9  ;;  %v2291_v61 = vsub.f32 1.0, %v9859_v50 }
 0x1b9   : > { %v7865_v11 = vpop.eup %7864  ;;  %v9837_v41 = vadd.f32 1.0, %v7863_v37  ;;  %7868 = vpow2.f32 %v7497_v56  ;;  %v7496_v46 = vmul.f32 -1.442695, %v9827_v36  ;;  %v2272_v10 = vsel %vm9820_vm8, %v2271_v51, %v2267_v31 }
 0x1ba   : > { %v7867_v43 = vpop.eup %7866  ;;  %7870 = vrcp.f32 %v9834_v24  ;;  %v9842_v59 = vadd.f32 1.0, %v7865_v11  ;;  %v3224_v47 = vadd.f32 %v7857_v26, %v3223_v22  ;;  %v2309_v49 = vmul.f32 %v2272_v10, %v9615_v14 }
 0x1bb   : > { %7872 = vrcp.f32 %v9837_v41  ;;  %v9846_v44 = vpop.f32.mrf.mxu2  ;;  %v9848_v53 = vpop.f32.mrf.mxu3  ;;  %v3236_v42 = vmul.f32 %v7867_v43, %v9779_v40  ;;  %vm3241_vm12 = vweird.f32 %v7867_v43  ;;  %vm3245_vm10 = vcmp.eq.f32.partialorder %v3244_v13, 8.507059e+37 }
 0x1bc   : > { %7874 = vrcp.f32 %v9842_v59  ;;  %v9853_v3 = vpop.f32.mrf.mxu1  ;;  %v9855_v6 = vpop.f32.mrf.mxu0  ;;  %v3228_v27 = vsel %vm3227_vm11, %v7857_v26, %v3224_v47  ;;  %vm9882_vm14 = vmor %vm3240_vm13, %vm3241_vm12  ;;  %v3247_v9 = vor.u32 1.1754944e-38, %v3246_v38  ;;  %v3259_v39 = vand.u32 2147483647, %v9834_v24 }
 0x1bd   : > { %7876 = vpow2.f32 %v7498_v63  ;;  %v3233_v4 = vsel %vm3230_vm0, %v3232_v28, %v3228_v27  ;;  %v3237_v52 = vsub.f32 1.0, %v3236_v42  ;;  %v3261_v60 = vand.u32 2147483648, %v9834_v24 }
 0x1be   : > { %7878 = vpow2.f32 %v7496_v46  ;;  %v3340_v12 = vmul.f32 %v3233_v4, %v9689_v16  ;;  %vm3255_vm3 = vweird.f32 %v9834_v24  ;;  %v3291_v42 = vand.u32 2147483648, %v9842_v59 }
 0x1bf   : > { %v7869_v62 = vpop.eup %7868  ;;  %v3238_v26 = vmul.f32 %v7867_v43, %v3237_v52  ;;  %vm3260_vm7 = vcmp.eq.f32.partialorder %v3259_v39, 8.507059e+37  ;;  %vm3285_vm8 = vweird.f32 %v9842_v59  ;;  %vm3270_vm9 = vweird.f32 %v9837_v41 }
 0x1c0   : > { %v7871_v48 = vpop.eup %7870  ;;  %v9866_v45 = vadd.f32 1.0, %v7869_v62  ;;  %5289 = vrot.lane.b32.xlu0 %v3340_v12, %s8022_s21  ;;  %v3274_v38 = vand.u32 2147483647, %v9837_v41 }
 0x1c1   : > { %v9874_v16 = vpop.eup %7872  ;;  %v3239_v18 = vadd.f32 %v7867_v43, %v3238_v26  ;;  %v3251_v21 = vmul.f32 %v7871_v48, %v9834_v24  ;;  %vm3256_vm15 = vweird.f32 %v7871_v48  ;;  %v3289_v24 = vand.u32 2147483647, %v9842_v59 }
 0x1c2   : > { %v9879_v1 = vpop.eup %7874  ;;  %7880 = vrcp.f32 %v9866_v45  ;;  %v3266_v2 = vmul.f32 %v9874_v16, %v9837_v41  ;;  %vm3257_vm4 = vmor %vm3255_vm3, %vm3256_vm15  ;;  %vm3271_vm11 = vweird.f32 %v9874_v16  ;;  %vm3275_vm15 = vcmp.eq.f32.partialorder %v3274_v38, 8.507059e+37 }
 0x1c3   : > { %v7877_v29 = vpop.eup %7876  ;;  %v9888_v25 = vpop.f32.mrf.mxu2  ;;  %v3243_v14 = vsel %vm9882_vm14, %v7867_v43, %v3239_v18  ;;  %v3252_v17 = vsub.f32 1.0, %v3251_v21  ;;  %v3281_v34 = vmul.f32 %v9879_v1, %v9842_v59  ;;  %vm3286_vm5 = vweird.f32 %v9879_v1  ;;  %vm9945_vm13 = vmor %vm3270_vm9, %vm3271_vm11 }
 0x1c4   : > { %v9890_v40 = vpop.f32.mrf.mxu3  ;;  %v7879_v56 = vpop.eup %7878  ;;  %v9897_v15 = vadd.f32 1.0, %v7877_v29  ;;  %v3248_v22 = vsel %vm3245_vm10, %v3247_v9, %v3243_v14  ;;  %v3267_v11 = vsub.f32 1.0, %v3266_v2  ;;  %vm3287_vm2 = vmor %vm3285_vm8, %vm3286_vm5  ;;  %v3292_v18 = vor.u32 1.1754944e-38, %v3291_v42 }
 0x1c5   : > { %v9899_v31 = vpop.f32.mrf.mxu1  ;;  %v9901_v37 = vpop.f32.mrf.mxu0  ;;  %v9904_v63 = vadd.f32 1.0, %v7879_v56  ;;  %v3341_v43 = vmul.f32 %v3248_v22, %v9720_v7  ;;  %v3253_v46 = vmul.f32 %v7871_v48, %v3252_v17  ;;  %v3282_v47 = vsub.f32 1.0, %v3281_v34 }
 0x1c6   : > { %7882 = vrcp.f32 %v9897_v15  ;;  %v3268_v51 = vmul.f32 %v9874_v16, %v3267_v11  ;;  %v3262_v7 = vor.u32 1.1754944e-38, %v3261_v60  ;;  %vm3290_vm0 = vcmp.eq.f32.partialorder %v3289_v24, 8.507059e+37 }
 0x1c7   : > { %7884 = vrcp.f32 %v9904_v63  ;;  %5291 = vrot.lane.b32.xlu2 %v3341_v43, %s8022_s21  ;;  %v3254_v28 = vadd.f32 %v7871_v48, %v3253_v46  ;;  %v3283_v4 = vmul.f32 %v9879_v1, %v3282_v47  ;;  %v3276_v2 = vand.u32 2147483648, %v9837_v41 }
 0x1c8   : > { %v7881_v27 = vpop.eup %7880  ;;  %5258 = vrot.lane.b32.xlu0 %v2309_v49, %s8021_s20  ;;  %v3321_v29 = vand.u32 2147483648, %v9866_v45  ;;  %v1275_v22 = vmul.f32 %v9871_v8, %v9590_v20  ;;  %v3319_v60 = vand.u32 2147483647, %v9866_v45  ;;  %vm3315_vm14 = vweird.f32 %v9866_v45 }
 0x1c9   : > { %v3258_v52 = vsel %vm3257_vm4, %v7871_v48, %v3254_v28  ;;  %v3311_v10 = vmul.f32 %v7881_v27, %v9866_v45  ;;  %v3284_v13 = vadd.f32 %v9879_v1, %v3283_v4  ;;  %v3269_v48 = vadd.f32 %v9874_v16, %v3268_v51 }
 0x1ca   : > { %v3263_v12 = vsel %vm3260_vm7, %v3262_v7, %v3258_v52  ;;  %vm3316_vm12 = vweird.f32 %v7881_v27  ;;  %v3277_v8 = vor.u32 1.1754944e-38, %v3276_v2  ;;  %v3322_v45 = vor.u32 1.1754944e-38, %v3321_v29 }
 0x1cb   : > { %v9922_v62 = vpop.f32.mrf.mxu2  ;;  %v3312_v59 = vsub.f32 1.0, %v3311_v10  ;;  %v3288_v9 = vsel %vm3287_vm2, %v9879_v1, %v3284_v13  ;;  %v3342_v17 = vmul.f32 %v3263_v12, %v9744_v57  ;;  %vm3317_vm10 = vmor %vm3315_vm14, %vm3316_vm12  ;;  %vm3320_vm3 = vcmp.eq.f32.partialorder %v3319_v60, 8.507059e+37 }
 0x1cc   : > { %v9924_v26 = vpop.f32.mrf.mxu3  ;;  %v9928_v49 = vpop.eup %7882  ;;  %v3293_v39 = vsel %vm3290_vm0, %v3292_v18, %v3288_v9  ;;  %vm2295_vm5 = vweird.f32 %v9809_v23  ;;  %vm3300_vm7 = vweird.f32 %v9904_v63  ;;  %v3304_v12 = vand.u32 2147483647, %v9904_v63 }
 0x1cd   : > { %v9930_v21 = vpop.f32.mrf.mxu1  ;;  %v9932_v33 = vpop.f32.mrf.mxu0  ;;  %v3313_v34 = vmul.f32 %v7881_v27, %v3312_v59  ;;  %v3344_v56 = vmul.f32 %v3293_v39, %v9762_v30  ;;  %v3273_v30 = vsel %vm9945_vm13, %v9874_v16, %v3269_v48  ;;  %v3326_v41 = vmul.f32 %v9928_v49, %v9897_v15 }
 0x1ce   : > { %v7885_v14 = vpop.eup %7884  ;;  %v2292_v16 = vmul.f32 %v9809_v23, %v2291_v61  ;;  %v3278_v47 = vsel %vm3275_vm15, %v3277_v8, %v3273_v30  ;;  %v3306_v61 = vand.u32 2147483648, %v9904_v63  ;;  %v2300_v13 = vand.u32 2147483648, %v9738_v54 }
 0x1cf   : > { %v3296_v57 = vmul.f32 %v7885_v14, %v9904_v63  ;;  %v5253_v11 = vpop.permute.xlu2 %5252  ;;  %5293 = vrot.lane.b32.xlu2 %v3342_v17, %s8022_s21  ;;  %v3314_v20 = vadd.f32 %v7881_v27, %v3313_v34  ;;  %5297 = vrot.lane.b32.xlu1 %v3344_v56, %s8022_s21  ;;  %vm3301_vm4 = vweird.f32 %v7885_v14  ;;  %v3327_v4 = vsub.f32 1.0, %v3326_v41 }
 0x1d0   : > { %5275 = vst.msk [vmem:[#allocation2 + $0xc] sm:$0x3] %vm5272_vm1, %v5253_v11  ;;  %5220 = vrot.lane.b32.xlu0 %v1275_v22, %s8019_s17  ;;  %v3343_v10 = vmul.f32 %v3278_v47, %v9750_v58  ;;  %vm3302_vm8 = vmor %vm3300_vm7, %vm3301_vm4  ;;  %vm2294_vm9 = vweird.f32 %v9738_v54  ;;  %v2298_v18 = vand.u32 2147483647, %v9738_v54  ;;  %v3307_v58 = vor.u32 1.1754944e-38, %v3306_v61 }
 0x1d1   : > { %v3297_v43 = vsub.f32 1.0, %v3296_v57  ;;  %v3318_v46 = vsel %vm3317_vm10, %v7881_v27, %v3314_v20  ;;  %v2293_v27 = vadd.f32 %v9809_v23, %v2292_v16  ;;  %vm2296_vm2 = vmor %vm2294_vm9, %vm2295_vm5  ;;  %v3328_v59 = vmul.f32 %v9928_v49, %v3327_v4 }
 0x1d2   : > { %v3323_v7 = vsel %vm3320_vm3, %v3322_v45, %v3318_v46  ;;  %vm3305_vm11 = vcmp.eq.f32.partialorder %v3304_v12, 8.507059e+37  ;;  %v2301_v9 = vor.u32 1.1754944e-38, %v2300_v13  ;;  %vm2299_vm0 = vcmp.eq.f32.partialorder %v2298_v18, 8.507059e+37 }
 0x1d3   : > { %v3298_v28 = vmul.f32 %v7885_v14, %v3297_v43  ;;  %v9965_v42 = vpop.f32.mrf.mxu2  ;;  %v3346_v38 = vmul.f32 %v3323_v7, %v9798_v55  ;;  %v2297_v63 = vsel %vm2296_vm2, %v9809_v23, %v2293_v27  ;;  %v3329_v54 = vadd.f32 %v9928_v49, %v3328_v59 }
 0x1d4   : > { %v9967_v51 = vpop.f32.mrf.mxu3  ;;  %v2302_v17 = vsel %vm2299_vm0, %v2301_v9, %v2297_v63  ;;  %vm3331_vm12 = vweird.f32 %v9928_v49  ;;  %v3336_v23 = vand.u32 2147483648, %v9897_v15  ;;  %vm3330_vm13 = vweird.f32 %v9897_v15 }
 0x1d5   : > { %v9969_v24 = vpop.f32.mrf.mxu1  ;;  %v9971_v52 = vpop.f32.mrf.mxu0  ;;  %v3299_v50 = vadd.f32 %v7885_v14, %v3298_v28  ;;  %v3334_v22 = vand.u32 2147483647, %v9897_v15  ;;  %v2311_v1 = vmul.f32 %v2302_v17, %v9676_v32  ;;  %vm3332_vm14 = vmor %vm3330_vm13, %vm3331_vm12  ;;  %vm5313_vm15 = vcmask 124000  }
 0x1d6   : > { %v3333_v60 = vsel %vm3332_vm14, %v9928_v49, %v3329_v54  ;;  %v3337_v57 = vor.u32 1.1754944e-38, %v3336_v23  ;;  %v3581_v54 = vadd.f32 %v9901_v37, %v9793_v0  ;;  %v3681_v37 = vadd.f32 %v9932_v33, %v9855_v6 }
 0x1d7   : > { %5295 = vrot.lane.b32.xlu2 %v3343_v10, %s8022_s21  ;;  %v3303_v48 = vsel %vm3302_vm8, %v7885_v14, %v3299_v50  ;;  %5301 = vrot.lane.b32.xlu1 %v3346_v38, %s8022_s21  ;;  %vm3335_vm10 = vcmp.eq.f32.partialorder %v3334_v22, 8.507059e+37  ;;  %vm5322_vm4 = vcmask 25600   ;;  %vm5345_vm13 = vcmask 130048  }
 0x1d8   : > { %v3308_v2 = vsel %vm3305_vm11, %v3307_v58, %v3303_v48  ;;  %v3338_v11 = vsel %vm3335_vm10, %v3337_v57, %v3333_v60 }
 0x1d9   : > { %v3345_v56 = vmul.f32 %v3308_v2, %v9827_v36  ;;  %v3347_v15 = vmul.f32 %v3338_v11, %v9812_v35  ;;  %v3631_v11 = vadd.f32 %v9922_v62, %v9846_v44 }
 0x1db   : > { %v5261_v55 = vpop.permute.xlu2 %5260  ;;  %v9987_v29 = vpop.f32.mrf.mxu2 }
 0x1dc   : > { %5279 = vst.msk [vmem:[#allocation2 + $0x1c] sm:$0x3] %vm5272_vm1, %v5261_v55  ;;  %v9992_v14 = vpop.f32.mrf.mxu3  ;;  %v3972_v0 = vadd.f32 %v9987_v29, %v3631_v11 }
 0x1dd   : > { %v9994_v39 = vpop.f32.mrf.mxu1  ;;  %v9997_v34 = vpop.f32.mrf.mxu0 }
 0x1df   : > { %5299 = vrot.lane.b32.xlu2 %v3345_v56, %s8022_s21  ;;  %5262 = vrot.lane.b32.xlu1 %v2311_v1, %s8021_s20  ;;  %v3970_v1 = vadd.f32 %v9971_v52, %v3581_v54  ;;  %s7193_s20 = scalar_lea.hbm %s10569_s7, %s7736_s16 }
 0x1e3   : > { %v10006_v30 = vpop.f32.mrf.mxu2 }
 0x1e4   : > { %v10008_v20 = vpop.f32.mrf.mxu3 }
 0x1e5   : > { %v10010_v36 = vpop.f32.mrf.mxu1  ;;  %v4010_v41 = vpop.f32.mrf.mxu0 }
 0x1e6   : > { %v4174_v57 = vadd.f32 %v4010_v41, %v3970_v1 }
 0x1e7   : > { %5303 = vrot.lane.b32.xlu2 %v3347_v15, %s8022_s21  ;;  %v3656_v15 = vadd.f32 %v9924_v26, %v9848_v53 }
 0x1e8   : > { %v5255_v32 = vpop.permute.xlu0 %5254 }
 0x1e9   : > { %5276 = vst.msk [vmem:[#allocation2 + $0x10] sm:$0x3] %vm5272_vm1, %v5255_v32  ;;  %v5251_v49 = vpop.permute.xlu1 %5250  ;;  %v3606_v32 = vadd.f32 %v9930_v21, %v9853_v3  ;;  %v3973_v52 = vadd.f32 %v9992_v14, %v3656_v15  ;;  %v3974_v3 = vadd.f32 %v9997_v34, %v3681_v37 }
 0x1ea   : > { %5274 = vst.msk [vmem:[#allocation2 + $0x8] sm:$0x3] %vm5272_vm1, %v5251_v49 }
 0x1eb   : > { %v4056_v8 = vpop.f32.mrf.mxu2  ;;  %v3971_v41 = vadd.f32 %v9994_v39, %v3606_v32  ;;  %v3731_v39 = vadd.f32 %v9965_v42, %v9888_v25 }
 0x1ec   : > { %v4079_v43 = vpop.f32.mrf.mxu3 }
 0x1ed   : > { %v4033_v16 = vpop.f32.mrf.mxu1  ;;  %v4102_v46 = vpop.f32.mrf.mxu0  ;;  %v4177_v21 = vadd.f32 %v4079_v43, %v3973_v52  ;;  %v3756_v43 = vadd.f32 %v9967_v51, %v9890_v40 }
 0x1ee   : > { %v4175_v29 = vadd.f32 %v4033_v16, %v3971_v41  ;;  %v3976_v16 = vadd.f32 %v10006_v30, %v3731_v39 }
 0x1f1   : > { %v5249_v45 = vpop.permute.xlu1 %5248 }
 0x1f2   : > { %5273 = vst.msk [vmem:[#allocation2 + $0x4] sm:$0x3] %vm5272_vm1, %v5249_v45 }
 0x1f3   : > { %v10017_v47 = vpop.f32.mrf.mxu2 }
 0x1f4   : > { %v10019_v28 = vpop.f32.mrf.mxu3 }
 0x1f5   : > { %v10021_v35 = vpop.f32.mrf.mxu1 }
 0x1f6   : > { %v4216_v7 = vpop.f32.mrf.mxu0 }
 0x1f7   : > { %v4394_v49 = vadd.f32 %v4216_v7, %v4174_v57  ;;  %v4178_v57 = vadd.f32 %v4102_v46, %v3974_v3 }
 0x1f9   : > { %v5257_v4 = vpop.permute.xlu1 %5256 }
 0x1fa   : > { %5277 = vst.msk [vmem:[#allocation2 + $0x14] sm:$0x3] %vm5272_vm1, %v5257_v4  ;;  %v4176_v4 = vadd.f32 %v4056_v8, %v3972_v0 }
 0x1fb   : > { %v4266_v50 = vpop.f32.mrf.mxu2 }
 0x1fc   : > { %v4291_v61 = vpop.f32.mrf.mxu3  ;;  %v4396_v54 = vadd.f32 %v4266_v50, %v4176_v4 }
 0x1fd   : > { %v4241_v27 = vpop.f32.mrf.mxu1  ;;  %v4397_v6 = vadd.f32 %v4291_v61, %v4177_v21 }
 0x1fe   : > { %v4316_v10 = vpop.f32.mrf.mxu0  ;;  %v4395_v33 = vadd.f32 %v4241_v27, %v4175_v29 }
 0x1ff   : > { %v4398_v8 = vadd.f32 %v4316_v10, %v4178_v57  ;;  %v3706_v10 = vadd.f32 %v9969_v24, %v9899_v31 }
 0x203   : > { %v10024_v12 = vpop.f32.mrf.mxu2 }
 0x204   : > { %v10026_v13 = vpop.f32.mrf.mxu3 }
 0x205   : > { %v10028_v38 = vpop.f32.mrf.mxu1 }
 0x206   : > { %v4434_v18 = vpop.f32.mrf.mxu0 }
 0x207   : > { %v4598_v44 = vadd.f32 %v4434_v18, %v4394_v49 }
 0x20b   : > { %v4480_v48 = vpop.f32.mrf.mxu2 }
 0x20c   : > { %v4503_v59 = vpop.f32.mrf.mxu3  ;;  %v4600_v18 = vadd.f32 %v4480_v48, %v4396_v54  ;;  %v3977_v48 = vadd.f32 %v10008_v20, %v3756_v43 }
 0x20d   : > { %v4457_v58 = vpop.f32.mrf.mxu1  ;;  %v4601_v11 = vadd.f32 %v4503_v59, %v4397_v6  ;;  %v4180_v59 = vadd.f32 %v10017_v47, %v3976_v16 }
 0x20e   : > { %v4526_v63 = vpop.f32.mrf.mxu0  ;;  %v4599_v15 = vadd.f32 %v4457_v58, %v4395_v33  ;;  %v4181_v31 = vadd.f32 %v10019_v28, %v3977_v48 }
 0x20f   : > { %v4602_v50 = vadd.f32 %v4526_v63, %v4398_v8  ;;  %v3975_v63 = vadd.f32 %v10010_v36, %v3706_v10  ;;  %v5823_v10 = vld [vmem:[#allocation2] sm:$0x3] }
 0x210   : > { %5927 = vrot.lane.b32.xlu2 %v5823_v10, %s8023_s8 }
 0x213   : > { %v10030_v9 = vpop.f32.mrf.mxu2 }
 0x214   : > { %v10032_v2 = vpop.f32.mrf.mxu3 }
 0x215   : > { %v10034_v55 = vpop.f32.mrf.mxu1 }
 0x216   : > { %v4640_v17 = vpop.f32.mrf.mxu0 }
 0x217   : > { %v4818_v7 = vadd.f32 %v4640_v17, %v4598_v44 }
 0x21b   : > { %v4690_v23 = vpop.f32.mrf.mxu2 }
 0x21c   : > { %v4715_v56 = vpop.f32.mrf.mxu3  ;;  %v4820_v46 = vadd.f32 %v4690_v23, %v4600_v18 }
 0x21d   : > { %v4665_v22 = vpop.f32.mrf.mxu1  ;;  %v4821_v61 = vadd.f32 %v4715_v56, %v4601_v11  ;;  %v4400_v56 = vadd.f32 %v10024_v12, %v4180_v59  ;;  %v4401_v12 = vadd.f32 %v10026_v13, %v4181_v31 }
 0x21e   : > { %v4740_v60 = vpop.f32.mrf.mxu0  ;;  %v4819_v27 = vadd.f32 %v4665_v22, %v4599_v15 }
 0x21f   : > { %v4822_v30 = vadd.f32 %v4740_v60, %v4602_v50  ;;  %v4179_v60 = vadd.f32 %v10021_v35, %v3975_v63  ;;  %v4605_v4 = vadd.f32 %v10032_v2, %v4401_v12  ;;  %v7951_v2 = vld [vmem:[%s10564_s2] ss:$0 sm:$0xff] }
 0x220   : > { %v10272_v12 = vld [vmem:[%s10565_s3 + $0x20] sm:$0xff] }
 0x221   : > { %v5292_v45 = vpop.permute.xlu2 %5291  ;;  %v4399_v41 = vadd.f32 %v10028_v38, %v4179_v60 }
 0x222   : > { %5315 = vst.msk [vmem:[#allocation2 + $0x8] sm:$0x3] %vm5313_vm15, %v5292_v45  ;;  %v4604_v45 = vadd.f32 %v10030_v9, %v4400_v56 }
 0x223   : > { %v4790_v62 = vpop.f32.mrf.mxu2 }
 0x224   : > { %v10051_v53 = vpop.f32.mrf.mxu3  ;;  %v4824_v44 = vadd.f32 %v4790_v62, %v4604_v45 }
 0x225   : > { %v10053_v26 = vpop.f32.mrf.mxu1  ;;  %v4825_v29 = vadd.f32 %v10051_v53, %v4605_v4 }
 0x226   : > { %v4858_v1 = vpop.f32.mrf.mxu0 }
 0x227   : > { %v5022_v14 = vadd.f32 %v4858_v1, %v4818_v7 }
 0x229   : > { %v10059_v32 = vadd.f32 %v9587_v5, %v5022_v14  ;;  %v5294_v34 = vpop.permute.xlu2 %5293 }
 0x22a   : > { %5316 = vst.msk [vmem:[#allocation2 + $0xc] sm:$0x3] %vm5313_vm15, %v5294_v34  ;;  %v10119_v34 = vld [vmem:[%s10565_s3 + $0x18] sm:$0xff] }
 0x22b   : > { %v7633_v25 = vmul.f32 -1.442695, %v10059_v32  ;;  %v4904_v42 = vpop.f32.mrf.mxu2  ;;  %5363 = vmatpush.msra.mxu0 %v10119_v34  ;;  %5386 = vmatpush.msra.mxu1 %v10119_v34 }
 0x22c   : > { %v5024_v58 = vadd.f32 %v4904_v42, %v4820_v46  ;;  %v4927_v40 = vpop.f32.mrf.mxu3  ;;  %5409 = vmatpush.msra.mxu2 %v10119_v34  ;;  %5432 = vmatpush.msra.mxu3 %v10119_v34 }
 0x22d   : > { %v4881_v51 = vpop.f32.mrf.mxu1  ;;  %7886 = vpow2.f32 %v7633_v25  ;;  %v5025_v17 = vadd.f32 %v4927_v40, %v4821_v61  ;;  %v10135_v61 = vld [vmem:[%s10565_s3 + $0x10] sm:$0xff] }
 0x22e   : > { %v5023_v23 = vadd.f32 %v4881_v51, %v4819_v27  ;;  %v10073_v22 = vadd.f32 %v9587_v5, %v5024_v58  ;;  %v4950_v49 = vpop.f32.mrf.mxu0  ;;  %5364 = vmatpush.msra.mxu0 %v10135_v61  ;;  %5387 = vmatpush.msra.mxu1 %v10135_v61 }
 0x22f   : > { %v10077_v24 = vadd.f32 %v9587_v5, %v5025_v17  ;;  %v5026_v47 = vadd.f32 %v4950_v49, %v4822_v30  ;;  %5410 = vmatpush.msra.mxu2 %v10135_v61  ;;  %5433 = vmatpush.msra.mxu3 %v10135_v61 }
 0x230   : > { %v10080_v20 = vadd.f32 %v9587_v5, %v5023_v23  ;;  %v7635_v36 = vmul.f32 -1.442695, %v10073_v22 }
 0x231   : > { %v7636_v0 = vmul.f32 -1.442695, %v10077_v24  ;;  %v10089_v28 = vadd.f32 %v9587_v5, %v5026_v47  ;;  %v5296_v52 = vpop.permute.xlu2 %5295  ;;  %v4603_v5 = vadd.f32 %v10034_v55, %v4399_v41 }
 0x232   : > { %v7634_v37 = vmul.f32 -1.442695, %v10080_v20  ;;  %7888 = vpow2.f32 %v7635_v36  ;;  %5317 = vst.msk [vmem:[#allocation2 + $0x10] sm:$0x3] %vm5313_vm15, %v5296_v52  ;;  %v5290_v35 = vpop.permute.xlu0 %5289 }
 0x233   : > { %v7887_v9 = vpop.eup %7886  ;;  %7890 = vpow2.f32 %v7636_v0  ;;  %v7637_v13 = vmul.f32 -1.442695, %v10089_v28  ;;  %5314 = vst.msk [vmem:[#allocation2 + $0x4] sm:$0x3] %vm5313_vm15, %v5290_v35  ;;  %v4996_v3 = vpop.f32.mrf.mxu2  ;;  %v4823_v54 = vadd.f32 %v10053_v26, %v4603_v5  ;;  %v10206_v5 = vld [vmem:[%s10565_s3] sm:$0xff] }
 0x234   : > { %v10097_v21 = vadd.f32 1.0, %v7887_v9  ;;  %7892 = vpow2.f32 %v7634_v37  ;;  %v5028_v38 = vadd.f32 %v4996_v3, %v4824_v44  ;;  %v5019_v62 = vpop.f32.mrf.mxu3  ;;  %v10183_v37 = vld [vmem:[%s10565_s3 + $0x8] sm:$0xff] }
 0x235   : > { %7894 = vpow2.f32 %v7637_v13  ;;  %v4973_v7 = vpop.f32.mrf.mxu1  ;;  %v5029_v55 = vadd.f32 %v5019_v62, %v4825_v29  ;;  %5455 = vmatpush.msrb.mxu0 %v10183_v37  ;;  %5478 = vmatpush.msrb.mxu1 %v10183_v37 }
 0x236   : > { %7896 = vrcp.f32 %v10097_v21  ;;  %v10105_v1 = vadd.f32 %v7951_v2, %v5028_v38  ;;  %v5027_v6 = vadd.f32 %v4973_v7, %v4823_v54  ;;  %v5079_v50 = vand.u32 2147483647, %v10097_v21  ;;  %5501 = vmatpush.msrb.mxu2 %v10183_v37  ;;  %5524 = vmatpush.msrb.mxu3 %v10183_v37 }
 0x237   : > { %v10113_v15 = vadd.f32 %v7951_v2, %v5029_v55  ;;  %vm5075_vm3 = vweird.f32 %v10097_v21  ;;  %v5081_v27 = vand.u32 2147483648, %v10097_v21  ;;  %5456 = vmatpush.msrb.mxu0 %v10206_v5  ;;  %5479 = vmatpush.msrb.mxu1 %v10206_v5 }
 0x238   : > { %v7889_v57 = vpop.eup %7888  ;;  %v7639_v11 = vmul.f32 -1.442695, %v10105_v1  ;;  %v10124_v16 = vadd.f32 %v7951_v2, %v5027_v6  ;;  %vm10164_vm7 = vcmp.eq.f32.partialorder %v5079_v50, 8.507059e+37  ;;  %5502 = vmatpush.msrb.mxu2 %v10206_v5  ;;  %5525 = vmatpush.msrb.mxu3 %v10206_v5 }
 0x239   : > { %v7891_v33 = vpop.eup %7890  ;;  %v10107_v14 = vadd.f32 1.0, %v7889_v57  ;;  %v5300_v39 = vpop.permute.xlu2 %5299  ;;  %v7640_v58 = vmul.f32 -1.442695, %v10113_v15  ;;  %v5082_v31 = vor.u32 1.1754944e-38, %v5081_v27 }
 0x23a   : > { %v7893_v53 = vpop.eup %7892  ;;  %v10109_v18 = vadd.f32 1.0, %v7891_v33  ;;  %v5259_v8 = vpop.permute.xlu0 %5258  ;;  %v7638_v30 = vmul.f32 -1.442695, %v10124_v16 }
 0x23b   : > { %v7895_v26 = vpop.eup %7894  ;;  %7898 = vrcp.f32 %v10107_v14  ;;  %5278 = vst.msk [vmem:[#allocation2 + $0x18] sm:$0x3] %vm5272_vm1, %v5259_v8  ;;  %v10141_v25 = vadd.f32 1.0, %v7893_v53  ;;  %v5109_v59 = vand.u32 2147483647, %v10107_v14  ;;  %v5111_v40 = vand.u32 2147483648, %v10107_v14 }
 0x23c   : > { %v10121_v43 = vpop.eup %7896  ;;  %7900 = vrcp.f32 %v10109_v18  ;;  %5319 = vst.msk [vmem:[#allocation2 + $0x18] sm:$0x3] %vm5313_vm15, %v5300_v39  ;;  %v10143_v42 = vadd.f32 1.0, %v7895_v26  ;;  %v5124_v51 = vand.u32 2147483647, %v10109_v18  ;;  %v5126_v63 = vand.u32 2147483648, %v10109_v18 }
 0x23d   : > { %v5071_v46 = vmul.f32 %v10121_v43, %v10097_v21  ;;  %7902 = vpow2.f32 %v7639_v11  ;;  %vm5076_vm5 = vweird.f32 %v10121_v43  ;;  %vm5105_vm8 = vweird.f32 %v10107_v14 }
 0x23e   : > { %7904 = vrcp.f32 %v10141_v25  ;;  %vm10172_vm9 = vcmp.eq.f32.partialorder %v5109_v59, 8.507059e+37  ;;  %vm5120_vm2 = vweird.f32 %v10109_v18  ;;  %vm10189_vm11 = vmor %vm5075_vm3, %vm5076_vm5  ;;  %v5112_v44 = vor.u32 1.1754944e-38, %v5111_v40 }
 0x23f   : > { %v5072_v48 = vsub.f32 1.0, %v5071_v46  ;;  %7906 = vrcp.f32 %v10143_v42  ;;  %vm10193_vm0 = vcmp.eq.f32.partialorder %v5124_v51, 8.507059e+37  ;;  %v5127_v3 = vor.u32 1.1754944e-38, %v5126_v63 }
 0x240   : > { %7908 = vpow2.f32 %v7640_v58  ;;  %vm5090_vm10 = vweird.f32 %v10141_v25  ;;  %v5094_v39 = vand.u32 2147483647, %v10141_v25  ;;  %v5096_v53 = vand.u32 2147483648, %v10141_v25 }
 0x241   : > { %v10156_v17 = vpop.eup %7898  ;;  %v5073_v23 = vmul.f32 %v10121_v43, %v5072_v48  ;;  %v5298_v60 = vpop.permute.xlu1 %5297  ;;  %7910 = vpow2.f32 %v7638_v30 }
 0x242   : > { %v10162_v56 = vpop.eup %7900  ;;  %v5101_v47 = vmul.f32 %v10156_v17, %v10107_v14  ;;  %v5221_v45 = vpop.permute.xlu0 %5220  ;;  %5318 = vst.msk [vmem:[#allocation2 + $0x14] sm:$0x3] %vm5313_vm15, %v5298_v60  ;;  %vm5106_vm12 = vweird.f32 %v10156_v17  ;;  %v5139_v14 = vand.u32 2147483647, %v10143_v42 }
 0x243   : > { %v5074_v36 = vadd.f32 %v10121_v43, %v5073_v23  ;;  %v5116_v0 = vmul.f32 %v10162_v56, %v10109_v18  ;;  %5239 = vst.msk [vmem:[#allocation2 + $0x20] sm:$0x3] %vm5231_vm6, %v5221_v45  ;;  %v7903_v9 = vpop.eup %7902  ;;  %vm5121_vm14 = vweird.f32 %v10162_v56  ;;  %vm5107_vm3 = vmor %vm5105_vm8, %vm5106_vm12 }
 0x244   : > { %v5102_v41 = vsub.f32 1.0, %v5101_v47  ;;  %v7905_v21 = vpop.eup %7904  ;;  %v10214_v29 = vadd.f32 1.0, %v7903_v9  ;;  %vm5122_vm5 = vmor %vm5120_vm2, %vm5121_vm14  ;;  %vm5135_vm2 = vweird.f32 %v10143_v42  ;;  %vm5140_vm12 = vcmp.eq.f32.partialorder %v5139_v14, 8.507059e+37 }
 0x245   : > { %v5078_v4 = vsel %vm10189_vm11, %v10121_v43, %v5074_v36  ;;  %v5117_v13 = vsub.f32 1.0, %v5116_v0  ;;  %v7907_v7 = vpop.eup %7906  ;;  %v5086_v55 = vmul.f32 %v7905_v21, %v10141_v25  ;;  %v5141_v43 = vand.u32 2147483648, %v10143_v42 }
 0x246   : > { %v5083_v38 = vsel %vm10164_vm7, %v5082_v31, %v5078_v4  ;;  %v5103_v62 = vmul.f32 %v10156_v17, %v5102_v41  ;;  %v5131_v6 = vmul.f32 %v7907_v7, %v10143_v42  ;;  %7912 = vrcp.f32 %v10214_v29  ;;  %v7909_v8 = vpop.eup %7908  ;;  %v10265_v42 = vld [vmem:[%s10565_s3 + $0x28] sm:$0xff] }
 0x247   : > { %v5190_v54 = vmul.f32 %v5083_v38, %v10059_v32  ;;  %v5118_v2 = vmul.f32 %v10162_v56, %v5117_v13  ;;  %v5087_v33 = vsub.f32 1.0, %v5086_v55  ;;  %v7911_v50 = vpop.eup %7910  ;;  %vm5091_vm7 = vweird.f32 %v7905_v21  ;;  %v5332_v13 = vld [vmem:[#allocation2] sm:$0x3] }
 0x248   : > { %v5104_v57 = vadd.f32 %v10156_v17, %v5103_v62  ;;  %v5132_v11 = vsub.f32 1.0, %v5131_v6  ;;  %vm5136_vm8 = vweird.f32 %v7907_v7  ;;  %v10252_v30 = vadd.f32 1.0, %v7909_v8 }
 0x249   : > { %v5119_v32 = vadd.f32 %v10162_v56, %v5118_v2  ;;  %5323 = vst.msk [vmem:[#allocation2 + $0x5] sm:$0x3] %vm5322_vm4, %v5190_v54  ;;  %v5302_v46 = vpop.permute.xlu1 %5301  ;;  %v5088_v48 = vmul.f32 %v7905_v21, %v5087_v33  ;;  %vm5095_vm11 = vcmp.eq.f32.partialorder %v5094_v39, 8.507059e+37  ;;  %v10257_v63 = vadd.f32 1.0, %v7911_v50 }
 0x24a   : > { %v5108_v26 = vsel %vm5107_vm3, %v10156_v17, %v5104_v57  ;;  %5320 = vst.msk [vmem:[#allocation2 + $0x1c] sm:$0x3] %vm5313_vm15, %v5302_v46  ;;  %v5133_v58 = vmul.f32 %v7907_v7, %v5132_v11  ;;  %v5142_v49 = vor.u32 1.1754944e-38, %v5141_v43  ;;  %7914 = vrcp.f32 %v10252_v30 }
 0x24b   : > { %v5113_v27 = vsel %vm10172_vm9, %v5112_v44, %v5108_v26  ;;  %v5123_v10 = vsel %vm5122_vm5, %v10162_v56, %v5119_v32  ;;  %v5089_v51 = vadd.f32 %v7905_v21, %v5088_v48  ;;  %vm5092_vm9 = vmor %vm5090_vm10, %vm5091_vm7  ;;  %v5171_v52 = vand.u32 2147483648, %v10214_v29  ;;  %v10302_v32 = vld [vmem:[%s10565_s3 + $0x30] sm:$0xff] }
 0x24c   : > { %v5192_v59 = vmul.f32 %v5113_v27, %v10073_v22  ;;  %v5128_v18 = vsel %vm10193_vm0, %v5127_v3, %v5123_v10  ;;  %v7913_v17 = vpop.eup %7912  ;;  %v5097_v22 = vor.u32 1.1754944e-38, %v5096_v53  ;;  %v5134_v23 = vadd.f32 %v7907_v7, %v5133_v58  ;;  %vm5137_vm0 = vmor %vm5135_vm2, %vm5136_vm8 }
 0x24d   : > { %v5193_v40 = vmul.f32 %v5128_v18, %v10077_v24  ;;  %v5093_v56 = vsel %vm5092_vm9, %v7905_v21, %v5089_v51  ;;  %v5161_v24 = vmul.f32 %v7913_v17, %v10214_v29  ;;  %7916 = vrcp.f32 %v10257_v63 }
 0x24e   : > { %5325 = vst.msk [vmem:[#allocation2 + $0xd] sm:$0x3] %vm5322_vm4, %v5192_v59  ;;  %v5098_v25 = vsel %vm5095_vm11, %v5097_v22, %v5093_v56  ;;  %v5138_v31 = vsel %vm5137_vm0, %v7907_v7, %v5134_v23  ;;  %vm5166_vm14 = vweird.f32 %v7913_v17  ;;  %v5169_v44 = vand.u32 2147483647, %v10214_v29 }
 0x24f   : > { %5326 = vst.msk [vmem:[#allocation2 + $0x11] sm:$0x3] %vm5322_vm4, %v5193_v40  ;;  %v5191_v60 = vmul.f32 %v5098_v25, %v10080_v20  ;;  %v5143_v45 = vsel %vm5140_vm12, %v5142_v49, %v5138_v31  ;;  %v5162_v36 = vsub.f32 1.0, %v5161_v24  ;;  %vm5165_vm10 = vweird.f32 %v10214_v29  ;;  %v10292_v29 = vld [vmem:[%s10565_s3 + $0x38] sm:$0xff] }
 0x250   : > { %v5338_v47 = vld [vmem:[#allocation2 + $0x4] sm:$0x3]  ;;  %v5194_v0 = vmul.f32 %v5143_v45, %v10089_v28  ;;  %v7915_v35 = vpop.eup %7914  ;;  %v5304_v28 = vpop.permute.xlu2 %5303  ;;  %vm5167_vm3 = vmor %vm5165_vm10, %vm5166_vm14  ;;  %v5172_v3 = vor.u32 1.1754944e-38, %v5171_v52  ;;  %vm5170_vm5 = vcmp.eq.f32.partialorder %v5169_v44, 8.507059e+37  ;;  %v5186_v57 = vand.u32 2147483648, %v10252_v30 }
 0x251   : > { %7643 = vmatmul.msk.f32.vlgmr.msra.gmra.mxu0 %vm5345_vm13, %v5338_v47  ;;  %v5263_v41 = vpop.permute.xlu1 %5262  ;;  %5324 = vst.msk [vmem:[#allocation2 + $0x9] sm:$0x3] %vm5322_vm4, %v5191_v60  ;;  %v5163_v20 = vmul.f32 %v7913_v17, %v5162_v36  ;;  %v5176_v21 = vmul.f32 %v7915_v35, %v10252_v30  ;;  %v5184_v39 = vand.u32 2147483647, %v10252_v30  ;;  %v5156_v11 = vand.u32 2147483648, %v10257_v63 }
 0x252   : > { %5554 = vmatpush.msra.mxu0 %v10265_v42  ;;  %5327 = vst.msk [vmem:[#allocation2 + $0x15] sm:$0x3] %vm5322_vm4, %v5194_v0  ;;  %v5187_v43 = vor.u32 1.1754944e-38, %v5186_v57  ;;  %v5154_v50 = vand.u32 2147483647, %v10257_v63  ;;  %vm5150_vm9 = vweird.f32 %v10257_v63  ;;  %vm5833_vm12 = vcmask 64512  }
 0x253   : > { %v5164_v9 = vadd.f32 %v7913_v17, %v5163_v20  ;;  %5280 = vst.msk [vmem:[#allocation2 + $0x20] sm:$0x3] %vm5272_vm1, %v5263_v41  ;;  %v7917_v7 = vpop.eup %7916  ;;  %v5177_v2 = vsub.f32 1.0, %v5176_v21  ;;  %vm5181_vm1 = vweird.f32 %v7915_v35  ;;  %vm5185_vm2 = vcmp.eq.f32.partialorder %v5184_v39, 8.507059e+37  ;;  %v6026_v49 = vld [vmem:[#allocation2 + $0x4] sm:$0x3] }
 0x254   : > { %5555 = vmatpush.msra.mxu0 %v10272_v12  ;;  %5321 = vst.msk [vmem:[#allocation2 + $0x20] sm:$0x3] %vm5313_vm15, %v5304_v28  ;;  %v5146_v6 = vmul.f32 %v7917_v7, %v10257_v63  ;;  %vm5180_vm15 = vweird.f32 %v10252_v30  ;;  %vm5151_vm8 = vweird.f32 %v7917_v7  ;;  %v5157_v58 = vor.u32 1.1754944e-38, %v5156_v11  ;;  %v5636_v44 = vld [vmem:[#allocation2 + $0x24] sm:$0x3] }
 0x255   : > { %v5339_v4 = vld [vmem:[#allocation2 + $0xc] sm:$0x3]  ;;  %v5168_v62 = vsel %vm5167_vm3, %v7913_v17, %v5164_v9  ;;  %v5178_v33 = vmul.f32 %v7915_v35, %v5177_v2  ;;  %vm5182_vm7 = vmor %vm5180_vm15, %vm5181_vm1  ;;  %vm5155_vm0 = vcmp.eq.f32.partialorder %v5154_v50, 8.507059e+37  ;;  %v10390_v50 = vld [vmem:[%s10566_s4] ss:$0 sm:$0xff] }
 0x256   : > { %7644 = vmatmul.msk.f32.vlgmr.msra.gmra.mxu1 %vm5345_vm13, %v5339_v4  ;;  %v5825_v38 = vld [vmem:[#allocation2 + $0x10] sm:$0x3]  ;;  %v5173_v54 = vsel %vm5170_vm5, %v5172_v3, %v5168_v62  ;;  %vm5152_vm11 = vmor %vm5150_vm9, %vm5151_vm8  ;;  %v6027_v22 = vld [vmem:[#allocation2 + $0xc] sm:$0x3] }
 0x257   : > { %5977 = vrot.lane.b32.xlu1 %v5825_v38, %s8023_s8  ;;  %5577 = vmatpush.msra.mxu1 %v10265_v42  ;;  %v5196_v55 = vmul.f32 %v5173_v54, %v10105_v1  ;;  %v5147_v1 = vsub.f32 1.0, %v5146_v6  ;;  %v5179_v26 = vadd.f32 %v7915_v35, %v5178_v33  ;;  %v6237_v23 = vld [vmem:[#allocation2 + $0x10] sm:$0x3]  ;;  %v6446_v36 = vld [vmem:[#allocation2 + $0xc] sm:$0x3] }
 0x258   : > { %v5824_v53 = vld [vmem:[#allocation2 + $0x8] sm:$0x3]  ;;  %v5334_v63 = vld [vmem:[#allocation2 + $0x10] sm:$0x3]  ;;  %v5828_v3 = vld [vmem:[#allocation2 + $0x1] sm:$0x3] }
 0x259   : > { %7647 = vmatmul.msk.f32.vlgmr.msrb.gmra.mxu0 %vm5345_vm13, %v5332_v13  ;;  %5578 = vmatpush.msra.mxu1 %v10272_v12  ;;  %5329 = vst.msk [vmem:[#allocation2 + $0x1d] sm:$0x3] %vm5322_vm4, %v5196_v55  ;;  %v6028_v8 = vld [vmem:[#allocation2 + $0x14] sm:$0x3]  ;;  %v5148_v46 = vmul.f32 %v7917_v7, %v5147_v1  ;;  %v5333_v27 = vld [vmem:[#allocation2 + $0x8] sm:$0x3]  ;;  %v5183_v10 = vsel %vm5182_vm7, %v7915_v35, %v5179_v26 }
 0x25a   : > { %5657 = vmatpush.msrb.mxu0 %v10292_v29  ;;  %5952 = vrot.lane.b32.xlu0 %v5824_v53, %s8023_s8  ;;  %v5340_v14 = vld [vmem:[#allocation2 + $0x14] sm:$0x3]  ;;  %v5188_v48 = vsel %vm5185_vm2, %v5187_v43, %v5183_v10  ;;  %v5530_v40 = vld [vmem:[#allocation2 + $0x8] sm:$0x3]  ;;  %v5531_v56 = vld [vmem:[#allocation2 + $0x10] sm:$0x3] }
 0x25b   : > { %6082 = vrot.lane.b32.xlu2 %v6028_v8, %s8023_s8  ;;  %7645 = vmatmul.msk.f32.vlgmr.msra.gmra.mxu2 %vm5345_vm13, %v5340_v14  ;;  %v5149_v59 = vadd.f32 %v7917_v7, %v5148_v46  ;;  %v5197_v18 = vmul.f32 %v5188_v48, %v10113_v15  ;;  %v5634_v60 = vld [vmem:[#allocation2 + $0x14] sm:$0x3]  ;;  %v5829_v20 = vld [vmem:[#allocation2 + $0x9] sm:$0x3]  ;;  %v5830_v28 = vld [vmem:[#allocation2 + $0x11] sm:$0x3] }
 0x25c   : > { %5658 = vmatpush.msrb.mxu0 %v10302_v32  ;;  %5600 = vmatpush.msra.mxu2 %v10265_v42  ;;  %v6447_v35 = vld [vmem:[#allocation2 + $0x14] sm:$0x3]  ;;  %v6236_v9 = vld [vmem:[#allocation2 + $0x8] sm:$0x3]  ;;  %v6136_v33 = vld [vmem:[#allocation2 + $0xd] sm:$0x3] }
 0x25d   : > { %v5153_v51 = vsel %vm5152_vm11, %v7917_v7, %v5149_v59  ;;  %5330 = vst.msk [vmem:[#allocation2 + $0x21] sm:$0x3] %vm5322_vm4, %v5197_v18  ;;  %v6137_v55 = vld [vmem:[#allocation2 + $0x15] sm:$0x3]  ;;  %v6135_v46 = vld [vmem:[#allocation2 + $0x5] sm:$0x3] }
 0x25e   : > { %7648 = vmatmul.msk.f32.vlgmr.msrb.gmra.mxu1 %vm5345_vm13, %v5333_v27  ;;  %5601 = vmatpush.msra.mxu2 %v10272_v12  ;;  %v5158_v30 = vsel %vm5155_vm0, %v5157_v58, %v5153_v51 }
 0x25f   : > { %5680 = vmatpush.msrb.mxu1 %v10292_v29  ;;  %v5195_v15 = vmul.f32 %v5158_v30, %v10124_v16  ;;  %v5633_v16 = vld [vmem:[#allocation2 + $0xc] sm:$0x3] }
 0x260   : > { %v5341_v17 = vld [vmem:[#allocation2 + $0x1c] sm:$0x3] }
 0x261   : > { %7653 = vmatmul.msk.f32.vlgmr.msra.gmra.mxu0 %vm5345_vm13, %v5530_v40  ;;  %5681 = vmatpush.msrb.mxu1 %v10302_v32  ;;  %5328 = vst.msk [vmem:[#allocation2 + $0x19] sm:$0x3] %vm5322_vm4, %v5195_v15  ;;  %v6029_v0 = vld [vmem:[#allocation2 + $0x1c] sm:$0x3] }
 0x262   : > { %5852 = vmatpush.msra.mxu0 %v10183_v37  ;;  %7646 = vmatmul.msk.f32.vlgmr.msra.gmra.mxu3 %vm5345_vm13, %v5341_v17  ;;  %v5635_v41 = vld [vmem:[#allocation2 + $0x1c] sm:$0x3] }
 0x263   : > { %6057 = vrot.lane.b32.xlu0 %v6027_v22, %s8023_s8  ;;  %6267 = vrot.lane.b32.xlu2 %v6237_v23, %s8023_s8  ;;  %v6448_v4 = vld [vmem:[#allocation2 + $0x1c] sm:$0x3]  ;;  %v6346_v22 = vld [vmem:[#allocation2 + $0x11] sm:$0x3] }
 0x264   : > { %5623 = vmatpush.msra.mxu3 %v10265_v42  ;;  %7649 = vmatmul.msk.f32.vlgmr.msrb.gmra.mxu2 %vm5345_vm13, %v5334_v63  ;;  %v6239_v24 = vld [vmem:[#allocation2 + $0x20] sm:$0x3] }
 0x265   : > { %5703 = vmatpush.msrb.mxu2 %v10292_v29  ;;  %v5533_v52 = vld [vmem:[#allocation2 + $0x20] sm:$0x3] }
 0x266   : > { %7654 = vmatmul.msk.f32.vlgmr.msra.gmra.mxu1 %vm5345_vm13, %v5531_v56  ;;  %5624 = vmatpush.msra.mxu3 %v10272_v12  ;;  %v6138_v56 = vld [vmem:[#allocation2 + $0x1d] sm:$0x3] }
 0x267   : > { %5875 = vmatpush.msra.mxu1 %v10183_v37  ;;  %5704 = vmatpush.msrb.mxu2 %v10302_v32 }
 0x268   : > { %v5826_v25 = vld [vmem:[#allocation2 + $0x18] sm:$0x3] }
 0x269   : > { %7659 = vmatmul.msk.f32.vlgmr.msrb.gmra.mxu0 %vm5345_vm13, %v5633_v16  ;;  %v5335_v31 = vld [vmem:[#allocation2 + $0x18] sm:$0x3]  ;;  %6002 = vrot.lane.b32.xlu1 %v5826_v25, %s8023_s8 }
 0x26a   : > { %5946 = vmatpush.msrb.mxu0 %v10206_v5  ;;  %7650 = vmatmul.msk.f32.vlgmr.msrb.gmra.mxu3 %vm5345_vm13, %v5335_v31  ;;  %v5532_v47 = vld [vmem:[#allocation2 + $0x18] sm:$0x3]  ;;  %v5928_v21 = vpop.permute.xlu2 %5927 }
 0x26b   : > { %6032 = vrot.lane.b32.xlu0 %v6026_v49, %s8023_s8  ;;  %6317 = vrot.lane.b32.xlu2 %v6239_v24, %s8023_s8  ;;  %v6238_v45 = vld [vmem:[#allocation2 + $0x18] sm:$0x3] }
 0x26c   : > { %7655 = vmatmul.msk.f32.vlgmr.msra.gmra.mxu2 %vm5345_vm13, %v5532_v47  ;;  %5726 = vmatpush.msrb.mxu3 %v10292_v29  ;;  %v5831_v13 = vld [vmem:[#allocation2 + $0x19] sm:$0x3] }
 0x26d   : > { %5898 = vmatpush.msra.mxu2 %v10183_v37  ;;  %v6347_v23 = vld [vmem:[#allocation2 + $0x19] sm:$0x3] }
 0x26e   : > { %7660 = vmatmul.msk.f32.vlgmr.msrb.gmra.mxu1 %vm5345_vm13, %v5634_v60  ;;  %5727 = vmatpush.msrb.mxu3 %v10302_v32 }
 0x26f   : > { %5971 = vmatpush.msrb.mxu1 %v10206_v5 }
 0x271   : > { %6107 = vrot.lane.b32.xlu1 %v6029_v0, %s8023_s8  ;;  %7667 = vmatmul.msk.f32.vlgmr.msra.gmra.mxu0 %vm5833_vm12, %v5828_v3 }
 0x272   : > { %7656 = vmatmul.msk.f32.vlgmr.msra.gmra.mxu3 %vm5345_vm13, %v5533_v52  ;;  %6051 = vmatpush.msra.mxu0 %v10135_v61 }
 0x273   : > { %6292 = vrot.lane.b32.xlu0 %v6238_v45, %s8023_s8  ;;  %6452 = vrot.lane.b32.xlu2 %v6446_v36, %s8023_s8  ;;  %v6345_v45 = vld [vmem:[#allocation2 + $0x9] sm:$0x3] }
 0x274   : > { %7661 = vmatmul.msk.f32.vlgmr.msrb.gmra.mxu2 %vm5345_vm13, %v5635_v41  ;;  %5921 = vmatpush.msra.mxu3 %v10183_v37  ;;  %v6449_v37 = vld [vmem:[#allocation2 + $0x24] sm:$0x3] }
 0x275   : > { %5996 = vmatpush.msrb.mxu2 %v10206_v5 }
 0x276   : > { %7668 = vmatmul.msk.f32.vlgmr.msra.gmra.mxu1 %vm5833_vm12, %v5829_v20 }
 0x277   : > { %6076 = vmatpush.msra.mxu1 %v10135_v61 }
 0x279   : > { %6242 = vrot.lane.b32.xlu1 %v6236_v9, %s8023_s8  ;;  %7671 = vmatmul.msk.f32.vlgmr.msrb.gmra.mxu0 %vm5833_vm12, %v5928_v21 }
 0x27a   : > { %7662 = vmatmul.msk.f32.vlgmr.msrb.gmra.mxu3 %vm5345_vm13, %v5636_v44  ;;  %6158 = vmatpush.msrb.mxu0 %v10119_v34 }
 0x27b   : > { %6477 = vrot.lane.b32.xlu0 %v6447_v35, %s8023_s8  ;;  %6021 = vmatpush.msrb.mxu3 %v10206_v5 }
 0x27c   : > { %7669 = vmatmul.msk.f32.vlgmr.msra.gmra.mxu2 %vm5833_vm12, %v5830_v28 }
 0x27d   : > { %6101 = vmatpush.msra.mxu2 %v10135_v61 }
 0x281   : > { %6502 = vrot.lane.b32.xlu1 %v6448_v4, %s8023_s8 }
 0x282   : > { %7670 = vmatmul.msk.f32.vlgmr.msra.gmra.mxu3 %vm5833_vm12, %v5831_v13 }
 0x283   : > { %6527 = vrot.lane.b32.xlu0 %v6449_v37, %s8023_s8  ;;  %6126 = vmatpush.msra.mxu3 %v10135_v61  ;;  %v6556_v37 = vld [vmem:[#allocation2 + $0x15] sm:$0x3]  ;;  %s7196_s8 = sshll.u32 %s7193_s20, 4  ;;  %s7197_s8 = int_to_ptr.hbm [resolvable:$true] %s7196_s8 }
 0x284   : > { %s7966_s22 = sshra.s32 %s7197_s8, 4  ;;  %s7967_s22 = int_to_ptr.hbm [resolvable:$true] %s7966_s22 }
 0x285   : > { %p7973_p0 = scmp.lt.s32.totalorder %s7967_s22, %s10569_s7 }
 0x2b5   : > { %v6083_v7 = vpop.permute.xlu2 %6082 }
 0x2bd   : > { %v6268_v11 = vpop.permute.xlu2 %6267 }
 0x2c5   : > { %v6318_v31 = vpop.permute.xlu2 %6317 }
 0x2c9   : > { %v5978_v5 = vpop.permute.xlu1 %5977 }
 0x2ca   : > { %7673 = vmatmul.msk.f32.vlgmr.msrb.gmra.mxu2 %vm5833_vm12, %v5978_v5  ;;  %v6348_v5 = vld [vmem:[#allocation2 + $0x21] sm:$0x3] }
 0x2cb   : > { %6204 = vmatpush.msrb.mxu2 %v10119_v34 }
 0x2cc   : > { %v5953_v38 = vpop.permute.xlu0 %5952 }
 0x2cd   : > { %7672 = vmatmul.msk.f32.vlgmr.msrb.gmra.mxu1 %vm5833_vm12, %v5953_v38  ;;  %v6453_v3 = vpop.permute.xlu2 %6452 }
 0x2ce   : > { %v5366_v62 = vpop.f32.mrf.mxu0  ;;  %6181 = vmatpush.msrb.mxu1 %v10119_v34 }
 0x2d2   : > { %7678 = vmatmul.msk.f32.vlgmr.msra.gmra.mxu2 %vm5833_vm12, %v6083_v7 }
 0x2d3   : > { %v5389_v61 = vpop.f32.mrf.mxu1  ;;  %6311 = vmatpush.msra.mxu2 %v10272_v12 }
 0x2d5   : > { %v6058_v54 = vpop.permute.xlu0 %6057 }
 0x2d6   : > { %7677 = vmatmul.msk.f32.vlgmr.msra.gmra.mxu1 %vm5833_vm12, %v6058_v54  ;;  %v5458_v2 = vpop.f32.mrf.mxu0 }
 0x2d7   : > { %6286 = vmatpush.msra.mxu1 %v10272_v12  ;;  %v5459_v8 = vadd.f32 %v5458_v2, %v5366_v62  ;;  %v6557_v62 = vld [vmem:[#allocation2 + $0x1d] sm:$0x3] }
 0x2da   : > { %7683 = vmatmul.msk.f32.vlgmr.msrb.gmra.mxu2 %vm5833_vm12, %v6137_v55 }
 0x2db   : > { %v5481_v57 = vpop.f32.mrf.mxu1  ;;  %6414 = vmatpush.msrb.mxu2 %v10265_v42  ;;  %v6003_v53 = vpop.permute.xlu1 %6002 }
 0x2dc   : > { %7674 = vmatmul.msk.f32.vlgmr.msrb.gmra.mxu3 %vm5833_vm12, %v6003_v53  ;;  %v5482_v59 = vadd.f32 %v5481_v57, %v5389_v61 }
 0x2dd   : > { %v6033_v6 = vpop.permute.xlu0 %6032  ;;  %6227 = vmatpush.msrb.mxu3 %v10119_v34 }
 0x2de   : > { %7676 = vmatmul.msk.f32.vlgmr.msra.gmra.mxu0 %vm5833_vm12, %v6033_v6  ;;  %7682 = vmatmul.msk.f32.vlgmr.msrb.gmra.mxu1 %vm5833_vm12, %v6136_v33  ;;  %v5557_v39 = vpop.f32.mrf.mxu0  ;;  %v5412_v1 = vpop.f32.mrf.mxu2 }
 0x2df   : > { %6261 = vmatpush.msra.mxu0 %v10272_v12  ;;  %6391 = vmatpush.msrb.mxu1 %v10265_v42  ;;  %v5629_v14 = vadd.f32 %v5557_v39, %v5459_v8 }
 0x2e3   : > { %v5580_v26 = vpop.f32.mrf.mxu1  ;;  %v6108_v48 = vpop.permute.xlu1 %6107 }
 0x2e4   : > { %7679 = vmatmul.msk.f32.vlgmr.msra.gmra.mxu3 %vm5833_vm12, %v6108_v48  ;;  %v5630_v40 = vadd.f32 %v5580_v26, %v5482_v59 }
 0x2e5   : > { %v6293_v43 = vpop.permute.xlu0 %6292  ;;  %v5435_v27 = vpop.f32.mrf.mxu3  ;;  %6336 = vmatpush.msra.mxu3 %v10272_v12 }
 0x2e6   : > { %7681 = vmatmul.msk.f32.vlgmr.msrb.gmra.mxu0 %vm5833_vm12, %v6135_v46  ;;  %7687 = vmatmul.msk.f32.vlgmr.msra.gmra.mxu1 %vm5833_vm12, %v6268_v11  ;;  %v5660_v10 = vpop.f32.mrf.mxu0 }
 0x2e7   : > { %7688 = vmatmul.msk.f32.vlgmr.msra.gmra.mxu2 %vm5833_vm12, %v6293_v43  ;;  %v5732_v34 = vadd.f32 %v5660_v10, %v5629_v14  ;;  %6368 = vmatpush.msrb.mxu0 %v10265_v42  ;;  %v5504_v18 = vpop.f32.mrf.mxu2  ;;  %v6555_v10 = vld [vmem:[#allocation2 + $0xd] sm:$0x3] }
 0x2e8   : > { %6496 = vmatpush.msra.mxu1 %v10302_v32  ;;  %6521 = vmatpush.msra.mxu2 %v10302_v32  ;;  %v5505_v60 = vadd.f32 %v5504_v18, %v5412_v1 }
 0x2e9   : > { %v10399_v58 = vadd.f32 %v10390_v50, %v5732_v34 }
 0x2eb   : > { %v7663_v51 = vmul.f32 -1.442695, %v10399_v58  ;;  %v5683_v30 = vpop.f32.mrf.mxu1  ;;  %v6243_v63 = vpop.permute.xlu1 %6242 }
 0x2ec   : > { %v5733_v17 = vadd.f32 %v5683_v30, %v5630_v40  ;;  %7684 = vmatmul.msk.f32.vlgmr.msrb.gmra.mxu3 %vm5833_vm12, %v6138_v56 }
 0x2ed   : > { %7918 = vpow2.f32 %v7663_v51  ;;  %v5527_v12 = vpop.f32.mrf.mxu3  ;;  %6437 = vmatpush.msrb.mxu3 %v10265_v42  ;;  %v6478_v47 = vpop.permute.xlu0 %6477 }
 0x2ee   : > { %v10405_v15 = vadd.f32 %v10390_v50, %v5733_v17  ;;  %7692 = vmatmul.msk.f32.vlgmr.msrb.gmra.mxu1 %vm5833_vm12, %v6346_v22  ;;  %7686 = vmatmul.msk.f32.vlgmr.msra.gmra.mxu0 %vm5833_vm12, %v6243_v63  ;;  %v5528_v28 = vadd.f32 %v5527_v12, %v5435_v27  ;;  %v6558_v17 = vld [vmem:[#allocation2 + $0x25] sm:$0x3] }
 0x2ef   : > { %7693 = vmatmul.msk.f32.vlgmr.msrb.gmra.mxu2 %vm5833_vm12, %v6347_v23  ;;  %6601 = vmatpush.msrb.mxu1 %v10292_v29  ;;  %v5603_v49 = vpop.f32.mrf.mxu2 }
 0x2f0   : > { %v7664_v16 = vmul.f32 -1.442695, %v10405_v15  ;;  %6471 = vmatpush.msra.mxu0 %v10302_v32  ;;  %6624 = vmatpush.msrb.mxu2 %v10292_v29  ;;  %v5631_v52 = vadd.f32 %v5603_v49, %v5505_v60 }
 0x2f2   : > { %7920 = vpow2.f32 %v7664_v16 }
 0x2f3   : > { %v7919_v24 = vpop.eup %7918  ;;  %v6503_v0 = vpop.permute.xlu1 %6502 }
 0x2f4   : > { %v5755_v25 = vadd.f32 1.0, %v7919_v24  ;;  %7689 = vmatmul.msk.f32.vlgmr.msra.gmra.mxu3 %vm5833_vm12, %v6318_v31 }
 0x2f5   : > { %v5626_v42 = vpop.f32.mrf.mxu3  ;;  %6546 = vmatpush.msra.mxu3 %v10302_v32  ;;  %v6528_v8 = vpop.permute.xlu0 %6527 }
 0x2f6   : > { %7922 = vrcp.f32 %v5755_v25  ;;  %7697 = vmatmul.msk.f32.vlgmr.msra.gmra.mxu1 %vm5833_vm12, %v6478_v47  ;;  %7691 = vmatmul.msk.f32.vlgmr.msrb.gmra.mxu0 %vm5833_vm12, %v6345_v45  ;;  %v5632_v21 = vadd.f32 %v5626_v42, %v5528_v28  ;;  %v5770_v7 = vand.u32 2147483648, %v5755_v25  ;;  %v5768_v55 = vand.u32 2147483647, %v5755_v25  ;;  %v5877_v28 = vpop.f32.mrf.mxu1 }
 0x2f7   : > { %v5706_v20 = vpop.f32.mrf.mxu2  ;;  %7698 = vmatmul.msk.f32.vlgmr.msra.gmra.mxu2 %vm5833_vm12, %v6503_v0  ;;  %6578 = vmatpush.msrb.mxu0 %v10292_v29  ;;  %vm5764_vm14 = vweird.f32 %v5755_v25 }
 0x2f8   : > { %v7921_v36 = vpop.eup %7920  ;;  %v5734_v44 = vadd.f32 %v5706_v20, %v5631_v52  ;;  %v5771_v39 = vor.u32 1.1754944e-38, %v5770_v7  ;;  %vm5769_vm3 = vcmp.eq.f32.partialorder %v5768_v55, 8.507059e+37 }
 0x2f9   : > { %v5756_v41 = vadd.f32 1.0, %v7921_v36 }
 0x2fa   : > { %v10423_v9 = vadd.f32 %v10390_v50, %v5734_v44 }
 0x2fb   : > { %7924 = vrcp.f32 %v5756_v41  ;;  %v5785_v11 = vand.u32 2147483648, %v5756_v41  ;;  %v5783_v46 = vand.u32 2147483647, %v5756_v41  ;;  %vm5779_vm1 = vweird.f32 %v5756_v41 }
 0x2fc   : > { %v7923_v35 = vpop.eup %7922  ;;  %v7665_v13 = vmul.f32 -1.442695, %v10423_v9  ;;  %7694 = vmatmul.msk.f32.vlgmr.msrb.gmra.mxu3 %vm5833_vm12, %v6348_v5 }
 0x2fd   : > { %v5760_v4 = vmul.f32 %v7923_v35, %v5755_v25  ;;  %v5729_v32 = vpop.f32.mrf.mxu3  ;;  %6647 = vmatpush.msrb.mxu3 %v10292_v29  ;;  %vm5765_vm13 = vweird.f32 %v7923_v35  ;;  %v5786_v59 = vor.u32 1.1754944e-38, %v5785_v11  ;;  %vm5784_vm7 = vcmp.eq.f32.partialorder %v5783_v46, 8.507059e+37 }
 0x2fe   : > { %7702 = vmatmul.msk.f32.vlgmr.msrb.gmra.mxu1 %vm5833_vm12, %v6556_v37  ;;  %7926 = vpow2.f32 %v7665_v13  ;;  %7696 = vmatmul.msk.f32.vlgmr.msra.gmra.mxu0 %vm5833_vm12, %v6453_v3  ;;  %v5735_v54 = vadd.f32 %v5729_v32, %v5632_v21  ;;  %vm5766_vm10 = vmor %vm5764_vm14, %vm5765_vm13 }
 0x2ff   : > { %v5761_v38 = vsub.f32 1.0, %v5760_v4  ;;  %7703 = vmatmul.msk.f32.vlgmr.msrb.gmra.mxu2 %vm5833_vm12, %v6557_v62  ;;  %v5900_v37 = vpop.f32.mrf.mxu2 }
 0x300   : > { %v10432_v6 = vadd.f32 %v10390_v50, %v5735_v54 }
 0x301   : > { %v7925_v61 = vpop.eup %7924  ;;  %v5762_v2 = vmul.f32 %v7923_v35, %v5761_v38 }
 0x302   : > { %v5775_v57 = vmul.f32 %v7925_v61, %v5756_v41  ;;  %v7666_v1 = vmul.f32 -1.442695, %v10432_v6  ;;  %vm5780_vm5 = vweird.f32 %v7925_v61 }
 0x303   : > { %v5763_v33 = vadd.f32 %v7923_v35, %v5762_v2  ;;  %vm5781_vm15 = vmor %vm5779_vm1, %vm5780_vm5 }
 0x304   : > { %v5776_v53 = vsub.f32 1.0, %v5775_v57  ;;  %v7927_v14 = vpop.eup %7926  ;;  %7928 = vpow2.f32 %v7666_v1  ;;  %7699 = vmatmul.msk.f32.vlgmr.msra.gmra.mxu3 %vm5833_vm12, %v6528_v8 }
 0x305   : > { %v5767_v26 = vsel %vm5766_vm10, %v7923_v35, %v5763_v33  ;;  %v5757_v27 = vadd.f32 1.0, %v7927_v14  ;;  %v5923_v38 = vpop.f32.mrf.mxu3 }
 0x306   : > { %v5772_v29 = vsel %vm5769_vm3, %v5771_v39, %v5767_v26  ;;  %v5777_v43 = vmul.f32 %v7925_v61, %v5776_v53  ;;  %7701 = vmatmul.msk.f32.vlgmr.msrb.gmra.mxu0 %vm5833_vm12, %v6555_v10  ;;  %vm288_vm3 = vcmask 59392  }
 0x307   : > { %v5819_v48 = vmul.f32 %v5772_v29, %v10399_v58  ;;  %7930 = vrcp.f32 %v5757_v27  ;;  %v5800_v56 = vand.u32 2147483648, %v5757_v27  ;;  %v5798_v16 = vand.u32 2147483647, %v5757_v27  ;;  %289 = vst.msk [vmem:[#allocation3] sm:$0x7] %vm288_vm3, %v8020_v19 }
 0x308   : > { %v5778_v34 = vadd.f32 %v7925_v61, %v5777_v43  ;;  %vm5794_vm2 = vweird.f32 %v5757_v27  ;;  %290 = vst.msk [vmem:[#allocation3 + $0x4] sm:$0x7] %vm288_vm3, %v8020_v19 }
 0x309   : > { %6744 = vrot.lane.b32.xlu2 %v5819_v48, %s8019_s17  ;;  %vm5799_vm11 = vcmp.eq.f32.partialorder %v5798_v16, 8.507059e+37  ;;  %294 = vst.msk [vmem:[#allocation3 + $0x14] sm:$0x7] %vm288_vm3, %v8020_v19 }
 0x30a   : > { %v5782_v18 = vsel %vm5781_vm15, %v7925_v61, %v5778_v34  ;;  %v7929_v30 = vpop.eup %7928  ;;  %291 = vst.msk [vmem:[#allocation3 + $0x8] sm:$0x7] %vm288_vm3, %v8020_v19 }
 0x30b   : > { %v5787_v40 = vsel %vm5784_vm7, %v5786_v59, %v5782_v18  ;;  %v5758_v22 = vadd.f32 1.0, %v7929_v30  ;;  %292 = vst.msk [vmem:[#allocation3 + $0xc] sm:$0x7] %vm288_vm3, %v8020_v19 }
 0x30c   : > { %v5820_v51 = vmul.f32 %v5787_v40, %v10405_v15  ;;  %7704 = vmatmul.msk.f32.vlgmr.msrb.gmra.mxu3 %vm5833_vm12, %v6558_v17  ;;  %v5801_v15 = vor.u32 1.1754944e-38, %v5800_v56  ;;  %293 = vst.msk [vmem:[#allocation3 + $0x10] sm:$0x7] %vm288_vm3, %v8020_v19 }
 0x30d   : > { %v7931_v58 = vpop.eup %7930  ;;  %7932 = vrcp.f32 %v5758_v22  ;;  %v5815_v36 = vand.u32 2147483648, %v5758_v22  ;;  %v5813_v52 = vand.u32 2147483647, %v5758_v22  ;;  %vm5809_vm13 = vweird.f32 %v5758_v22 }
 0x30e   : > { %6746 = vrot.lane.b32.xlu1 %v5820_v51, %s8019_s17  ;;  %v5790_v23 = vmul.f32 %v7931_v58, %v5757_v27  ;;  %vm5795_vm8 = vweird.f32 %v7931_v58 }
 0x30f   : > { %vm5796_vm9 = vmor %vm5794_vm2, %vm5795_vm8  ;;  %v5816_v41 = vor.u32 1.1754944e-38, %v5815_v36  ;;  %vm5814_vm10 = vcmp.eq.f32.partialorder %v5813_v52, 8.507059e+37 }
 0x310   : > { %v5791_v63 = vsub.f32 1.0, %v5790_v23 }
 0x312   : > { %v5792_v12 = vmul.f32 %v7931_v58, %v5791_v63 }
 0x313   : > { %v7933_v49 = vpop.eup %7932 }
 0x314   : > { %v5793_v24 = vadd.f32 %v7931_v58, %v5792_v12  ;;  %v5805_v25 = vmul.f32 %v7933_v49, %v5758_v22  ;;  %vm5810_vm0 = vweird.f32 %v7933_v49 }
 0x315   : > { %vm5811_vm14 = vmor %vm5809_vm13, %vm5810_vm0 }
 0x316   : > { %v5797_v31 = vsel %vm5796_vm9, %v7931_v58, %v5793_v24  ;;  %v5806_v60 = vsub.f32 1.0, %v5805_v25 }
 0x317   : > { %v5802_v47 = vsel %vm5799_vm11, %v5801_v15, %v5797_v31 }
 0x318   : > { %v5821_v45 = vmul.f32 %v5802_v47, %v10423_v9  ;;  %v5807_v0 = vmul.f32 %v7933_v49, %v5806_v60  ;;  %v5854_v9 = vpop.f32.mrf.mxu0 }
 0x31a   : > { %6748 = vrot.lane.b32.xlu0 %v5821_v45, %s8019_s17  ;;  %v5808_v42 = vadd.f32 %v7933_v49, %v5807_v0 }
 0x31c   : > { %v5812_v20 = vsel %vm5811_vm14, %v7933_v49, %v5808_v42 }
 0x31d   : > { %v5817_v44 = vsel %vm5814_vm10, %v5816_v41, %v5812_v20 }
 0x31e   : > { %v5822_v35 = vmul.f32 %v5817_v44, %v10432_v6 }
 0x320   : > { %6750 = vrot.lane.b32.xlu1 %v5822_v35, %s8019_s17  ;;  %v5948_v3 = vpop.f32.mrf.mxu0  ;;  %s7968_s17 = scalar_lea.hbm %s7967_s22, 4 }
 0x321   : > { %v5949_v27 = vadd.f32 %v5948_v3, %v5854_v9  ;;  %v6766_v3 = vld [vmem:[#allocation3] sm:$0x3]  ;;  %p7969_p11 = scmp.ne.s32.totalorder %s7967_s22, %s7968_s17  ;;  %p7974_p1 = scmp.lt.s32.totalorder %s7972_s14, %s7968_s17 }
 0x323   : > { %p7970_p12 = pnand %p7969_p11, %p8104_p5  ;;  %p7975_p2 = por %p7974_p1, %p7973_p0 }
 0x325   : > { %p7971_p13 = pneg %p7970_p12 }
 0x327   : > { %p7976_p3 = pnand %p7975_p2, %p7971_p13 }
 0x34a   : > { %v5973_v4 = vpop.f32.mrf.mxu1 }
 0x34b   : > { %v5974_v53 = vadd.f32 %v5973_v4, %v5877_v28 }
 0x34d   : > { %v5998_v13 = vpop.f32.mrf.mxu2 }
 0x34e   : > { %v5999_v43 = vadd.f32 %v5998_v13, %v5900_v37  ;;  %v6768_v13 = vld [vmem:[%s10567_s5] sm:$0xff] }
 0x34f   : > { %6836 = vmatpush.msra.mxu2 %v6768_v13  ;;  %6859 = vmatpush.msra.mxu3 %v6768_v13 }
 0x350   : > { %7711 = vmatmul.msk.f32.vlgmr.msra.gmra.mxu2 %vm5833_vm12, %v6766_v3 }
 0x353   : > { %v6078_v21 = vpop.f32.mrf.mxu1 }
 0x354   : > { %v6132_v19 = vadd.f32 %v6078_v21, %v5974_v53 }
 0x355   : > { %v6103_v5 = vpop.f32.mrf.mxu2 }
 0x356   : > { %v6133_v10 = vadd.f32 %v6103_v5, %v5999_v43 }
 0x35b   : > { %v6053_v32 = vpop.f32.mrf.mxu0  ;;  %v6183_v62 = vpop.f32.mrf.mxu1 }
 0x35c   : > { %v6233_v11 = vadd.f32 %v6183_v62, %v6132_v19  ;;  %v6131_v59 = vadd.f32 %v6053_v32, %v5949_v27 }
 0x35d   : > { %v6206_v7 = vpop.f32.mrf.mxu2 }
 0x35e   : > { %v6234_v51 = vadd.f32 %v6206_v7, %v6133_v10  ;;  %v6769_v7 = vld [vmem:[#allocation3 + $0x1] sm:$0x3] }
 0x35f   : > { %v6023_v61 = vpop.f32.mrf.mxu3 }
 0x360   : > { %v6024_v42 = vadd.f32 %v6023_v61, %v5923_v38  ;;  %v6771_v38 = vld [vmem:[%s10567_s5 + $0x8] sm:$0xff] }
 0x361   : > { %6790 = vmatpush.msra.mxu0 %v6771_v38  ;;  %6813 = vmatpush.msra.mxu1 %v6771_v38 }
 0x362   : > { %7709 = vmatmul.msk.f32.vlgmr.msra.gmra.mxu0 %vm5833_vm12, %v6769_v7 }
 0x363   : > { %v6160_v54 = vpop.f32.mrf.mxu0  ;;  %v6288_v2 = vpop.f32.mrf.mxu1 }
 0x364   : > { %v6745_v55 = vpop.permute.xlu2 %6744  ;;  %v6342_v29 = vadd.f32 %v6288_v2, %v6233_v11  ;;  %v6232_v22 = vadd.f32 %v6160_v54, %v6131_v59  ;;  %v7713_v11 = vld [vmem:[%s10567_s5 + $0x10] sm:$0xff] }
 0x365   : > { %6757 = vst.msk [vmem:[#allocation3 + $0x4] sm:$0x3] %vm5231_vm6, %v6745_v55  ;;  %6886 = vmatpush.msrb.mxu0 %v7713_v11  ;;  %6909 = vmatpush.msrb.mxu1 %v7713_v11 }
 0x367   : > { %v6128_v6 = vpop.f32.mrf.mxu3 }
 0x368   : > { %v6134_v35 = vadd.f32 %v6128_v6, %v6024_v42 }
 0x36a   : > { %v6313_v57 = vpop.f32.mrf.mxu2 }
 0x36b   : > { %v6393_v33 = vpop.f32.mrf.mxu1  ;;  %v6263_v39 = vpop.f32.mrf.mxu0  ;;  %v6343_v58 = vadd.f32 %v6313_v57, %v6234_v51 }
 0x36c   : > { %v6443_v46 = vadd.f32 %v6393_v33, %v6342_v29  ;;  %v6341_v63 = vadd.f32 %v6263_v39, %v6232_v22 }
 0x36f   : > { %v6229_v8 = vpop.f32.mrf.mxu3 }
 0x370   : > { %v6235_v37 = vadd.f32 %v6229_v8, %v6134_v35  ;;  %v7728_v35 = vld [vmem:[%s10567_s5 + $0x38] sm:$0xff] }
 0x372   : > { %v6416_v1 = vpop.f32.mrf.mxu2 }
 0x373   : > { %v6498_v26 = vpop.f32.mrf.mxu1  ;;  %v6370_v14 = vpop.f32.mrf.mxu0  ;;  %v6444_v12 = vadd.f32 %v6416_v1, %v6343_v58 }
 0x374   : > { %v6552_v34 = vadd.f32 %v6498_v26, %v6443_v46  ;;  %v6442_v49 = vadd.f32 %v6370_v14, %v6341_v63  ;;  %v7716_v26 = vld [vmem:[%s10567_s5 + $0x18] sm:$0xff]  ;;  %v7722_v14 = vld [vmem:[%s10567_s5 + $0x28] sm:$0xff] }
 0x375   : > { %6937 = vmatpush.msrb.mxu2 %v7716_v26  ;;  %6960 = vmatpush.msrb.mxu3 %v7716_v26 }
 0x377   : > { %v6338_v48 = vpop.f32.mrf.mxu3  ;;  %7040 = vmatpush.msra.mxu2 %v7722_v14 }
 0x378   : > { %v6344_v4 = vadd.f32 %v6338_v48, %v6235_v37 }
 0x37a   : > { %v6523_v18 = vpop.f32.mrf.mxu2 }
 0x37b   : > { %v6603_v40 = vpop.f32.mrf.mxu1  ;;  %v6473_v30 = vpop.f32.mrf.mxu0  ;;  %v6553_v15 = vadd.f32 %v6523_v18, %v6444_v12 }
 0x37c   : > { %v6653_v17 = vadd.f32 %v6603_v40, %v6552_v34  ;;  %v6551_v25 = vadd.f32 %v6473_v30, %v6442_v49 }
 0x37e   : > { %v10454_v23 = vadd.f32 %v10390_v50, %v6653_v17 }
 0x37f   : > { %v6439_v24 = vpop.f32.mrf.mxu3 }
 0x380   : > { %v6747_v56 = vpop.permute.xlu1 %6746  ;;  %v7706_v16 = vmul.f32 -1.442695, %v10454_v23  ;;  %v6445_v5 = vadd.f32 %v6439_v24, %v6344_v4 }
 0x381   : > { %6758 = vst.msk [vmem:[#allocation3 + $0x8] sm:$0x3] %vm5231_vm6, %v6747_v56 }
 0x382   : > { %7934 = vpow2.f32 %v7706_v16  ;;  %v6626_v31 = vpop.f32.mrf.mxu2 }
 0x383   : > { %v6654_v47 = vadd.f32 %v6626_v31, %v6553_v15  ;;  %v6580_v60 = vpop.f32.mrf.mxu0 }
 0x384   : > { %v6652_v45 = vadd.f32 %v6580_v60, %v6551_v25 }
 0x385   : > { %v10459_v36 = vadd.f32 %v10390_v50, %v6654_v47 }
 0x386   : > { %v10462_v0 = vadd.f32 %v10390_v50, %v6652_v45 }
 0x387   : > { %v7707_v41 = vmul.f32 -1.442695, %v10459_v36  ;;  %v6548_v28 = vpop.f32.mrf.mxu3 }
 0x388   : > { %v7935_v52 = vpop.eup %7934  ;;  %v7705_v44 = vmul.f32 -1.442695, %v10462_v0  ;;  %v6554_v2 = vadd.f32 %v6548_v28, %v6445_v5  ;;  %v7725_v28 = vld [vmem:[%s10567_s5 + $0x30] sm:$0xff] }
 0x389   : > { %v6673_v20 = vadd.f32 1.0, %v7935_v52  ;;  %7936 = vpow2.f32 %v7707_v41 }
 0x38b   : > { %7938 = vrcp.f32 %v6673_v20  ;;  %v6702_v53 = vand.u32 2147483648, %v6673_v20  ;;  %v6700_v19 = vand.u32 2147483647, %v6673_v20 }
 0x38c   : > { %7940 = vpow2.f32 %v7705_v44  ;;  %v6749_v9 = vpop.permute.xlu0 %6748 }
 0x38d   : > { %6759 = vst.msk [vmem:[#allocation3 + $0xc] sm:$0x3] %vm5231_vm6, %v6749_v9  ;;  %v6703_v46 = vor.u32 1.1754944e-38, %v6702_v53  ;;  %vm6701_vm15 = vcmp.eq.f32.partialorder %v6700_v19, 8.507059e+37  ;;  %v7123_v53 = vld [vmem:[#allocation3 + $0x15] sm:$0x3] }
 0x38f   : > { %v7937_v21 = vpop.eup %7936  ;;  %v6649_v55 = vpop.f32.mrf.mxu3 }
 0x390   : > { %v10474_v62 = vadd.f32 1.0, %v7937_v21  ;;  %v6655_v33 = vadd.f32 %v6649_v55, %v6554_v2 }
 0x391   : > { %v7939_v32 = vpop.eup %7938 }
 0x392   : > { %v7941_v61 = vpop.eup %7940  ;;  %v6692_v54 = vmul.f32 %v7939_v32, %v6673_v20  ;;  %7942 = vrcp.f32 %v10474_v62  ;;  %v6751_v39 = vpop.permute.xlu1 %6750  ;;  %vm6697_vm5 = vweird.f32 %v7939_v32  ;;  %v10480_v8 = vadd.f32 %v10390_v50, %v6655_v33  ;;  %v7719_v50 = vld [vmem:[%s10567_s5 + $0x20] sm:$0xff] }
 0x393   : > { %v6672_v6 = vadd.f32 1.0, %v7941_v61  ;;  %6760 = vst.msk [vmem:[#allocation3 + $0x10] sm:$0x3] %vm5231_vm6, %v6751_v39  ;;  %vm6696_vm6 = vweird.f32 %v6673_v20  ;;  %6989 = vmatpush.msra.mxu0 %v7719_v50  ;;  %v6717_v51 = vand.u32 2147483648, %v10474_v62  ;;  %v6715_v22 = vand.u32 2147483647, %v10474_v62 }
 0x394   : > { %v6693_v57 = vsub.f32 1.0, %v6692_v54  ;;  %vm6698_vm1 = vmor %vm6696_vm6, %vm6697_vm5  ;;  %v7708_v27 = vmul.f32 -1.442695, %v10480_v8  ;;  %vm6711_vm8 = vweird.f32 %v10474_v62  ;;  %v7071_v39 = vld [vmem:[#allocation3 + $0x14] sm:$0x3] }
 0x395   : > { %7944 = vrcp.f32 %v6672_v6  ;;  %v6687_v56 = vand.u32 2147483648, %v6672_v6  ;;  %v6718_v16 = vor.u32 1.1754944e-38, %v6717_v51  ;;  %vm6716_vm11 = vcmp.eq.f32.partialorder %v6715_v22, 8.507059e+37 }
 0x396   : > { %v6694_v1 = vmul.f32 %v7939_v32, %v6693_v57  ;;  %7946 = vpow2.f32 %v7708_v27  ;;  %vm6681_vm0 = vweird.f32 %v6672_v6 }
 0x397   : > { %v6688_v60 = vor.u32 1.1754944e-38, %v6687_v56  ;;  %v7789_v56 = vld [vmem:[%s10568_s6] ss:$0 sm:$0xff] }
 0x398   : > { %v6695_v29 = vadd.f32 %v7939_v32, %v6694_v1  ;;  %v7943_v43 = vpop.eup %7942 }
 0x399   : > { %v6707_v48 = vmul.f32 %v7943_v43, %v10474_v62  ;;  %vm6712_vm7 = vweird.f32 %v7943_v43 }
 0x39a   : > { %v6699_v10 = vsel %vm6698_vm1, %v7939_v32, %v6695_v29  ;;  %vm6713_vm2 = vmor %vm6711_vm8, %vm6712_vm7 }
 0x39b   : > { %v6704_v34 = vsel %vm6701_vm15, %v6703_v46, %v6699_v10  ;;  %v7945_v59 = vpop.eup %7944  ;;  %v6708_v40 = vsub.f32 1.0, %v6707_v48 }
 0x39c   : > { %v6737_v18 = vmul.f32 %v6704_v34, %v10454_v23  ;;  %v6677_v30 = vmul.f32 %v7945_v59, %v6672_v6  ;;  %v7947_v12 = vpop.eup %7946  ;;  %vm6682_vm9 = vweird.f32 %v7945_v59  ;;  %v6685_v23 = vand.u32 2147483647, %v6672_v6 }
 0x39d   : > { %v6709_v17 = vmul.f32 %v7943_v43, %v6708_v40  ;;  %v6675_v15 = vadd.f32 1.0, %v7947_v12  ;;  %vm6683_vm13 = vmor %vm6681_vm0, %vm6682_vm9 }
 0x39e   : > { %6762 = vst.msk [vmem:[#allocation3 + $0x9] sm:$0x3] %vm5322_vm4, %v6737_v18  ;;  %v6678_v58 = vsub.f32 1.0, %v6677_v30  ;;  %vm6686_vm14 = vcmp.eq.f32.partialorder %v6685_v23, 8.507059e+37 }
 0x39f   : > { %v6710_v63 = vadd.f32 %v7943_v43, %v6709_v17  ;;  %7948 = vrcp.f32 %v6675_v15  ;;  %v6732_v13 = vand.u32 2147483648, %v6675_v15  ;;  %v6730_v3 = vand.u32 2147483647, %v6675_v15 }
 0x3a0   : > { %v6679_v49 = vmul.f32 %v7945_v59, %v6678_v58  ;;  %vm6726_vm3 = vweird.f32 %v6675_v15 }
 0x3a1   : > { %v6714_v24 = vsel %vm6713_vm2, %v7943_v43, %v6710_v63  ;;  %v6733_v32 = vor.u32 1.1754944e-38, %v6732_v13  ;;  %vm6731_vm6 = vcmp.eq.f32.partialorder %v6730_v3, 8.507059e+37 }
 0x3a2   : > { %v6719_v25 = vsel %vm6716_vm11, %v6718_v16, %v6714_v24  ;;  %v6680_v31 = vadd.f32 %v7945_v59, %v6679_v49 }
 0x3a3   : > { %v6738_v47 = vmul.f32 %v6719_v25, %v10459_v36 }
 0x3a4   : > { %v6684_v45 = vsel %vm6683_vm13, %v7945_v59, %v6680_v31 }
 0x3a5   : > { %v6770_v52 = vld [vmem:[#allocation3 + $0x9] sm:$0x3]  ;;  %v6689_v41 = vsel %vm6686_vm14, %v6688_v60, %v6684_v45  ;;  %6763 = vst.msk [vmem:[#allocation3 + $0xd] sm:$0x3] %vm5322_vm4, %v6738_v47  ;;  %v7949_v36 = vpop.eup %7948 }
 0x3a6   : > { %v6767_v42 = vld [vmem:[#allocation3 + $0x8] sm:$0x3]  ;;  %7710 = vmatmul.msk.f32.vlgmr.msra.gmra.mxu1 %vm5833_vm12, %v6770_v52  ;;  %v6736_v20 = vmul.f32 %v6689_v41, %v10462_v0  ;;  %v6722_v44 = vmul.f32 %v7949_v36, %v6675_v15  ;;  %vm6727_vm10 = vweird.f32 %v7949_v36 }
 0x3a7   : > { %7712 = vmatmul.msk.f32.vlgmr.msra.gmra.mxu3 %vm5833_vm12, %v6767_v42  ;;  %7012 = vmatpush.msra.mxu1 %v7719_v50  ;;  %vm6728_vm5 = vmor %vm6726_vm3, %vm6727_vm10  ;;  %v6967_v54 = vld [vmem:[#allocation3 + $0x8] sm:$0x3] }
 0x3a8   : > { %7063 = vmatpush.msra.mxu3 %v7722_v14  ;;  %6761 = vst.msk [vmem:[#allocation3 + $0x5] sm:$0x3] %vm5322_vm4, %v6736_v20  ;;  %v6723_v37 = vsub.f32 1.0, %v6722_v44  ;;  %v7019_v2 = vld [vmem:[#allocation3 + $0x9] sm:$0x3] }
 0x3aa   : > { %v6724_v0 = vmul.f32 %v7949_v36, %v6723_v37 }
 0x3ac   : > { %v6865_v9 = vld [vmem:[#allocation3 + $0xc] sm:$0x3]  ;;  %v6725_v38 = vadd.f32 %v7949_v36, %v6724_v0 }
 0x3ad   : > { %v6917_v4 = vld [vmem:[#allocation3 + $0xd] sm:$0x3] }
 0x3ae   : > { %7715 = vmatmul.msk.f32.vlgmr.msrb.gmra.mxu1 %vm5833_vm12, %v6865_v9  ;;  %v6729_v62 = vsel %vm6728_vm5, %v7949_v36, %v6725_v38  ;;  %v7070_v6 = vld [vmem:[#allocation3 + $0xc] sm:$0x3] }
 0x3af   : > { %7718 = vmatmul.msk.f32.vlgmr.msrb.gmra.mxu3 %vm5833_vm12, %v6917_v4  ;;  %7115 = vmatpush.msrb.mxu1 %v7725_v28  ;;  %v6864_v21 = vld [vmem:[#allocation3 + $0x4] sm:$0x3]  ;;  %v6734_v7 = vsel %vm6731_vm6, %v6733_v32, %v6729_v62  ;;  %v7122_v33 = vld [vmem:[#allocation3 + $0xd] sm:$0x3] }
 0x3b0   : > { %7166 = vmatpush.msrb.mxu3 %v7728_v35  ;;  %v6916_v5 = vld [vmem:[#allocation3 + $0x5] sm:$0x3]  ;;  %7714 = vmatmul.msk.f32.vlgmr.msrb.gmra.mxu0 %vm5833_vm12, %v6864_v21  ;;  %v6739_v61 = vmul.f32 %v6734_v7, %v10480_v8 }
 0x3b1   : > { %7717 = vmatmul.msk.f32.vlgmr.msrb.gmra.mxu2 %vm5833_vm12, %v6916_v5  ;;  %7092 = vmatpush.msrb.mxu0 %v7725_v28 }
 0x3b2   : > { %7143 = vmatpush.msrb.mxu2 %v7728_v35  ;;  %6764 = vst.msk [vmem:[#allocation3 + $0x11] sm:$0x3] %vm5322_vm4, %v6739_v61  ;;  %vm7178_vm4 = vcmask 58368  }
 0x3b8   : > { %7720 = vmatmul.msk.f32.vlgmr.msra.gmra.mxu0 %vm5833_vm12, %v6967_v54 }
 0x3b9   : > { %7723 = vmatmul.msk.f32.vlgmr.msra.gmra.mxu2 %vm5833_vm12, %v7019_v2  ;;  %v6968_v55 = vld [vmem:[#allocation3 + $0x10] sm:$0x3] }
 0x3ba   : > { %v7020_v57 = vld [vmem:[#allocation3 + $0x11] sm:$0x3]  ;;  %7721 = vmatmul.msk.f32.vlgmr.msra.gmra.mxu1 %vm5833_vm12, %v6968_v55 }
 0x3bb   : > { %7724 = vmatmul.msk.f32.vlgmr.msra.gmra.mxu3 %vm5833_vm12, %v7020_v57 }
 0x3c0   : > { %7726 = vmatmul.msk.f32.vlgmr.msrb.gmra.mxu0 %vm5833_vm12, %v7070_v6 }
 0x3c1   : > { %7729 = vmatmul.msk.f32.vlgmr.msrb.gmra.mxu2 %vm5833_vm12, %v7122_v33 }
 0x3c2   : > { %7727 = vmatmul.msk.f32.vlgmr.msrb.gmra.mxu1 %vm5833_vm12, %v7071_v39 }
 0x3c3   : > { %7730 = vmatmul.msk.f32.vlgmr.msrb.gmra.mxu3 %vm5833_vm12, %v7123_v53 }
 0x3d3   : > { %v6838_v8 = vpop.f32.mrf.mxu2 }
 0x3df   : > { %v6792_v1 = vpop.f32.mrf.mxu0 }
 0x3e0   : > { %v6839_v50 = vadd.f32 %v6838_v8, %v6792_v1 }
 0x423   : > { %v6815_v19 = vpop.f32.mrf.mxu1 }
 0x42a   : > { %v6861_v26 = vpop.f32.mrf.mxu3 }
 0x42b   : > { %v6911_v14 = vpop.f32.mrf.mxu1  ;;  %v6862_v10 = vadd.f32 %v6861_v26, %v6815_v19 }
 0x42d   : > { %v6888_v11 = vpop.f32.mrf.mxu0  ;;  %v6915_v18 = vadd.f32 %v6911_v14, %v6862_v10 }
 0x42e   : > { %v6914_v46 = vadd.f32 %v6888_v11, %v6839_v50 }
 0x432   : > { %v6962_v27 = vpop.f32.mrf.mxu3 }
 0x433   : > { %v6966_v51 = vadd.f32 %v6962_v27, %v6915_v18 }
 0x434   : > { %v6939_v29 = vpop.f32.mrf.mxu2 }
 0x435   : > { %v6991_v43 = vpop.f32.mrf.mxu0  ;;  %v6965_v48 = vadd.f32 %v6939_v29, %v6914_v46 }
 0x437   : > { %v7014_v34 = vpop.f32.mrf.mxu1  ;;  %v7017_v40 = vadd.f32 %v6991_v43, %v6965_v48 }
 0x438   : > { %v7018_v58 = vadd.f32 %v7014_v34, %v6966_v51 }
 0x43c   : > { %v7042_v59 = vpop.f32.mrf.mxu2 }
 0x43d   : > { %v7068_v30 = vadd.f32 %v7042_v59, %v7017_v40  ;;  %v7094_v17 = vpop.f32.mrf.mxu0 }
 0x43e   : > { %v7065_v22 = vpop.f32.mrf.mxu3 }
 0x43f   : > { %v7120_v63 = vadd.f32 %v7094_v17, %v7068_v30  ;;  %v7069_v16 = vadd.f32 %v7065_v22, %v7018_v58  ;;  %v7117_v23 = vpop.f32.mrf.mxu1 }
 0x441   : > { %v7121_v15 = vadd.f32 %v7117_v23, %v7069_v16 }
 0x444   : > { %v7145_v12 = vpop.f32.mrf.mxu2 }
 0x445   : > { %v7171_v49 = vadd.f32 %v7145_v12, %v7120_v63 }
 0x446   : > { %v7168_v25 = vpop.f32.mrf.mxu3 }
 0x447   : > { %v7176_v24 = vadd.f32 %v7789_v56, %v7171_v49  ;;  %v7172_v31 = vadd.f32 %v7168_v25, %v7121_v15 }
 0x449   : > { %7179 = vst.msk [vmem:[%s271_s23] sm:$0x3] %vm7178_vm4, %v7176_v24  ;;  %v7177_v47 = vadd.f32 %v7789_v56, %v7172_v31 }
 0x44b   : > { %7180 = vst.msk [vmem:[%s271_s23 + $0x2] sm:$0x3] %vm7178_vm4, %v7177_v47 }
 0x44c   : > { %7979 = shalt.err (!%p7976_p3)
}
 0x44d   : > { %s8024_s13 = smov 32   ;;  %s8025_s18 = smov 2  }
 0x44e   : > { %7738 = dma.vmem_to_hbm [thread:$0]  (%p8104_p5), %s7195_s29, 64, %s7197_s8, %s7182_s28, %s8024_s13, %s8024_s13, %s8025_s18  }
 0x44f PF: > { %p7744_p4 = scmp.ge.s32.totalorder %s8014_s27, 2  ;;  %s7211_s19 = sand.u32 1, %s8002_s24  }
 0x450   : > { %s7212_s20 = scalar_lea.sflag [#allocation5], %s7211_s19 }
 0x451   : > { %p7741_p7 = pnand %p7744_p4, %p8108_p6 }
 0x453   : > { %p7742_p8 = pneg %p7741_p7 }
 0x455   : > { %7997 = dma.done.wait (%p7742_p8), %s7212_s20, 64  }
 0x456   : > { %7999 = vsyncadd (%p7742_p8), %s7212_s20, 4294967232  ;;  %p17_p9 = scmp.ge.s32.totalorder %s8091_s30, 4   ;;  %s10622_s24 = smov %s8006_s25 }
 0x457   : > { %s10623_s25 = smov %s8010_s26  ;;  %s10624_s26 = smov %s8102_s10 }
 0x458   : > { %s10625_s27 = smov %s8091_s30  ;;  %19 = sbr.rel (!%p17_p9) target bundleno = 3 (0x3), region = 94 }
 0x45d   :  { %7218 = vsyncpa [#allocation5], 1 }
 0x45e   :  { %7220 = vsyncpa [#allocation5 + $0x1], 1 }

</bundles_post_ra>
